<compile_context>
chip_gen: v7x
topology: tpu7x:2x2x1
jax: 0.10.0
libtpu: 0.0.40
codegen_flags: <defaults>
</compile_context>

<pallas_src>
import functools

import jax
import jax.numpy as jnp
from jax import lax
from jax.experimental import pallas as pl
from jax.experimental.pallas import tpu as pltpu

BN_EPS = 1e-5
_LANE = 128


# ----------------------------------------------------------------------------
# Small helpers
# ----------------------------------------------------------------------------
def _round_up(x, m):
    return (x + m - 1) // m * m


def _divisors_desc(n):
    return [d for d in range(n, 0, -1) if n % d == 0]


def _pad_vec(v, n, fill):
    v = jnp.asarray(v, jnp.float32)
    return jnp.pad(v, (0, n - v.shape[0]), constant_values=fill)


@functools.lru_cache(maxsize=1)
def _vmem_sizes():
    """Generation-aware VMEM sizing: (per-step tile budget, scoped limit)."""
    vmem_bytes = 64 * 1024 * 1024            # conservative default (v7x per-TC)
    try:
        info = pltpu.get_tpu_info()
        cap = getattr(info, "vmem_capacity_bytes", None)
        if cap:
            vmem_bytes = int(cap)
    except Exception:
        pass
    limit = min(int(vmem_bytes) * 3 // 4, 100 * 1024 * 1024)
    budget = limit // 2
    return budget, limit


def _choose_out_channel_tile(ci, co, w_itemsize, budget):
    # Prefer the widest multiple-of-128 divisor of co up to 256 (full MXU
    # width on v6e/v7x) whose double-buffered weight slab fits the budget.
    for tco in _divisors_desc(co):
        if tco % _LANE or tco > 256:
            continue
        if 2 * 9 * ci * tco * w_itemsize <= budget // 3:
            return tco
    return min(co, _LANE)


def _choose_conv_row_tile(h, w, ci, tco, x_it, w_it, y_it, xs_it, budget):
    w_bytes = 2 * 9 * ci * tco * w_it
    for th in _divisors_desc(h):
        tile_bytes = (
            2 * th * w * ci * x_it              # double-buffered main input rows
            + 4 * w * ci * x_it                 # double-buffered halo rows
            + w_bytes                           # double-buffered weight slab
            + 2 * th * w * tco * y_it           # double-buffered output block
            + (th + 2) * (w + 2) * ci * xs_it   # stitched input scratch
            + th * w * tco * 4                  # fp32 accumulator scratch
        )
        if tile_bytes <= budget:
            return th
    return 1


def _choose_pool_row_tile(h, ph, w, c, itemsize, budget):
    for th in _divisors_desc(h):
        if th % ph:
            continue
        if 4 * th * w * c * itemsize <= budget:
            return th
    return ph


# ----------------------------------------------------------------------------
# Kernel 1: 3x3 conv (stride 1, pad 1, no bias) + per-tile BN partial stats,
#           with an optional fused BN+ReLU of the *producer* layer on input.
# ----------------------------------------------------------------------------
def _conv3x3_stats_kernel(x_main_ref, x_top_ref, x_bot_ref, w_ref,
                          scale_ref, shift_ref, y_ref, stats_ref,
                          xs_ref, acc_ref,
                          *, apply_input_act, n_row_tiles, row_axis):
    th = xs_ref.shape[0] - 2
    wo = xs_ref.shape[1] - 2
    ci = xs_ref.shape[2]
    tco = w_ref.shape[2]

    def act(v):
        v = v.astype(jnp.float32)
        if apply_input_act:
            v = jnp.maximum(v * scale_ref[...] + shift_ref[...], 0.0)
        return v.astype(xs_ref.dtype)

    # Stitch the (th+2, wo+2, ci) halo'd tile in VMEM.  The fused producer
    # BN+ReLU (if any) is applied on the way in, so the post-BN activation
    # never round-trips through HBM.
    xs_ref[1:th + 1, 1:wo + 1, :] = act(x_main_ref[...])
    xs_ref[0:1, 1:wo + 1, :] = act(x_top_ref[...])
    xs_ref[th + 1:th + 2, 1:wo + 1, :] = act(x_bot_ref[...])

    # In-kernel spatial zero padding (no host-side jnp.pad of the activation).
    zcol = jnp.zeros((th + 2, 1, ci), xs_ref.dtype)
    xs_ref[:, 0:1, :] = zcol
    xs_ref[:, wo + 1:wo + 2, :] = zcol
    zrow = jnp.zeros((1, wo + 2, ci), xs_ref.dtype)
    row_tile = pl.program_id(row_axis)

    @pl.when(row_tile == 0)
    def _():
        xs_ref[0:1] = zrow

    @pl.when(row_tile == n_row_tiles - 1)
    def _():
        xs_ref[th + 1:th + 2] = zrow

    # 3 MXU matmuls (one per kernel row), K = 3*ci im2col slab over the three
    # width taps; accumulate into a VMEM fp32 scratch (bounded vreg footprint).
    for kh in range(3):
        rows = xs_ref[kh:kh + th, :, :]
        slab = jnp.concatenate(
            [rows[:, 0:wo, :], rows[:, 1:wo + 1, :], rows[:, 2:wo + 2, :]],
            axis=-1).reshape(th * wo, 3 * ci)
        part = jnp.dot(slab, w_ref[kh], preferred_element_type=jnp.float32)
        if kh == 0:
            acc_ref[...] = part
        else:
            acc_ref[...] += part

    acc = acc_ref[...]
    y_ref[...] = acc.reshape(th, wo, tco).astype(y_ref.dtype)

    # Per-tile BN partials: channel sum + sum of squared deviations from the
    # tile mean (combined host-side with Chan's parallel-variance formula ->
    # no catastrophic E[x^2]-E[x]^2 cancellation), written with one store.
    s1 = jnp.sum(acc, axis=0, keepdims=True)
    mean_t = s1 * (1.0 / (th * wo))
    dev = acc - mean_t
    ssd = jnp.sum(dev * dev, axis=0, keepdims=True)
    stats_ref[...] = jnp.concatenate([s1, ssd], axis=0)


def _conv3x3_stats(x_nhwc, w_k3, in_scale=None, in_shift=None,
                   out_dtype=None, row_tile=None, co_tile=None,
                   grid_order=None):
    n, h, w, ci = x_nhwc.shape
    assert w_k3.shape[0] == 3 and w_k3.shape[1] == 3 * ci, (w_k3.shape, ci)
    co = w_k3.shape[-1]
    out_dtype = out_dtype or x_nhwc.dtype
    x_it = jnp.dtype(x_nhwc.dtype).itemsize
    w_it = jnp.dtype(w_k3.dtype).itemsize
    y_it = jnp.dtype(out_dtype).itemsize
    budget, vmem_limit = _vmem_sizes()

    tco = co_tile or _choose_out_channel_tile(ci, co, w_it, budget)
    assert co % tco == 0 and tco % _LANE == 0, (co, tco)
    th = row_tile or _choose_conv_row_tile(h, w, ci, tco, x_it, w_it, y_it,
                                           w_it, budget)
    assert h % th == 0, (h, th)
    nrt = h // th
    nco = co // tco

    apply_act = in_scale is not None
    if not apply_act:
        in_scale = jnp.ones((1, ci), jnp.float32)
        in_shift = jnp.zeros((1, ci), jnp.float32)
    else:
        in_scale = in_scale.reshape(1, ci).astype(jnp.float32)
        in_shift = in_shift.reshape(1, ci).astype(jnp.float32)

    # HBM-traffic model to pick which operand stays resident innermost.
    x_bytes = n * h * w * ci * x_it
    w_bytes = 9 * ci * co * w_it
    if grid_order is None:
        rows_inner_bytes = nco * x_bytes + n * w_bytes
        co_inner_bytes = x_bytes + n * nrt * w_bytes
        grid_order = 'rows_inner' if rows_inner_bytes <= co_inner_bytes else 'co_inner'

    if grid_order == 'rows_inner':        # weight slab resident over inner axis
        grid = (n, nco, nrt)
        row_axis = 2

        def _bij(b, j, i):
            return b, i, j
    elif grid_order == 'co_inner':        # activation row-tile resident
        grid = (n, nrt, nco)
        row_axis = 1

        def _bij(b, i, j):
            return b, i, j
    else:
        raise ValueError(grid_order)

    def im_main(*g):
        b, i, j = _bij(*g)
        return (b, i, 0, 0)

    def im_top(*g):
        b, i, j = _bij(*g)
        return (b, jnp.maximum(i * th - 1, 0), 0, 0)      # clamped; zeroed in-kernel

    def im_bot(*g):
        b, i, j = _bij(*g)
        return (b, jnp.minimum((i + 1) * th, h - 1), 0, 0)  # clamped; zeroed in-kernel

    def im_w(*g):
        b, i, j = _bij(*g)
        return (0, 0, j)

    def im_vec(*g):
        return (0, 0)

    def im_out(*g):
        b, i, j = _bij(*g)
        return (b, i, 0, j)

    kernel = functools.partial(_conv3x3_stats_kernel, apply_input_act=apply_act,
                               n_row_tiles=nrt, row_axis=row_axis)

    flops = 2 * 9 * n * h * w * ci * co
    halo_bytes = n * nrt * 2 * w * ci * x_it
    if grid_order == 'rows_inner':
        in_bytes = nco * (x_bytes + halo_bytes) + n * w_bytes
    else:
        in_bytes = (x_bytes + halo_bytes) + n * nrt * w_bytes
    out_bytes = n * h * w * co * y_it + n * nrt * 2 * co * 4

    y, stats = pl.pallas_call(
        kernel,
        out_shape=(jax.ShapeDtypeStruct((n, h, w, co), out_dtype),
                   jax.ShapeDtypeStruct((n, nrt, 2, co), jnp.float32)),
        grid=grid,
        in_specs=[
            pl.BlockSpec((None, th, w, ci), im_main),
            pl.BlockSpec((None, 1, w, ci), im_top),
            pl.BlockSpec((None, 1, w, ci), im_bot),
            pl.BlockSpec((3, 3 * ci, tco), im_w),
            pl.BlockSpec((1, ci), im_vec),
            pl.BlockSpec((1, ci), im_vec),
        ],
        out_specs=(
            pl.BlockSpec((None, th, w, tco), im_out),
            pl.BlockSpec((None, None, 2, tco), im_out),
        ),
        scratch_shapes=[pltpu.VMEM((th + 2, w + 2, ci), w_k3.dtype),
                        pltpu.VMEM((th * w, tco), jnp.float32)],
        compiler_params=pltpu.CompilerParams(
            dimension_semantics=("parallel", "parallel", "parallel"),
            vmem_limit_bytes=vmem_limit),
        cost_estimate=pl.CostEstimate(flops=flops, transcendentals=0,
                                      bytes_accessed=in_bytes + out_bytes),
    )(x_nhwc, x_nhwc, x_nhwc, w_k3, in_scale, in_shift)
    return y, stats


def _bn_scale_shift(stats, gamma, beta, tile_count, total_count):
    """Finalize per-tile (sum, ssd) partials into per-channel (scale, shift)."""
    s1 = stats[:, :, 0, :]                      # (N, n_tiles, C) channel sums
    ssd = stats[:, :, 1, :]                     # sum((x - tile_mean)^2)
    mean = jnp.sum(s1, axis=(0, 1)) / total_count
    tile_mean = s1 / tile_count
    m2 = jnp.sum(ssd, axis=(0, 1)) + jnp.sum(
        tile_count * (tile_mean - mean) ** 2, axis=(0, 1))
    var = m2 / total_count                      # biased variance (PyTorch BN)
    inv_std = lax.rsqrt(var + BN_EPS)
    scale = gamma.astype(jnp.float32) * inv_std
    shift = beta.astype(jnp.float32) - mean * scale
    return scale.reshape(1, -1), shift.reshape(1, -1)


# ----------------------------------------------------------------------------
# Kernel 2: fused BN(affine)+ReLU + non-overlapping (ph, pw) pooling epilogue.
# ----------------------------------------------------------------------------
def _bn_relu_pool_kernel(x_ref, scale_ref, shift_ref, o_ref, *, ph, pw, pool_type):
    th, w, c = x_ref.shape
    h2, w2 = th // ph, w // pw

    x = jnp.maximum(x_ref[...].astype(jnp.float32) * scale_ref[...]
                    + shift_ref[...], 0.0)
    xw = x.reshape(h2, ph, w2, pw, c)
    if pool_type == 'avg':
        out = jnp.mean(xw, axis=(1, 3))
    elif pool_type == 'max':
        out = jnp.max(xw, axis=(1, 3))
    else:  # 'avg+max'
        out = jnp.mean(xw, axis=(1, 3)) + jnp.max(xw, axis=(1, 3))
    o_ref[...] = out.astype(o_ref.dtype)


def _bn_relu_pool(x_nhwc, scale, shift, pool_size, pool_type,
                  out_dtype=None, row_tile=None):
    if pool_type not in ('avg', 'max', 'avg+max'):
        raise Exception('Incorrect argument!')
    n, h, w, c = x_nhwc.shape
    ph, pw = pool_size
    assert h % ph == 0 and w % pw == 0, "pooling assumes divisible spatial dims"
    out_dtype = out_dtype or x_nhwc.dtype
    itemsize = jnp.dtype(x_nhwc.dtype).itemsize
    budget, vmem_limit = _vmem_sizes()
    if row_tile and row_tile % ph == 0 and h % row_tile == 0:
        th = row_tile
    else:
        th = _choose_pool_row_tile(h, ph, w, c, itemsize, budget)
    nrt = h // th

    kernel = functools.partial(_bn_relu_pool_kernel, ph=ph, pw=pw,
                               pool_type=pool_type)
    return pl.pallas_call(
        kernel,
        out_shape=jax.ShapeDtypeStruct((n, h // ph, w // pw, c), out_dtype),
        grid=(n, nrt),
        in_specs=[
            pl.BlockSpec((None, th, w, c), lambda b, i: (b, i, 0, 0)),
            pl.BlockSpec((1, c), lambda b, i: (0, 0)),
            pl.BlockSpec((1, c), lambda b, i: (0, 0)),
        ],
        out_specs=pl.BlockSpec((None, th // ph, w // pw, c),
                               lambda b, i: (b, i, 0, 0)),
        compiler_params=pltpu.CompilerParams(
            dimension_semantics=("parallel", "parallel"),
            vmem_limit_bytes=vmem_limit),
    )(x_nhwc, scale.astype(jnp.float32), shift.astype(jnp.float32))


# ----------------------------------------------------------------------------
# Public forward (NCHW in / NCHW out, like the PyTorch module)
# ----------------------------------------------------------------------------
def conv_block_forward(x_nchw, params, pool_size=(2, 2), pool_type='avg',
                       row_tile=None, co_tile=None, grid_order=None,
                       interm_dtype=jnp.bfloat16, mxu_dtype=jnp.bfloat16):
    if pool_type not in ('avg', 'max', 'avg+max'):
        raise Exception('Incorrect argument!')

    out_dtype = x_nchw.dtype
    x = jnp.transpose(x_nchw, (0, 2, 3, 1))                  # NCHW -> NHWC
    n, h, w, cin = x.shape
    assert params['w1'].shape[2] == cin
    cout = params['w1'].shape[-1]
    cin_p = _round_up(cin, _LANE)
    cout_p = _round_up(cout, _LANE)

    # Lane-dense channel padding (padded channels are zero end-to-end).
    x = jnp.pad(x, ((0, 0), (0, 0), (0, 0), (0, cin_p - cin)))
    w1 = jnp.pad(params['w1'], ((0, 0), (0, 0), (0, cin_p - cin), (0, cout_p - cout)))
    w2 = jnp.pad(params['w2'], ((0, 0), (0, 0), (0, cout_p - cout), (0, cout_p - cout)))
    # (3,3,Ci,Co) -> (3, 3*Ci, Co): per-kh kw-major im2col weight slabs, bf16.
    w1k = w1.reshape(3, 3 * cin_p, cout_p).astype(mxu_dtype)
    w2k = w2.reshape(3, 3 * cout_p, cout_p).astype(mxu_dtype)
    g1 = _pad_vec(params['g1'], cout_p, 1.0)
    b1 = _pad_vec(params['b1'], cout_p, 0.0)
    g2 = _pad_vec(params['g2'], cout_p, 1.0)
    b2 = _pad_vec(params['b2'], cout_p, 0.0)

    total = float(n * h * w)

    # conv1 (raw output) + per-tile batch stats
    y1, st1 = _conv3x3_stats(x, w1k, out_dtype=interm_dtype,
                             row_tile=row_tile, co_tile=co_tile,
                             grid_order=grid_order)
    tc1 = float((h // st1.shape[1]) * w)
    s1, t1 = _bn_scale_shift(st1, g1, b1, tc1, total)

    # conv2 with BN1+ReLU fused onto its input tiles, + per-tile batch stats
    y2, st2 = _conv3x3_stats(y1, w2k, in_scale=s1, in_shift=t1,
                             out_dtype=interm_dtype,
                             row_tile=row_tile, co_tile=co_tile,
                             grid_order=grid_order)
    tc2 = float((h // st2.shape[1]) * w)
    s2, t2 = _bn_scale_shift(st2, g2, b2, tc2, total)

    # BN2+ReLU fused into the pooling epilogue
    out = _bn_relu_pool(y2, s2, t2, pool_size, pool_type,
                        out_dtype=out_dtype, row_tile=row_tile)

    out = out[..., :cout]                                    # strip channel pad
    return jnp.transpose(out, (0, 3, 1, 2))                  # NHWC -> NCHW


# ----------------------------------------------------------------------------
# Deterministic parameter init (mirrors ConvBlock.__init__ / init_weight)
# ----------------------------------------------------------------------------
def init_conv_block_params(key, in_channels, out_channels):
    def xavier_uniform(k, out_c, in_c, kh, kw):
        fan_in = in_c * kh * kw
        fan_out = out_c * kh * kw
        bound = (6.0 / (fan_in + fan_out)) ** 0.5
        return jax.random.uniform(k, (out_c, in_c, kh, kw), jnp.float32,
                                  -bound, bound)

    k1, k2 = jax.random.split(key)
    w1_oihw = xavier_uniform(k1, out_channels, in_channels, 3, 3)
    w2_oihw = xavier_uniform(k2, out_channels, out_channels, 3, 3)
    params = {
        'w1': jnp.transpose(w1_oihw, (2, 3, 1, 0)),   # OIHW -> HWIO
        'w2': jnp.transpose(w2_oihw, (2, 3, 1, 0)),
        'g1': jnp.ones((out_channels,), jnp.float32),
        'b1': jnp.zeros((out_channels,), jnp.float32),
        'g2': jnp.ones((out_channels,), jnp.float32),
        'b2': jnp.zeros((out_channels,), jnp.float32),
    }
    return params, (w1_oihw, w2_oihw)


# ----------------------------------------------------------------------------
# Pure-JAX reference for correctness checks
# ----------------------------------------------------------------------------
def reference_forward(x_nchw, w1_oihw, w2_oihw, pool_size=(2, 2), pool_type='avg'):
    def conv(x, w):
        return lax.conv_general_dilated(
            x, w, window_strides=(1, 1), padding=((1, 1), (1, 1)),
            dimension_numbers=('NCHW', 'OIHW', 'NCHW'),
            precision=lax.Precision.HIGHEST)

    def bn_relu(x):
        mean = jnp.mean(x, axis=(0, 2, 3), keepdims=True)
        var = jnp.var(x, axis=(0, 2, 3), keepdims=True)
        return jax.nn.relu((x - mean) / jnp.sqrt(var + BN_EPS))

    x = bn_relu(conv(x_nchw, w1_oihw))
    x = bn_relu(conv(x, w2_oihw))
    n, c, h, w = x.shape
    ph, pw = pool_size
    xr = x.reshape(n, c, h // ph, ph, w // pw, pw)
    avg = xr.mean(axis=(3, 5))
    mx = xr.max(axis=(3, 5))
    if pool_type == 'avg':
        return avg
    if pool_type == 'max':
        return mx
    return avg + mx


if __name__ == "__main__":
    key = jax.random.PRNGKey(0)
    kx, kp, kx2, kp2 = jax.random.split(key, 4)

    # Main check: ConvBlock(4 -> 8) on a (2, 4, 16, 16) input.
    #  - 'avg' uses auto tiling (single row tile: both halo rows are zeroed)
    #  - 'avg+max' forces two row tiles (exercises cross-tile halos + pl.when)
    N, Cin, Cout, H, W = 2, 4, 8, 16, 16
    x = jax.random.normal(kx, (N, Cin, H, W), jnp.float32)
    params, (w1_oihw, w2_oihw) = init_conv_block_params(kp, Cin, Cout)

    for pool_type, rt in (('avg', None), ('avg+max', 8)):
        out = conv_block_forward(x, params, pool_size=(2, 2),
                                 pool_type=pool_type, row_tile=rt)
        out = jax.block_until_ready(out)
        assert out.shape == (N, Cout, H // 2, W // 2), out.shape
        ref = reference_forward(x, w1_oihw, w2_oihw, pool_size=(2, 2),
                                pool_type=pool_type)
        max_err = float(jnp.max(jnp.abs(out - ref)))
        assert jnp.allclose(out, ref, atol=5e-2, rtol=5e-2), (pool_type, max_err)

    # Secondary check: exercises the Cout-tile grid axis (nco=2) and the
    # 'co_inner' grid ordering (activation row-tile resident innermost).
    N2, Cin2, Cout2 = 1, 4, 256
    x2 = jax.random.normal(kx2, (N2, Cin2, H, W), jnp.float32)
    params2, (w1b, w2b) = init_conv_block_params(kp2, Cin2, Cout2)
    out2 = conv_block_forward(x2, params2, pool_size=(2, 2), pool_type='max',
                              row_tile=8, co_tile=128, grid_order='co_inner')
    out2 = jax.block_until_ready(out2)
    assert out2.shape == (N2, Cout2, H // 2, W // 2), out2.shape
    ref2 = reference_forward(x2, w1b, w2b, pool_size=(2, 2), pool_type='max')
    err2 = float(jnp.max(jnp.abs(out2 - ref2)))
    assert jnp.allclose(out2, ref2, atol=5e-2, rtol=5e-2), err2

    print("KERNEL_OK")
</pallas_src>

<mosaic_0001>
module attributes {stable_mosaic.version = 11 : i64} {
  func.func @_conv3x3_stats_kernel(%arg0: i32, %arg1: i32, %arg2: i32, %arg3: memref<1x16x16x128xf32, #tpu.memory_space<vmem>>, %arg4: memref<1x1x16x128xf32, #tpu.memory_space<vmem>>, %arg5: memref<1x1x16x128xf32, #tpu.memory_space<vmem>>, %arg6: memref<3x384x128xbf16, #tpu.memory_space<vmem>>, %arg7: memref<1x128xf32, #tpu.memory_space<vmem>>, %arg8: memref<1x128xf32, #tpu.memory_space<vmem>>, %arg9: memref<1x16x16x128xbf16, #tpu.memory_space<vmem>>, %arg10: memref<1x1x2x128xf32, #tpu.memory_space<vmem>>, %arg11: memref<18x18x128xbf16, #tpu.memory_space<vmem>>, %arg12: memref<256x128xf32, #tpu.memory_space<vmem>>) attributes {dimension_semantics = [#tpu.dimension_semantics<parallel>, #tpu.dimension_semantics<parallel>, #tpu.dimension_semantics<parallel>], iteration_bounds = array<i64: 2, 1, 1>, scalar_prefetch = 0 : i64, scratch_operands = 2 : i64, tpu.core_type = #tpu.core_type<tc>, window_params = [{transform_indices = @transform_0, window_bounds = array<i64: 1, 16, 16, 128>}, {transform_indices = @transform_1, window_bounds = array<i64: 1, 1, 16, 128>}, {transform_indices = @transform_2, window_bounds = array<i64: 1, 1, 16, 128>}, {transform_indices = @transform_3, window_bounds = array<i64: 3, 384, 128>}, {pipeline_mode = #tpu.pipeline_mode<synchronous>, transform_indices = @transform_4, window_bounds = array<i64: 1, 128>}, {pipeline_mode = #tpu.pipeline_mode<synchronous>, transform_indices = @transform_5, window_bounds = array<i64: 1, 128>}, {transform_indices = @transform_6, window_bounds = array<i64: 1, 16, 16, 128>}, {transform_indices = @transform_7, window_bounds = array<i64: 1, 1, 2, 128>}]} {
    %c0 = arith.constant 0 : index
    %c0_0 = arith.constant 0 : index
    %c0_1 = arith.constant 0 : index
    %c0_2 = arith.constant 0 : index
    %0 = vector.load %arg3[%c0, %c0_0, %c0_1, %c0_2] : memref<1x16x16x128xf32, #tpu.memory_space<vmem>>, vector<1x16x16x128xf32>
    %1 = vector.shape_cast %0 : vector<1x16x16x128xf32> to vector<16x16x128xf32>
    %2 = arith.truncf %1 : vector<16x16x128xf32> to vector<16x16x128xbf16>
    %c1 = arith.constant 1 : index
    %c1_3 = arith.constant 1 : index
    %c0_4 = arith.constant 0 : index
    %3 = vector.load %arg11[%c1, %c1_3, %c0_4] : memref<18x18x128xbf16, #tpu.memory_space<vmem>>, vector<16x16x128xbf16>
    tpu.vector_store %arg11[%c1, %c1_3, %c0_4], %2 {strides = array<i32>} : memref<18x18x128xbf16, #tpu.memory_space<vmem>>, vector<16x16x128xbf16>,
    %c0_5 = arith.constant 0 : index
    %c0_6 = arith.constant 0 : index
    %c0_7 = arith.constant 0 : index
    %c0_8 = arith.constant 0 : index
    %4 = vector.load %arg4[%c0_5, %c0_6, %c0_7, %c0_8] : memref<1x1x16x128xf32, #tpu.memory_space<vmem>>, vector<1x1x16x128xf32>
    %5 = vector.shape_cast %4 : vector<1x1x16x128xf32> to vector<1x16x128xf32>
    %6 = arith.truncf %5 : vector<1x16x128xf32> to vector<1x16x128xbf16>
    %c0_9 = arith.constant 0 : index
    %c1_10 = arith.constant 1 : index
    %c0_11 = arith.constant 0 : index
    %7 = vector.load %arg11[%c0_9, %c1_10, %c0_11] : memref<18x18x128xbf16, #tpu.memory_space<vmem>>, vector<1x16x128xbf16>
    tpu.vector_store %arg11[%c0_9, %c1_10, %c0_11], %6 {strides = array<i32>} : memref<18x18x128xbf16, #tpu.memory_space<vmem>>, vector<1x16x128xbf16>,
    %c0_12 = arith.constant 0 : index
    %c0_13 = arith.constant 0 : index
    %c0_14 = arith.constant 0 : index
    %c0_15 = arith.constant 0 : index
    %8 = vector.load %arg5[%c0_12, %c0_13, %c0_14, %c0_15] : memref<1x1x16x128xf32, #tpu.memory_space<vmem>>, vector<1x1x16x128xf32>
    %9 = vector.shape_cast %8 : vector<1x1x16x128xf32> to vector<1x16x128xf32>
    %10 = arith.truncf %9 : vector<1x16x128xf32> to vector<1x16x128xbf16>
    %c17 = arith.constant 17 : index
    %c1_16 = arith.constant 1 : index
    %c0_17 = arith.constant 0 : index
    %11 = vector.load %arg11[%c17, %c1_16, %c0_17] : memref<18x18x128xbf16, #tpu.memory_space<vmem>>, vector<1x16x128xbf16>
    tpu.vector_store %arg11[%c17, %c1_16, %c0_17], %10 {strides = array<i32>} : memref<18x18x128xbf16, #tpu.memory_space<vmem>>, vector<1x16x128xbf16>,
    %cst = arith.constant 0.000000e+00 : bf16
    %12 = vector.broadcast %cst : bf16 to vector<18x1x128xbf16>
    %c0_18 = arith.constant 0 : index
    %c0_19 = arith.constant 0 : index
    %c0_20 = arith.constant 0 : index
    %13 = vector.load %arg11[%c0_18, %c0_19, %c0_20] : memref<18x18x128xbf16, #tpu.memory_space<vmem>>, vector<18x1x128xbf16>
    tpu.vector_store %arg11[%c0_18, %c0_19, %c0_20], %12 {strides = array<i32>} : memref<18x18x128xbf16, #tpu.memory_space<vmem>>, vector<18x1x128xbf16>,
    %c0_21 = arith.constant 0 : index
    %c17_22 = arith.constant 17 : index
    %c0_23 = arith.constant 0 : index
    %14 = vector.load %arg11[%c0_21, %c17_22, %c0_23] : memref<18x18x128xbf16, #tpu.memory_space<vmem>>, vector<18x1x128xbf16>
    tpu.vector_store %arg11[%c0_21, %c17_22, %c0_23], %12 {strides = array<i32>} : memref<18x18x128xbf16, #tpu.memory_space<vmem>>, vector<18x1x128xbf16>,
    %cst_24 = arith.constant 0.000000e+00 : bf16
    %15 = vector.broadcast %cst_24 : bf16 to vector<1x18x128xbf16>
    %c0_i32 = arith.constant 0 : i32
    %16 = arith.cmpi eq, %arg2, %c0_i32 : i32
    %17 = arith.extui %16 : i1 to i32
    %c0_i32_25 = arith.constant 0 : i32
    %18 = arith.cmpi ne, %17, %c0_i32_25 : i32
    scf.if %18 {
      %c0_71 = arith.constant 0 : index
      %c0_72 = arith.constant 0 : index
      %c0_73 = arith.constant 0 : index
      %75 = vector.load %arg11[%c0_71, %c0_72, %c0_73] : memref<18x18x128xbf16, #tpu.memory_space<vmem>>, vector<1x18x128xbf16>
      tpu.vector_store %arg11[%c0_71, %c0_72, %c0_73], %15 {strides = array<i32>} : memref<18x18x128xbf16, #tpu.memory_space<vmem>>, vector<1x18x128xbf16>,
    } else {
    }
    %c0_i32_26 = arith.constant 0 : i32
    %19 = arith.cmpi eq, %arg2, %c0_i32_26 : i32
    %20 = arith.extui %19 : i1 to i32
    %c0_i32_27 = arith.constant 0 : i32
    %21 = arith.cmpi ne, %20, %c0_i32_27 : i32
    scf.if %21 {
      %c17_71 = arith.constant 17 : index
      %c0_72 = arith.constant 0 : index
      %c0_73 = arith.constant 0 : index
      %75 = vector.load %arg11[%c17_71, %c0_72, %c0_73] : memref<18x18x128xbf16, #tpu.memory_space<vmem>>, vector<1x18x128xbf16>
      tpu.vector_store %arg11[%c17_71, %c0_72, %c0_73], %15 {strides = array<i32>} : memref<18x18x128xbf16, #tpu.memory_space<vmem>>, vector<1x18x128xbf16>,
    } else {
    }
    %c0_28 = arith.constant 0 : index
    %c0_29 = arith.constant 0 : index
    %c0_30 = arith.constant 0 : index
    %22 = vector.load %arg11[%c0_28, %c0_29, %c0_30] : memref<18x18x128xbf16, #tpu.memory_space<vmem>>, vector<16x18x128xbf16>
    %23 = vector.extract_strided_slice %22 {offsets = [0, 0, 0], sizes = [16, 16, 128], strides = [1, 1, 1]} : vector<16x18x128xbf16> to vector<16x16x128xbf16>
    %24 = vector.extract_strided_slice %22 {offsets = [0, 1, 0], sizes = [16, 16, 128], strides = [1, 1, 1]} : vector<16x18x128xbf16> to vector<16x16x128xbf16>
    %25 = vector.extract_strided_slice %22 {offsets = [0, 2, 0], sizes = [16, 16, 128], strides = [1, 1, 1]} : vector<16x18x128xbf16> to vector<16x16x128xbf16>
    %26 = tpu.concatenate %23, %24, %25 in 2 : vector<16x16x128xbf16>, vector<16x16x128xbf16>, vector<16x16x128xbf16> -> vector<16x16x384xbf16>
    %27 = vector.shape_cast %26 : vector<16x16x384xbf16> to vector<256x384xbf16>
    %c0_31 = arith.constant 0 : index
    %c0_32 = arith.constant 0 : index
    %c0_33 = arith.constant 0 : index
    %28 = vector.load %arg6[%c0_31, %c0_32, %c0_33] : memref<3x384x128xbf16, #tpu.memory_space<vmem>>, vector<1x384x128xbf16>
    %29 = vector.shape_cast %28 : vector<1x384x128xbf16> to vector<384x128xbf16>
    %cst_34 = arith.constant dense<0.000000e+00> : vector<256x128xf32>
    %30 = tpu.matmul %27, %29, %cst_34 {dimension_numbers = #tpu.dot_dimension_numbers<[1], [0], [0], [1], [0, 0, 1, 1], [], []>} : vector<256x384xbf16>, vector<384x128xbf16>, vector<256x128xf32> -> vector<256x128xf32>
    %c0_35 = arith.constant 0 : index
    %c0_36 = arith.constant 0 : index
    %31 = vector.load %arg12[%c0_35, %c0_36] : memref<256x128xf32, #tpu.memory_space<vmem>>, vector<256x128xf32>
    tpu.vector_store %arg12[%c0_35, %c0_36], %30 {strides = array<i32>} : memref<256x128xf32, #tpu.memory_space<vmem>>, vector<256x128xf32>,
    %c1_37 = arith.constant 1 : index
    %c0_38 = arith.constant 0 : index
    %c0_39 = arith.constant 0 : index
    %32 = vector.load %arg11[%c1_37, %c0_38, %c0_39] : memref<18x18x128xbf16, #tpu.memory_space<vmem>>, vector<16x18x128xbf16>
    %33 = vector.extract_strided_slice %32 {offsets = [0, 0, 0], sizes = [16, 16, 128], strides = [1, 1, 1]} : vector<16x18x128xbf16> to vector<16x16x128xbf16>
    %34 = vector.extract_strided_slice %32 {offsets = [0, 1, 0], sizes = [16, 16, 128], strides = [1, 1, 1]} : vector<16x18x128xbf16> to vector<16x16x128xbf16>
    %35 = vector.extract_strided_slice %32 {offsets = [0, 2, 0], sizes = [16, 16, 128], strides = [1, 1, 1]} : vector<16x18x128xbf16> to vector<16x16x128xbf16>
    %36 = tpu.concatenate %33, %34, %35 in 2 : vector<16x16x128xbf16>, vector<16x16x128xbf16>, vector<16x16x128xbf16> -> vector<16x16x384xbf16>
    %37 = vector.shape_cast %36 : vector<16x16x384xbf16> to vector<256x384xbf16>
    %c1_40 = arith.constant 1 : index
    %c0_41 = arith.constant 0 : index
    %c0_42 = arith.constant 0 : index
    %38 = vector.load %arg6[%c1_40, %c0_41, %c0_42] : memref<3x384x128xbf16, #tpu.memory_space<vmem>>, vector<1x384x128xbf16>
    %39 = vector.shape_cast %38 : vector<1x384x128xbf16> to vector<384x128xbf16>
    %cst_43 = arith.constant dense<0.000000e+00> : vector<256x128xf32>
    %40 = tpu.matmul %37, %39, %cst_43 {dimension_numbers = #tpu.dot_dimension_numbers<[1], [0], [0], [1], [0, 0, 1, 1], [], []>} : vector<256x384xbf16>, vector<384x128xbf16>, vector<256x128xf32> -> vector<256x128xf32>
    %c0_44 = arith.constant 0 : index
    %c0_45 = arith.constant 0 : index
    %41 = vector.load %arg12[%c0_44, %c0_45] : memref<256x128xf32, #tpu.memory_space<vmem>>, vector<256x128xf32>
    %42 = arith.addf %41, %40 : vector<256x128xf32>
    %c0_46 = arith.constant 0 : index
    %c0_47 = arith.constant 0 : index
    %43 = vector.load %arg12[%c0_46, %c0_47] : memref<256x128xf32, #tpu.memory_space<vmem>>, vector<256x128xf32>
    tpu.vector_store %arg12[%c0_46, %c0_47], %42 {strides = array<i32>} : memref<256x128xf32, #tpu.memory_space<vmem>>, vector<256x128xf32>,
    %c2 = arith.constant 2 : index
    %c0_48 = arith.constant 0 : index
    %c0_49 = arith.constant 0 : index
    %44 = vector.load %arg11[%c2, %c0_48, %c0_49] : memref<18x18x128xbf16, #tpu.memory_space<vmem>>, vector<16x18x128xbf16>
    %45 = vector.extract_strided_slice %44 {offsets = [0, 0, 0], sizes = [16, 16, 128], strides = [1, 1, 1]} : vector<16x18x128xbf16> to vector<16x16x128xbf16>
    %46 = vector.extract_strided_slice %44 {offsets = [0, 1, 0], sizes = [16, 16, 128], strides = [1, 1, 1]} : vector<16x18x128xbf16> to vector<16x16x128xbf16>
    %47 = vector.extract_strided_slice %44 {offsets = [0, 2, 0], sizes = [16, 16, 128], strides = [1, 1, 1]} : vector<16x18x128xbf16> to vector<16x16x128xbf16>
    %48 = tpu.concatenate %45, %46, %47 in 2 : vector<16x16x128xbf16>, vector<16x16x128xbf16>, vector<16x16x128xbf16> -> vector<16x16x384xbf16>
    %49 = vector.shape_cast %48 : vector<16x16x384xbf16> to vector<256x384xbf16>
    %c2_50 = arith.constant 2 : index
    %c0_51 = arith.constant 0 : index
    %c0_52 = arith.constant 0 : index
    %50 = vector.load %arg6[%c2_50, %c0_51, %c0_52] : memref<3x384x128xbf16, #tpu.memory_space<vmem>>, vector<1x384x128xbf16>
    %51 = vector.shape_cast %50 : vector<1x384x128xbf16> to vector<384x128xbf16>
    %cst_53 = arith.constant dense<0.000000e+00> : vector<256x128xf32>
    %52 = tpu.matmul %49, %51, %cst_53 {dimension_numbers = #tpu.dot_dimension_numbers<[1], [0], [0], [1], [0, 0, 1, 1], [], []>} : vector<256x384xbf16>, vector<384x128xbf16>, vector<256x128xf32> -> vector<256x128xf32>
    %c0_54 = arith.constant 0 : index
    %c0_55 = arith.constant 0 : index
    %53 = vector.load %arg12[%c0_54, %c0_55] : memref<256x128xf32, #tpu.memory_space<vmem>>, vector<256x128xf32>
    %54 = arith.addf %53, %52 : vector<256x128xf32>
    %c0_56 = arith.constant 0 : index
    %c0_57 = arith.constant 0 : index
    %55 = vector.load %arg12[%c0_56, %c0_57] : memref<256x128xf32, #tpu.memory_space<vmem>>, vector<256x128xf32>
    tpu.vector_store %arg12[%c0_56, %c0_57], %54 {strides = array<i32>} : memref<256x128xf32, #tpu.memory_space<vmem>>, vector<256x128xf32>,
    %c0_58 = arith.constant 0 : index
    %c0_59 = arith.constant 0 : index
    %56 = vector.load %arg12[%c0_58, %c0_59] : memref<256x128xf32, #tpu.memory_space<vmem>>, vector<256x128xf32>
    %57 = vector.shape_cast %56 : vector<256x128xf32> to vector<16x16x128xf32>
    %58 = arith.truncf %57 : vector<16x16x128xf32> to vector<16x16x128xbf16>
    %c0_60 = arith.constant 0 : index
    %c0_61 = arith.constant 0 : index
    %c0_62 = arith.constant 0 : index
    %c0_63 = arith.constant 0 : index
    %59 = vector.load %arg9[%c0_60, %c0_61, %c0_62, %c0_63] : memref<1x16x16x128xbf16, #tpu.memory_space<vmem>>, vector<1x16x16x128xbf16>
    %60 = vector.shape_cast %59 : vector<1x16x16x128xbf16> to vector<16x16x128xbf16>
    %61 = vector.shape_cast %58 : vector<16x16x128xbf16> to vector<1x16x16x128xbf16>
    tpu.vector_store %arg9[%c0_60, %c0_61, %c0_62, %c0_63], %61 {strides = array<i32>} : memref<1x16x16x128xbf16, #tpu.memory_space<vmem>>, vector<1x16x16x128xbf16>,
    %cst_64 = arith.constant dense<0.000000e+00> : vector<128xf32>
    %62 = vector.multi_reduction <add>, %56, %cst_64 [0] : vector<256x128xf32> to vector<128xf32>
    %63 = vector.shape_cast %62 : vector<128xf32> to vector<1x128xf32>
    %cst_65 = arith.constant 3.906250e-03 : f32
    %64 = vector.broadcast %cst_65 : f32 to vector<1x128xf32>
    %65 = arith.mulf %63, %64 : vector<1x128xf32>
    %66 = vector.broadcast %65 : vector<1x128xf32> to vector<256x128xf32>
    %67 = arith.subf %56, %66 : vector<256x128xf32>
    %68 = arith.mulf %67, %67 : vector<256x128xf32>
    %cst_66 = arith.constant dense<0.000000e+00> : vector<128xf32>
    %69 = vector.multi_reduction <add>, %68, %cst_66 [0] : vector<256x128xf32> to vector<128xf32>
    %70 = vector.shape_cast %69 : vector<128xf32> to vector<1x128xf32>
    %71 = tpu.concatenate %63, %70 in 0 : vector<1x128xf32>, vector<1x128xf32> -> vector<2x128xf32>
    %c0_67 = arith.constant 0 : index
    %c0_68 = arith.constant 0 : index
    %c0_69 = arith.constant 0 : index
    %c0_70 = arith.constant 0 : index
    %72 = vector.load %arg10[%c0_67, %c0_68, %c0_69, %c0_70] : memref<1x1x2x128xf32, #tpu.memory_space<vmem>>, vector<1x1x2x128xf32>
    %73 = vector.shape_cast %72 : vector<1x1x2x128xf32> to vector<2x128xf32>
    %74 = vector.shape_cast %71 : vector<2x128xf32> to vector<1x1x2x128xf32>
    tpu.vector_store %arg10[%c0_67, %c0_68, %c0_69, %c0_70], %74 {strides = array<i32>} : memref<1x1x2x128xf32, #tpu.memory_space<vmem>>, vector<1x1x2x128xf32>,
    return
  }
  func.func @transform_0(%arg0: i32, %arg1: i32, %arg2: i32) -> (i32, i32, i32, i32) {
    %c0_i32 = arith.constant 0 : i32
    %c0_i32_0 = arith.constant 0 : i32
    %c0_i32_1 = arith.constant 0 : i32
    return %arg0, %arg2, %c0_i32, %c0_i32_0 : i32, i32, i32, i32
  }
  func.func @transform_1(%arg0: i32, %arg1: i32, %arg2: i32) -> (i32, i32, i32, i32) {
    %c16_i32 = arith.constant 16 : i32
    %0 = arith.muli %arg2, %c16_i32 : i32
    %c1_i32 = arith.constant 1 : i32
    %1 = arith.subi %0, %c1_i32 : i32
    %c0_i32 = arith.constant 0 : i32
    %2 = arith.maxsi %1, %c0_i32 : i32
    %c0_i32_0 = arith.constant 0 : i32
    %c0_i32_1 = arith.constant 0 : i32
    %c0_i32_2 = arith.constant 0 : i32
    return %arg0, %2, %c0_i32_0, %c0_i32_1 : i32, i32, i32, i32
  }
  func.func @transform_2(%arg0: i32, %arg1: i32, %arg2: i32) -> (i32, i32, i32, i32) {
    %c1_i32 = arith.constant 1 : i32
    %0 = arith.addi %arg2, %c1_i32 : i32
    %c16_i32 = arith.constant 16 : i32
    %1 = arith.muli %0, %c16_i32 : i32
    %c15_i32 = arith.constant 15 : i32
    %2 = arith.minsi %1, %c15_i32 : i32
    %c0_i32 = arith.constant 0 : i32
    %c0_i32_0 = arith.constant 0 : i32
    %c0_i32_1 = arith.constant 0 : i32
    return %arg0, %2, %c0_i32, %c0_i32_0 : i32, i32, i32, i32
  }
  func.func @transform_3(%arg0: i32, %arg1: i32, %arg2: i32) -> (i32, i32, i32) {
    %c0_i32 = arith.constant 0 : i32
    %c0_i32_0 = arith.constant 0 : i32
    %c0_i32_1 = arith.constant 0 : i32
    return %c0_i32, %c0_i32_0, %arg1 : i32, i32, i32
  }
  func.func @transform_4(%arg0: i32, %arg1: i32, %arg2: i32) -> (i32, i32) {
    %c0_i32 = arith.constant 0 : i32
    %c0_i32_0 = arith.constant 0 : i32
    %c0_i32_1 = arith.constant 0 : i32
    return %c0_i32, %c0_i32_0 : i32, i32
  }
  func.func @transform_5(%arg0: i32, %arg1: i32, %arg2: i32) -> (i32, i32) {
    %c0_i32 = arith.constant 0 : i32
    %c0_i32_0 = arith.constant 0 : i32
    %c0_i32_1 = arith.constant 0 : i32
    return %c0_i32, %c0_i32_0 : i32, i32
  }
  func.func @transform_6(%arg0: i32, %arg1: i32, %arg2: i32) -> (i32, i32, i32, i32) {
    %c0_i32 = arith.constant 0 : i32
    %c0_i32_0 = arith.constant 0 : i32
    return %arg0, %arg2, %c0_i32, %arg1 : i32, i32, i32, i32
  }
  func.func @transform_7(%arg0: i32, %arg1: i32, %arg2: i32) -> (i32, i32, i32, i32) {
    %c0_i32 = arith.constant 0 : i32
    %c0_i32_0 = arith.constant 0 : i32
    return %arg0, %arg2, %c0_i32, %arg1 : i32, i32, i32, i32
  }
}

</mosaic_0001>

<bundles_post_ra>
// kernel: tpu_custom_call.1
= control target key start
LH: loop header
LB: loop body
LE: loop exit
PB: predicated region body
PF: predicated region fallthrough
CT: control target
= control target key end

     0   :  { %s8292_s0 = inlined_call_operand.hbm [shape: f32[2,16,16,128], index: 0, kind: input, shape index: {}]   ;;  %s8293_s1 = inlined_call_operand.hbm [shape: f32[2,16,16,128], index: 1, kind: input, shape index: {}]   ;;  %s8294_s2 = inlined_call_operand.hbm [shape: f32[2,16,16,128], index: 2, kind: input, shape index: {}]   ;;  %s8295_s3 = inlined_call_operand.hbm [shape: bf16[3,384,128], index: 3, kind: input, shape index: {}]   ;;  %s8296_s4 = inlined_call_operand.vmem [shape: f32[1,128], index: 4, kind: input, shape index: {}]   ;;  %s8297_s5 = inlined_call_operand.vmem [shape: f32[1,128], index: 5, kind: input, shape index: {}]   ;;  %s8298_s6 = inlined_call_operand.hbm [shape: bf16[2,16,16,128], index: 6, kind: output, shape index: {0}]   ;;  %s8299_s7 = inlined_call_operand.hbm [shape: f32[2,1,2,128], index: 7, kind: output, shape index: {1}]  }
   0x1   :  { %8321 = sst [smem:[#allocation30_spill]] %s8293_s1 }
   0x2   :  { %8322 = sst [smem:[#allocation31_spill]] %s8299_s7 }
   0x3   :  { %13 = vsyncpa [#allocation5], 0 }
   0x4   :  { %15 = vsyncpa [#allocation5 + $0x1], 0 }
   0x5   :  { %16 = vsyncpa [#allocation8], 0 }
   0x6   :  { %18 = vsyncpa [#allocation8 + $0x1], 0 }
   0x7   :  { %19 = vsyncpa [#allocation11], 0 }
   0x8   :  { %20 = vsyncpa [#allocation6], 0 }
   0x9   :  { %22 = vsyncpa [#allocation6 + $0x1], 0 }
   0xa   :  { %23 = vsyncpa [#allocation14], 0 }
   0xb   :  { %25 = vsyncpa [#allocation14 + $0x1], 0  ;;  %s6716_s24 = smov 0   ;;  %s6718_s4 = smov 0  }
   0xc   :  { %s6720_s5 = smov 0   ;;  %s6722_s25 = smov 0  }
   0xd   :  { %s6724_s26 = smov 0   ;;  %s6726_s27 = smov 0  }
   0xe LB: > { %8323 = sst [smem:[#allocation20_spill]] %s6641_s24  ;;  %s50_s28 = sadd.s32 1, %s6657_s26  ;;  %s6661_s27 = sphi %s6726_s27, %s31_s27   ;;  %s6657_s26 = sphi %s6724_s26, %s8372_s26   ;;  %s6653_s25 = sphi %s6722_s25, %s8371_s25   ;;  %s6649_s5 = sphi %s6720_s5, %s8370_s5   ;;  %s6645_s4 = sphi %s6718_s4, %s8374_s4   ;;  %s6641_s24 = sphi %s6716_s24, %s8373_s24  }
   0xf   : > { %8324 = sst [smem:[#allocation21_spill]] %s6649_s5  ;;  %s59_s29 = sadd.s32 1, %s6649_s5 }
  0x10   : > { %8325 = sst [smem:[#allocation22_spill]] %s6657_s26  ;;  %p52_p0 = scmp.ge.s32.totalorder %s50_s28, 2 }
  0x11   : > { %8326 = sst [smem:[#allocation23_spill]] %s6661_s27  ;;  %p8300_p1 = scmp.ne.s32.totalorder %s6649_s5, %s6645_s4 }
  0x12   : > { %p67_p2 = scmp.eq.s32.totalorder %s6661_s27, 0  ;;  %s8376_s28 = smov (%p52_p0, %s50_s28), 0 }
  0x13   : > { %8327 = sst [smem:[#allocation24_spill]] %s8376_s28  ;;  %p6159_p5 = scmp.lt.s32.totalorder %s6661_s27, 2 }
  0x14   : > { %p68_p4 = por %p67_p2, %p8300_p1  ;;  %s54_s30 = ssub.s32 %s6657_s26, %s8376_s28 }
  0x15   : > { %s6761_s8 = sand.u32 1, %s6649_s5   ;;  %p57_p6 = scmp.eq.s32.totalorder %s54_s30, 0 }
  0x16   : > { %s6764_s9 = sshll.u32 %s6657_s26, 12  ;;  %p6766_p7 = pnand %p6159_p5, %p68_p4 }
  0x17   : > { %s6771_s11 = scalar_select %p57_p6, %s6649_s5, %s59_s29  }
  0x18   : > { %s8328_s10 = scalar_select %p6766_p7, 1, 0 }
  0x19   : > { %8329 = sst [smem:[#allocation25_spill]] %s6771_s11  ;;  %s341_s12 = sand.u32 1, %s6661_s27  }
  0x1a   : > { %s4970_s13 = sshll.u32 %s6761_s8, 4  ;;  %s8330_s1 = sld [smem:[#allocation30_spill]] }
  0x1b   : > { %s345_s17 = scalar_lea.vmem [#allocation7], %s4970_s13  ;;  %s6785_s19 = scalar_lea.sflag [#allocation8], %s341_s12 }
  0x1c   : > { %s358_s18 = sshll.u32 %s345_s17, 4  ;;  %p6791_p9 = pneg %p6766_p7  ;;  %s6783_s18 = int_to_ptr.vmem [resolvable:$true] %s358_s18 }
  0x1e   : > { %s8331_s21 = scalar_select %p6791_p9, 1, 0 }
  0x20   : > { %s6779_s16 = scalar_lea.hbm %s8330_s1, %s6764_s9  ;;  %s6426_s29 = scalar_lea.hbm %s8330_s1, 8192 }
  0x21   : > { %s6421_s20 = scalar_lea.hbm %s6779_s16, 256  ;;  %p6427_p12 = scmp.lt.u32.totalorder %s6779_s16, %s8330_s1 }
  0x22   : > { %p6422_p8 = scmp.ne.s32.totalorder %s6779_s16, %s6421_s20  ;;  %p6428_p13 = scmp.lt.u32.totalorder %s6426_s29, %s6421_s20 }
  0x23   : > { %p6430_p2 = scmp.lt.u32.totalorder %s6421_s20, %s6779_s16 }
  0x24   : > { %p6424_p10 = pnand %p6791_p9, %p6422_p8  ;;  %p6429_p0 = por %p6428_p13, %p6427_p12 }
  0x26   : > { %p6425_p11 = pneg %p6424_p10  ;;  %p6431_p4 = por %p6430_p2, %p6429_p0 }
  0x28   : > { %p6432_p5 = pnand %p6431_p4, %p6425_p11 }
  0x2a   : > { %6435 = shalt.err (!%p6432_p5)
}
  0x2b   : > { %s6436_s12 = scalar_lea.vmem %s6783_s18, 256  ;;  %s6663_s15 = smov [#allocation7]  }
  0x2c   : > { %p6437_p6 = scmp.ne.s32.totalorder %s6783_s18, %s6436_s12  ;;  %s6441_s17 = sshll.u32 %s6663_s15, 4  ;;  %s6442_s17 = int_to_ptr.vmem [resolvable:$false] %s6441_s17 }
  0x2d   : > { %s6443_s22 = scalar_lea.vmem %s6442_s17, 512  ;;  %p6444_p3 = scmp.lt.s32.totalorder %s6783_s18, %s6442_s17 }
  0x2e   : > { %p6439_p8 = pnand %p6437_p6, %p6791_p9  ;;  %p6445_p1 = scmp.lt.s32.totalorder %s6443_s22, %s6436_s12 }
  0x30   : > { %p6440_p10 = pneg %p6439_p8  ;;  %p6446_p12 = por %p6445_p1, %p6444_p3 }
  0x32   : > { %p6447_p13 = pnand %p6446_p12, %p6440_p10 }
  0x34   : > { %6450 = shalt.err (!%p6447_p13)
}
  0x35   : > { %s8301_s20 = smov 128   ;;  %s8303_s23 = smov 8  }
  0x36   : > { %6147 = dma.hbm_to_vmem [thread:$0]  (!%p6766_p7), %s6779_s16, 256, %s6783_s18, %s6785_s19, %s8301_s20, %s8301_s20, %s8303_s23  }
  0x37   : > { %s372_s29 = scalar_lea.vmem [#allocation9], %s4970_s13  ;;  %s6823_s14 = sadd.s32 4294967295, %s6661_s27  }
  0x38   : > { %s385_s30 = sshll.u32 %s372_s29, 4  ;;  %s4963_s12 = sadd.s32 4294967294, %s6661_s27   ;;  %s6820_s30 = int_to_ptr.vmem [resolvable:$true] %s385_s30 }
  0x39   : > { %p72_p1 = scmp.ne.s32.totalorder %s6645_s4, %s6641_s24  ;;  %p8312_p3 = scmp.eq.s32.totalorder %s6823_s14, 0 }
  0x3a   : > { %p240_p11 = scmp.eq.s32.totalorder %s6823_s14, 1  ;;  %p246_p0 = scmp.eq.s32.totalorder %s4963_s12, 1 }
  0x3b   : > { %p6832_p2 = por %p8312_p3, %p72_p1  ;;  %p4964_p4 = scmp.ge.s32.totalorder %s6661_s27, 1 }
  0x3c   : > { %p8333_p5 = scmp.ne.s32.totalorder %s6649_s5, %s6645_s4  ;;  %p6844_p8 = por %p246_p0, %p72_p1 }
  0x3d   : > { %s8332_s13 = scalar_select %p6832_p2, 1, 0 }
  0x3e   : > { %p6840_p6 = por %p240_p11, %p8333_p5  ;;  %p283_p10 = scmp.lt.s32.totalorder %s6661_s27, 3 }
  0x3f   : > { %s8335_s18 = scalar_select %p6844_p8, 1, 0 }
  0x40   : > { %s8334_s16 = scalar_select %p6840_p6, 1, 0 }
  0x41   : > { %8336 = sst [smem:[#allocation26_spill]] %s8335_s18  ;;  %p6849_p12 = pnand %p4964_p4, %p283_p10 }
  0x42   : > { %s6666_s17 = smov [#allocation10]   ;;  %s4967_s29 = sshll.u32 %s6761_s8, 8 }
  0x43   : > { %s8337_s15 = scalar_select %p6849_p12, 1, 0 }
  0x44   : > { %s297_s22 = sshll.u32 %s6666_s17, 4  ;;  %p6137_p13 = pneg %p6849_p12  ;;  %s6853_s22 = int_to_ptr.vmem [resolvable:$true] %s297_s22 }
  0x45   : > { %s6862_s23 = scalar_lea.hbm %s8292_s0, %s6764_s9  ;;  %s321_s28 = scalar_lea.vmem [#allocation4], %s4967_s29 }
  0x46   : > { %p6866_p1 = pnand %p6137_p13, %p8312_p3  ;;  %s331_s26 = sshll.u32 %s321_s28, 4  ;;  %s6871_s26 = int_to_ptr.vmem [resolvable:$true] %s331_s26 }
  0x47   : > { %s6451_s27 = scalar_lea.hbm %s8295_s3, 9216 }
  0x48   : > { %p6452_p11 = scmp.ne.s32.totalorder %s8295_s3, %s6451_s27  ;;  %p6453_p0 = pneg %p6866_p1 }
  0x49   : > { %p6458_p10 = scmp.lt.u32.totalorder %s6451_s27, %s8295_s3 }
  0x4a   : > { %p6454_p4 = pnand %p6453_p0, %p6452_p11 }
  0x4c   : > { %p6455_p5 = pneg %p6454_p4 }
  0x4e   : > { %p6460_p13 = pnand %p6458_p10, %p6455_p5 }
  0x50   : > { %6463 = shalt.err (!%p6460_p13)
}
  0x51   : > { %s6464_s28 = scalar_lea.vmem %s6853_s22, 9216  ;;  %p6472_p2 = scmp.lt.s32.totalorder %s6853_s22, %s6853_s22 }
  0x52   : > { %p6465_p3 = scmp.ne.s32.totalorder %s6853_s22, %s6464_s28  ;;  %p6473_p12 = scmp.lt.s32.totalorder %s6464_s28, %s6464_s28 }
  0x54   : > { %p6467_p8 = pnand %p6465_p3, %p6453_p0  ;;  %p6474_p7 = por %p6473_p12, %p6472_p2 }
  0x56   : > { %p6468_p6 = pneg %p6467_p8 }
  0x58   : > { %p6475_p9 = pnand %p6474_p7, %p6468_p6 }
  0x5a   : > { %6478 = shalt.err (!%p6475_p9)
}
  0x5b   : > { %s6667_s24 = smov 64   ;;  %s6668_s5 = smov 4  }
  0x5c   : > { %6140 = dma.hbm_to_vmem [thread:$0]  (!%p6866_p1), %s8295_s3, 9216, %s6853_s22, [#allocation11], %s6667_s24, %s6667_s24, %s6668_s5  }
  0x5d   : > { %s318_s29 = scalar_lea.sflag [#allocation5], %s6761_s8  ;;  %s6479_s17 = scalar_lea.hbm %s6862_s23, 4096 }
  0x5e   : > { %p6480_p3 = scmp.ne.s32.totalorder %s6862_s23, %s6479_s17  ;;  %p8339_p7 = scmp.ne.s32.totalorder %s8331_s21, 0 }
  0x5f   : > { %s6484_s28 = scalar_lea.hbm %s8292_s0, 8192  ;;  %p6485_p6 = scmp.lt.u32.totalorder %s6862_s23, %s8292_s0 }
  0x60   : > { %p6482_p9 = pnand %p6480_p3, %p8339_p7  ;;  %p6486_p8 = scmp.lt.u32.totalorder %s6484_s28, %s6479_s17 }
  0x61   : > { %p6488_p11 = scmp.lt.u32.totalorder %s6479_s17, %s6862_s23 }
  0x62   : > { %p6483_p2 = pneg %p6482_p9  ;;  %p6487_p12 = por %p6486_p8, %p6485_p6 }
  0x64   : > { %p6489_p0 = por %p6488_p11, %p6487_p12 }
  0x66   : > { %p6490_p4 = pnand %p6489_p0, %p6483_p2 }
  0x68   : > { %6493 = shalt.err (!%p6490_p4)
}
  0x69   : > { %s6494_s1 = scalar_lea.vmem %s6871_s26, 4096  ;;  %s6669_s22 = smov [#allocation4]  }
  0x6a   : > { %p6495_p1 = scmp.ne.s32.totalorder %s6871_s26, %s6494_s1  ;;  %s6499_s24 = sshll.u32 %s6669_s22, 4  ;;  %s6500_s24 = int_to_ptr.vmem [resolvable:$false] %s6499_s24 }
  0x6b   : > { %s6501_s7 = scalar_lea.vmem %s6500_s24, 8192  ;;  %p6502_p13 = scmp.lt.s32.totalorder %s6871_s26, %s6500_s24 }
  0x6c   : > { %p6497_p5 = pnand %p6495_p1, %p8339_p7  ;;  %p6503_p3 = scmp.lt.s32.totalorder %s6501_s7, %s6494_s1 }
  0x6e   : > { %p6498_p10 = pneg %p6497_p5  ;;  %p6504_p9 = por %p6503_p3, %p6502_p13 }
  0x70   : > { %p6505_p6 = pnand %p6504_p9, %p6498_p10 }
  0x72   : > { %6508 = shalt.err (!%p6505_p6)
}
  0x73   : > { %p8340_p2 = scmp.ne.s32.totalorder %s8328_s10, 0  ;;  %s8341_s11 = smov 8  }
  0x74   : > { %s8342_s5 = smov 128   ;;  %s8343_s27 = sadd.s32 3840, %s6764_s9 }
  0x75   : > { %6144 = dma.hbm_to_vmem [thread:$0]  (!%p8340_p2), %s6862_s23, 4096, %s6871_s26, %s318_s29, %s8342_s5, %s8342_s5, %s8341_s11  }
  0x76   : > { %s6926_s20 = scalar_lea.hbm %s8294_s2, %s8343_s27  ;;  %s6514_s1 = scalar_lea.hbm %s8294_s2, 8192 }
  0x77   : > { %s6509_s12 = scalar_lea.hbm %s6926_s20, 256  ;;  %p6515_p0 = scmp.lt.u32.totalorder %s6926_s20, %s8294_s2 }
  0x78   : > { %p6510_p8 = scmp.ne.s32.totalorder %s6926_s20, %s6509_s12  ;;  %p6516_p4 = scmp.lt.u32.totalorder %s6514_s1, %s6509_s12 }
  0x79   : > { %p6518_p5 = scmp.lt.u32.totalorder %s6509_s12, %s6926_s20 }
  0x7a   : > { %p6512_p12 = pnand %p6510_p8, %p8339_p7  ;;  %p6517_p1 = por %p6516_p4, %p6515_p0 }
  0x7c   : > { %p6513_p11 = pneg %p6512_p12  ;;  %p6519_p10 = por %p6518_p5, %p6517_p1 }
  0x7e   : > { %p6520_p13 = pnand %p6519_p10, %p6513_p11 }
  0x80   : > { %6523 = shalt.err (!%p6520_p13)
}
  0x81   : > { %s6524_s23 = scalar_lea.vmem %s6820_s30, 256  ;;  %s6670_s29 = smov [#allocation9]  }
  0x82   : > { %p6525_p3 = scmp.ne.s32.totalorder %s6820_s30, %s6524_s23  ;;  %s6529_s22 = sshll.u32 %s6670_s29, 4  ;;  %s6530_s22 = int_to_ptr.vmem [resolvable:$false] %s6529_s22 }
  0x83   : > { %s6531_s24 = scalar_lea.vmem %s6530_s22, 512  ;;  %p6532_p8 = scmp.lt.s32.totalorder %s6820_s30, %s6530_s22 }
  0x84   : > { %p6527_p9 = pnand %p6525_p3, %p8339_p7  ;;  %p6533_p12 = scmp.lt.s32.totalorder %s6531_s24, %s6524_s23 }
  0x86   : > { %p6528_p6 = pneg %p6527_p9  ;;  %p6534_p0 = por %p6533_p12, %p6532_p8 }
  0x88   : > { %p6535_p4 = pnand %p6534_p0, %p6528_p6 }
  0x8a   : > { %6538 = shalt.err (!%p6535_p4)
}
  0x8b   : > { %6150 = dma.hbm_to_vmem [thread:$0]  (!%p8340_p2), %s6926_s20, 256, %s6820_s30, %s6785_s19, %s8342_s5, %s8342_s5, %s8341_s11  }
  0x8c   : > { %p8344_p7 = scmp.ne.s32.totalorder %s8337_s15, 0 }
  0x8e   : > { %397 = sbr.rel (%p8344_p7) target bundleno = 871 (0x367), region = 44 }
  0x95   : > { %s6956_s21 = sand.u32 1, %s6645_s4   ;;  %p8345_p11 = scmp.ne.s32.totalorder %s8332_s13, 0 }
  0x96   : > { %s4977_s7 = sshll.u32 %s6956_s21, 8  ;;  %s400_s27 = scalar_lea.sflag [#allocation5], %s6956_s21 }
  0x97   : > { %s6960_s18 = scalar_lea.vmem [#allocation4], %s4977_s7 }
  0x98   : > { %6620 = dma.done.wait (%p8345_p11), %s400_s27, 4096  }
  0x99   : > { %6622 = vsyncadd (%p8345_p11), %s400_s27, 4294963200  ;;  %s408_s10 = sand.u32 1, %s6823_s14   ;;  %s4978_s19 = sshll.u32 %s6956_s21, 4 }
  0x9a   : > { %s409_s30 = scalar_lea.sflag [#allocation8], %s408_s10  ;;  %s6968_s15 = scalar_lea.vmem [#allocation7], %s4978_s19 }
  0x9b   : > { %6624 = dma.done.wait (%p8345_p11), %s409_s30, 512  }
  0x9c   : > { %6626 = vsyncadd (%p8345_p11), %s409_s30, 4294966784  ;;  %s6974_s11 = scalar_lea.vmem [#allocation9], %s4978_s19  ;;  %p8346_p2 = scmp.eq.s32.totalorder %s6823_s14, 0 }
  0x9e   : > { %6628 = dma.done.wait (%p8346_p2), [#allocation11], 9216   ;;  %p8347_p1 = pmov %p8346_p2 }
  0x9f   : > { %v6980_v0 = vld [vmem:[#allocation10 + $0x80] sm:$0xff]   ;;  %v6984_v3 = vld [vmem:[#allocation10 + $0x88] sm:$0xff]   ;;  %v6987_v6 = vld [vmem:[#allocation10 + $0x90] sm:$0xff]   ;;  %vm610_vm0 = vsmask.f32 256  ;;  %vm934_vm2 = vcmask 1043456  }
  0xa0   : > { %6630 = vsyncadd (%p8347_p1), [#allocation11], 4294958080  ;;  %v6219_v1 = vld [vmem:[#allocation10 + $0x40] sm:$0xff]   ;;  %5947 = vmatprep.subr.bf16.mxu1 %v6980_v0  ;;  %v6222_v4 = vld [vmem:[#allocation10 + $0x48] sm:$0xff]   ;;  %vm611_vm1 = vsmask.f32 4368 }
  0xa1   : > { %v6220_v2 = vld [vmem:[#allocation10] sm:$0xff]   ;;  %5955 = vmatpush3.bf16.msra.mxu1 %v6980_v0  ;;  %5395 = vmatprep.subr.bf16.mxu0 %v6219_v1  ;;  %v6223_v5 = vld [vmem:[#allocation10 + $0x8] sm:$0xff]   ;;  %v6225_v7 = vld [vmem:[#allocation10 + $0x50] sm:$0xff]   ;;  %vm935_vm3 = vsmask.f32 7938  ;;  %vm941_vm4 = vcmask 1040384  }
  0xa2   : > { %5396 = vmatpush3.bf16.msra.mxu0 %v6220_v2  ;;  %5948 = vmatprep.subr.bf16.mxu1 %v6984_v3  ;;  %v6226_v8 = vld [vmem:[#allocation10 + $0x10] sm:$0xff]   ;;  %v6991_v9 = vld [vmem:[#allocation10 + $0x98] sm:$0xff]   ;;  %v6995_v12 = vld [vmem:[#allocation10 + $0xa0] sm:$0xff]   ;;  %vm1642_vm9 = vcmask 1046528   ;;  %vm1433_vm10 = vsmask.f32 7424 }
  0xa3   : > { %5397 = vmatprep.subr.bf16.mxu0 %v6222_v4  ;;  %v6228_v10 = vld [vmem:[#allocation10 + $0x58] sm:$0xff]   ;;  %v6231_v13 = vld [vmem:[#allocation10 + $0x60] sm:$0xff]   ;;  %v6999_v15 = vld [vmem:[#allocation10 + $0xa8] sm:$0xff]   ;;  %s4981_s14 = sshll.u32 %s6956_s21, 7  ;;  %s5298_s5 = sshll.u32 %s6653_s25, 11 }
  0xa4   : > { %v6229_v11 = vld [vmem:[#allocation10 + $0x18] sm:$0xff]   ;;  %v6232_v14 = vld [vmem:[#allocation10 + $0x20] sm:$0xff]   ;;  %v6234_v16 = vld [vmem:[#allocation10 + $0x68] sm:$0xff]   ;;  %s7982_s13 = scalar_lea.vmem [#allocation12], %s4981_s14  ;;  %s8135_s8 = scalar_lea.hbm %s8298_s6, %s5298_s5 }
  0xa5   : > { %5956 = vmatpush3.bf16.msra.mxu1 %v6984_v3  ;;  %v6235_v17 = vld [vmem:[#allocation10 + $0x28] sm:$0xff]   ;;  %v7003_v18 = vld [vmem:[#allocation10 + $0xb0] sm:$0xff]   ;;  %v6239_v21 = vld [vmem:[#allocation10 + $0xb8] sm:$0xff]   ;;  %s4761_s17 = sshll.u32 %s7982_s13, 4  ;;  %s4739_s28 = scalar_lea.sflag [#allocation6], %s6956_s21  ;;  %s8137_s17 = int_to_ptr.vmem [resolvable:$true] %s4761_s17 }
  0xa6   : > { %5398 = vmatpush3.bf16.msra.mxu0 %v6223_v5  ;;  %5949 = vmatprep.subr.bf16.mxu1 %v6987_v6  ;;  %v6237_v19 = vld [vmem:[#allocation10 + $0x70] sm:$0xff]   ;;  %v497_v23 = vld [vmem:[%s6960_s18 + $0x78] sm:$0xff]  ;;  %v498_v27 = vld [vmem:[%s6960_s18 + $0x80] sm:$0xff]  ;;  %s6539_s1 = scalar_lea.vmem %s8137_s17, 2048  ;;  %p8362_p10 = scmp.ne.s32.totalorder %s8334_s16, 0 }
  0xa7   : > { %5399 = vmatprep.subr.bf16.mxu0 %v6225_v7  ;;  %v6238_v20 = vld [vmem:[#allocation10 + $0x30] sm:$0xff]   ;;  %v6240_v24 = vld [vmem:[#allocation10 + $0x78] sm:$0xff]   ;;  %v5245_v26 = vpack.c.bf16 %v497_v23, %v497_v23  ;;  %v499_v28 = vld [vmem:[%s6960_s18 + $0x88] sm:$0xff]  ;;  %v5246_v29 = vpack.c.bf16 %v498_v27, %v498_v27  ;;  %p6540_p5 = scmp.ne.s32.totalorder %s8137_s17, %s6539_s1  ;;  %s6672_s26 = smov [#allocation12]  }
  0xa8   : > { %v496_v22 = vld [vmem:[%s6960_s18 + $0x70] sm:$0xff]  ;;  %v5247_v30 = vpack.c.bf16 %v499_v28, %v499_v28  ;;  %v6241_v35 = vld [vmem:[#allocation10 + $0x38] sm:$0xff]   ;;  %v988_v36 = vld [vmem:[#allocation2 + $0x60] sm:$0xf]  ;;  %s6543_s9 = sshll.u32 %s6672_s26, 4  ;;  %s6544_s9 = int_to_ptr.vmem [resolvable:$false] %s6543_s9 }
  0xa9   : > { %5957 = vmatpush3.bf16.msra.mxu1 %v6987_v6  ;;  %v5244_v25 = vpack.c.bf16 %v496_v22, %v496_v22  ;;  %v741_v33 = vshrl.u32 %v5245_v26, 16  ;;  %v744_v34 = vshll.u32 %v5245_v26, 16  ;;  %v992_v37 = vld [vmem:[#allocation2 + $0x68] sm:$0x1]  ;;  %v750_v38 = vshrl.u32 %v5246_v29, 16  ;;  %v6246_v42 = vld [vmem:[#allocation10 + $0x100] sm:$0xff]   ;;  %vm7014_vm5 = vmand %vm941_vm4, %vm610_vm0  ;;  %p6541_p13 = pnand %p6540_p5, %p8362_p10  ;;  %p6546_p9 = scmp.lt.s32.totalorder %s8137_s17, %s6544_s9 }
  0xaa   : > { %5400 = vmatpush3.bf16.msra.mxu0 %v6226_v8  ;;  %5950 = vmatprep.subr.bf16.mxu1 %v6991_v9  ;;  %v753_v39 = vshll.u32 %v5246_v29, 16  ;;  %v758_v40 = vshrl.u32 %v5247_v30, 16  ;;  %v761_v41 = vshll.u32 %v5247_v30, 16  ;;  %v995_v45 = vld [vmem:[#allocation2 + $0x6c] sm:$0xf]  ;;  %vm7021_vm6 = vmor %vm610_vm0, %vm611_vm1  ;;  %v1052_v56 = vld [vmem:[%s6968_s15 + $0x8] sm:$0xff] }
  0xab   : > { %5401 = vmatprep.subr.bf16.mxu0 %v6228_v10  ;;  %v733_v31 = vshrl.u32 %v5244_v25, 16  ;;  %v736_v32 = vshll.u32 %v5244_v25, 16  ;;  %v743_v44 = vrot.slane %v741_v33, 7  ;;  %v752_v47 = vrot.slane %v750_v38, 7  ;;  %v999_v49 = vld [vmem:[#allocation2 + $0x74] sm:$0x1]  ;;  %vm7028_vm7 = vmand %vm934_vm2, %vm935_vm3  ;;  %p6542_p3 = pneg %p6541_p13 }
  0xac   : > { %v760_v48 = vrot.slane %v758_v40, 7  ;;  %v1051_v50 = vld [vmem:[%s6968_s15] sm:$0xff]  ;;  %v5263_v10 = vpack.c.bf16 %v1052_v56, %v1052_v56  ;;  %v1079_v23 = vld [vmem:[#allocation2] sm:$0xf]  ;;  %vm7053_vm8 = vmand %vm941_vm4, %vm935_vm3  ;;  %s6545_s23 = scalar_lea.vmem %s6544_s9, 4096 }
  0xad   : > { %5958 = vmatpush3.bf16.msra.mxu1 %v6991_v9  ;;  %v735_v43 = vrot.slane %v733_v31, 7  ;;  %v746_v54 = vor.u32 %v744_v34, %v743_v44  ;;  %v748_v55 = vrot.slane %v743_v44, 4  ;;  %v755_v58 = vor.u32 %v753_v39, %v752_v47  ;;  %v500_v4 = vld [vmem:[%s6960_s18 + $0x90] sm:$0xff]  ;;  %v1002_v40 = vld [vmem:[#allocation2 + $0x78] sm:$0xf]  ;;  %p6547_p6 = scmp.lt.s32.totalorder %s6545_s23, %s6539_s1 }
  0xae   : > { %5402 = vmatpush3.bf16.msra.mxu0 %v6229_v11  ;;  %5951 = vmatprep.subr.bf16.mxu1 %v6995_v12  ;;  %v756_v59 = vrot.slane %v752_v47, 4  ;;  %v763_v60 = vor.u32 %v761_v41, %v760_v48  ;;  %v765_v61 = vrot.slane %v760_v48, 4  ;;  %v5262_v2 = vpack.c.bf16 %v1051_v50, %v1051_v50  ;;  %v501_v11 = vld [vmem:[%s6960_s18 + $0x98] sm:$0xff]  ;;  %v1083_v31 = vld [vmem:[#allocation2 + $0x8] sm:$0x1]  ;;  %v482_v41 = vld [vmem:[%s6960_s18] sm:$0xff] }
  0xaf   : > { %5403 = vmatprep.subr.bf16.mxu0 %v6231_v13  ;;  %v738_v52 = vor.u32 %v736_v32, %v735_v43  ;;  %v739_v53 = vrot.slane %v735_v43, 4  ;;  %v993_v1 = vsel %vm7014_vm5, %v748_v55, %v992_v37  ;;  %v996_v7 = vsel %vm7028_vm7, %v755_v58, %v995_v45  ;;  %v1006_v44 = vld [vmem:[#allocation2 + $0x80] sm:$0x1]  ;;  %v1009_v55 = vld [vmem:[#allocation2 + $0x84] sm:$0xf]  ;;  %p6548_p8 = por %p6547_p6, %p6546_p9 }
  0xb0   : > { %994 = vst [vmem:[#allocation2 + $0x68] sm:$0x1] %v993_v1  ;;  %v764_v5 = vsel %vm7021_vm6, %v756_v59, %v763_v60  ;;  %v1000_v8 = vsel %vm7014_vm5, %v765_v61, %v999_v49  ;;  %997 = vst [vmem:[#allocation2 + $0x6c] sm:$0xf] %v996_v7  ;;  %v1060_v13 = vshrl.u32 %v5262_v2, 16  ;;  %v1071_v22 = vshll.u32 %v5263_v10, 16 }
  0xb1   : > { %5959 = vmatpush3.bf16.msra.mxu1 %v6995_v12  ;;  %v747_v62 = vsel %vm7021_vm6, %v739_v53, %v746_v54  ;;  %v989_v63 = vsel %vm7028_vm7, %v738_v52, %v988_v36  ;;  %998 = vst [vmem:[#allocation2 + $0x70] sm:$0xf] %v764_v5  ;;  %1001 = vst [vmem:[#allocation2 + $0x74] sm:$0x1] %v1000_v8  ;;  %v483_v48 = vld [vmem:[%s6960_s18 + $0x8] sm:$0xff]  ;;  %v5230_v56 = vpack.c.bf16 %v482_v41, %v482_v41  ;;  %v6671_v7 = vmov 0   ;;  %p6549_p12 = pnand %p6548_p8, %p6542_p3 }
  0xb2   : > { %5404 = vmatpush3.bf16.msra.mxu0 %v6232_v14  ;;  %5952 = vmatprep.subr.bf16.mxu1 %v6999_v15  ;;  %990 = vst [vmem:[#allocation2 + $0x60] sm:$0xf] %v989_v63  ;;  %991 = vst [vmem:[#allocation2 + $0x64] sm:$0xf] %v747_v62  ;;  %v1063_v14 = vshll.u32 %v5262_v2, 16  ;;  %v1062_v26 = vrot.slane %v1060_v13, 7 }
  0xb3   : > { %5405 = vmatprep.subr.bf16.mxu0 %v6234_v16  ;;  %v5248_v16 = vpack.c.bf16 %v500_v4, %v500_v4  ;;  %v507_v41 = vld [vmem:[%s6960_s18 + $0xc8] sm:$0xff] }
  0xb4   : > { %v1065_v36 = vor.u32 %v1063_v14, %v1062_v26  ;;  %v1066_v37 = vrot.slane %v1062_v26, 4  ;;  %v1013_v14 = vld [vmem:[#allocation2 + $0x8c] sm:$0x1] }
  0xb5   : > { %5960 = vmatpush3.bf16.msra.mxu1 %v6999_v15  ;;  %v767_v27 = vshrl.u32 %v5248_v16, 16  ;;  %v770_v28 = vshll.u32 %v5248_v16, 16 }
  0xb6   : > { %5406 = vmatpush3.bf16.msra.mxu0 %v6235_v17  ;;  %5953 = vmatprep.subr.bf16.mxu1 %v7003_v18  ;;  %v5249_v17 = vpack.c.bf16 %v501_v11, %v501_v11  ;;  %v1080_v52 = vsel %vm7028_vm7, %v1065_v36, %v1079_v23  ;;  %v614_v23 = vshrl.u32 %v5230_v56, 16  ;;  %v505_v36 = vld [vmem:[%s6960_s18 + $0xb8] sm:$0xff] }
  0xb7   : > { %5407 = vmatprep.subr.bf16.mxu0 %v6237_v19  ;;  %v502_v19 = vld [vmem:[%s6960_s18 + $0xa0] sm:$0xff]  ;;  %v769_v38 = vrot.slane %v767_v27, 7  ;;  %v1201_v50 = vld [vmem:[#allocation2 + $0x68] sm:$0x1]  ;;  %v1149_v60 = vld [vmem:[#allocation2 + $0x6c] sm:$0x1] }
  0xb8   : > { %v775_v29 = vshrl.u32 %v5249_v17, 16  ;;  %v778_v32 = vshll.u32 %v5249_v17, 16  ;;  %v1202_v59 = vsel %vm7053_vm8, 0, %v1201_v50  ;;  %v1204_v61 = vld [vmem:[#allocation2 + $0x74] sm:$0x1]  ;;  %v1150_v1 = vsel %vm7014_vm5, 0, %v1149_v60 }
  0xb9   : > { %5961 = vmatpush3.bf16.msra.mxu1 %v7003_v18  ;;  %v1146_v49 = vld [vmem:[#allocation2 + $0x60] sm:$0x1]  ;;  %v772_v53 = vor.u32 %v770_v28, %v769_v38  ;;  %1081 = vst [vmem:[#allocation2] sm:$0xf] %v1080_v52  ;;  %1203 = vst [vmem:[#allocation2 + $0x68] sm:$0x1] %v1202_v59 }
  0xba   : > { %5408 = vmatpush3.bf16.msra.mxu0 %v6238_v20  ;;  %5954 = vmatprep.subr.bf16.mxu1 %v6239_v21  ;;  %v503_v20 = vld [vmem:[%s6960_s18 + $0xa8] sm:$0xff]  ;;  %v777_v39 = vrot.slane %v775_v29, 7  ;;  %v1147_v58 = vsel %vm7014_vm5, 0, %v1146_v49  ;;  %v1205_v2 = vsel %vm7053_vm8, 0, %v1204_v61  ;;  %v773_v4 = vrot.slane %v769_v38, 4 }
  0xbb   : > { %5409 = vmatprep.subr.bf16.mxu0 %v6240_v24  ;;  %v5250_v24 = vpack.c.bf16 %v502_v19, %v502_v19  ;;  %v7049_v25 = vpack.c.bf16 %v503_v20, %v503_v20  ;;  %1148 = vst [vmem:[#allocation2 + $0x60] sm:$0x1] %v1147_v58  ;;  %1151 = vst [vmem:[#allocation2 + $0x6c] sm:$0x1] %v1150_v1  ;;  %v1003_v8 = vsel %vm7028_vm7, %v772_v53, %v1002_v40  ;;  %v937_v29 = vld [vmem:[#allocation2 + $0xc] sm:$0xf] }
  0xbc   : > { %v780_v54 = vor.u32 %v778_v32, %v777_v39  ;;  %v782_v5 = vrot.slane %v777_v39, 4  ;;  %1206 = vst [vmem:[#allocation2 + $0x74] sm:$0x1] %v1205_v2  ;;  %1004 = vst [vmem:[#allocation2 + $0x78] sm:$0xf] %v1003_v8  ;;  %v5231_v20 = vpack.c.bf16 %v483_v48, %v483_v48  ;;  %v6250_v53 = vld [vmem:[#allocation10 + $0x108] sm:$0xff]   ;;  %v7107_v8 = vpack.c.bf16 %v507_v41, %v507_v41 }
  0xbd   : > { %5962 = vmatpush3.bf16.msra.mxu1 %v6239_v21  ;;  %v1068_v21 = vshrl.u32 %v5263_v10, 16  ;;  %v784_v33 = vshrl.u32 %v5250_v24, 16  ;;  %v787_v34 = vshll.u32 %v5250_v24, 16  ;;  %v792_v47 = vshrl.u32 %v7049_v25, 16 }
  0xbe   : > { %5410 = vmatpush3.bf16.msra.mxu0 %v6241_v35  ;;  %5531 = vmatprep.subr.bf16.mxu1 %v6246_v42  ;;  %v781_v16 = vsel %vm7021_vm6, %v773_v4, %v780_v54  ;;  %v1007_v17 = vsel %vm7014_vm5, %v782_v5, %v1006_v44  ;;  %v795_v19 = vshll.u32 %v7049_v25, 16  ;;  %v617_v24 = vshll.u32 %v5230_v56, 16  ;;  %v943_v54 = vld [vmem:[#allocation2 + $0x14] sm:$0x1] }
  0xbf   : > { %5803 = vmatprep.subr.bf16.mxu0 %v6980_v0  ;;  %v1070_v30 = vrot.slane %v1068_v21, 7  ;;  %v786_v45 = vrot.slane %v784_v33, 7  ;;  %v794_v13 = vrot.slane %v792_v47, 7  ;;  %1005 = vst [vmem:[#allocation2 + $0x7c] sm:$0xf] %v781_v16  ;;  %v622_v27 = vshrl.u32 %v5231_v20, 16 }
  0xc0   : > { %1008 = vst [vmem:[#allocation2 + $0x80] sm:$0x1] %v1007_v17  ;;  %v7086_v25 = vrot.slane %v614_v23, 7  ;;  %v6247_v47 = vld [vmem:[#allocation10 + $0xc0] sm:$0xff]   ;;  %v5253_v56 = vpack.c.bf16 %v505_v36, %v505_v36  ;;  %v6257_v36 = vld [vmem:[#allocation10 + $0xd0] sm:$0xff]  }
  0xc1   : > { %v1073_v42 = vor.u32 %v1071_v22, %v1070_v30  ;;  %v1075_v43 = vrot.slane %v1070_v30, 4  ;;  %v789_v10 = vor.u32 %v787_v34, %v786_v45  ;;  %v790_v11 = vrot.slane %v786_v45, 4  ;;  %v504_v30 = vld [vmem:[%s6960_s18 + $0xb0] sm:$0xff] }
  0xc2   : > { %v799_v21 = vrot.slane %v794_v13, 4  ;;  %v797_v26 = vor.u32 %v795_v19, %v794_v13  ;;  %v624_v33 = vrot.slane %v622_v27, 7  ;;  %v625_v34 = vshll.u32 %v5231_v20, 16  ;;  %v6242_v38 = vld [vmem:[#allocation2 + $0x60] sm:$0xff]   ;;  %v6256_v20 = vld [vmem:[#allocation10 + $0x110] sm:$0xff]  }
  0xc3   : > { %v1074_v62 = vsel %vm7021_vm6, %v1066_v37, %v1073_v42  ;;  %v1084_v63 = vsel %vm7014_vm5, %v1075_v43, %v1083_v31  ;;  %v1010_v22 = vsel %vm7028_vm7, %v789_v10, %v1009_v55  ;;  %v1122_v31 = vld [vmem:[#allocation2] sm:$0x1]  ;;  %v506_v37 = vld [vmem:[%s6960_s18 + $0xc0] sm:$0xff]  ;;  %v619_v40 = vor.u32 %v617_v24, %v7086_v25  ;;  %v6243_v42 = vld [vmem:[#allocation2 + $0x68] ss:$0 sps:$4 sm:$0x11]  }
  0xc4   : > { %1082 = vst [vmem:[#allocation2 + $0x4] sm:$0xf] %v1074_v62  ;;  %1085 = vst [vmem:[#allocation2 + $0x8] sm:$0x1] %v1084_v63  ;;  %v1014_v28 = vsel %vm7014_vm5, %v799_v21, %v1013_v14  ;;  %v798_v32 = vsel %vm7021_vm6, %v790_v11, %v797_v26  ;;  %v1123_v39 = vsel %vm7014_vm5, 0, %v1122_v31  ;;  %v6244_v43 = vld [vmem:[#allocation2 + $0x6c] sm:$0xff]   ;;  %v5252_v55 = vpack.c.bf16 %v504_v30, %v504_v30 }
  0xc5   : > { %1236 = vst [vmem:[#allocation2 + $0x4] sm:$0xf] %v6671_v7  ;;  %1011 = vst [vmem:[#allocation2 + $0x84] sm:$0xf] %v1010_v22  ;;  %v1667_v44 = vrot.slane %v6242_v38, 1  ;;  %v938_v48 = vsel %vm7028_vm7, %v619_v40, %v937_v29  ;;  %v1668_v49 = vrot.slane %v6243_v42, 1  ;;  %v627_v62 = vor.u32 %v625_v34, %v624_v33 }
  0xc6   : > { %1015 = vst [vmem:[#allocation2 + $0x8c] sm:$0x1] %v1014_v28  ;;  %1012 = vst [vmem:[#allocation2 + $0x88] sm:$0xf] %v798_v32  ;;  %v1670_v50 = vrot.slane %v6244_v43, 1  ;;  %v5254_v63 = vpack.c.bf16 %v506_v37, %v506_v37  ;;  %v6251_v11 = vld [vmem:[#allocation10 + $0xc8] sm:$0xff]  }
  0xc7   : > { %1124 = vst [vmem:[#allocation2] sm:$0x1] %v1123_v39  ;;  %v6245_v45 = vld [vmem:[#allocation2 + $0x74] ss:$0 sps:$4 sm:$0x11]   ;;  %v1669_v1 = vsel %vm1642_vm9, %v1667_v44, %v1668_v49  ;;  %v620_v16 = vrot.slane %v7086_v25, 4 }
  0xc8   : > { %1235 = vst [vmem:[#allocation2] sm:$0xf] %v6671_v7  ;;  %939 = vst [vmem:[#allocation2 + $0xc] sm:$0xf] %v938_v48  ;;  %v1671_v58 = vrot.slane %v6245_v45, 1  ;;  %5835 = vmatprep.mubr.bf16.mxu1 %v1669_v1  ;;  %v629_v17 = vrot.slane %v624_v33, 4 }
  0xc9   : > { %v1152_v60 = vld [vmem:[#allocation2 + $0x78] sm:$0x1]  ;;  %v1207_v61 = vld [vmem:[#allocation2 + $0x80] sm:$0x1]  ;;  %v801_v21 = vshrl.u32 %v5252_v55, 16  ;;  %v804_v22 = vshll.u32 %v5252_v55, 16  ;;  %v628_v24 = vsel %vm7021_vm6, %v620_v16, %v627_v62 }
  0xca   : > { %v1153_v2 = vsel %vm7014_vm5, 0, %v1152_v60  ;;  %v1208_v4 = vsel %vm7053_vm8, 0, %v1207_v61  ;;  %v1672_v10 = vsel %vm1642_vm9, %v1670_v50, %v1671_v58  ;;  %v809_v23 = vshrl.u32 %v5253_v56, 16  ;;  %v1016_v28 = vld [vmem:[#allocation2 + $0x90] sm:$0xf] }
  0xcb   : > { %v1177_v52 = vld [vmem:[#allocation2 + $0x8] sm:$0x1]  ;;  %1154 = vst [vmem:[#allocation2 + $0x78] sm:$0x1] %v1153_v2  ;;  %1209 = vst [vmem:[#allocation2 + $0x80] sm:$0x1] %v1208_v4  ;;  %5836 = vmatmul.mubr.bf16.vlgmr.msra.gmra.mrb[0].mxu1 %v1672_v10  ;;  %v944_v26 = vsel %vm7014_vm5, %v629_v17, %v943_v54 }
  0xcc   : > { %v1178_v59 = vsel %vm7053_vm8, 0, %v1177_v52  ;;  %v1155_v5 = vld [vmem:[#allocation2 + $0x84] sm:$0x1]  ;;  %5532 = vmatpush3.bf16.msra.mxu1 %v6247_v47  ;;  %v812_v27 = vshll.u32 %v5253_v56, 16  ;;  %v818_v25 = vshrl.u32 %v5254_v63, 16  ;;  %v803_v30 = vrot.slane %v801_v21, 7 }
  0xcd   : > { %1179 = vst [vmem:[#allocation2 + $0x8] sm:$0x1] %v1178_v59  ;;  %v1156_v13 = vsel %vm7014_vm5, 0, %v1155_v5  ;;  %v1210_v14 = vld [vmem:[#allocation2 + $0x8c] sm:$0x1]  ;;  %5533 = vmatprep.subr.bf16.mxu1 %v6250_v53  ;;  %v811_v31 = vrot.slane %v809_v23, 7 }
  0xce   : > { %1237 = vst [vmem:[#allocation2 + $0x8] sm:$0x1] %v6671_v7  ;;  %1157 = vst [vmem:[#allocation2 + $0x84] sm:$0x1] %v1156_v13  ;;  %v1211_v19 = vsel %vm7053_vm8, 0, %v1210_v14  ;;  %v821_v33 = vshll.u32 %v5254_v63, 16  ;;  %v806_v45 = vor.u32 %v804_v22, %v803_v30 }
  0xcf   : > { %1212 = vst [vmem:[#allocation2 + $0x8c] sm:$0x1] %v1211_v19  ;;  %v7120_v29 = vld [vmem:[#allocation2] sm:$0xff]   ;;  %940 = vst [vmem:[#allocation2 + $0x10] sm:$0xf] %v628_v24  ;;  %v7122_v38 = vrot.slane %v818_v25, 7  ;;  %v814_v49 = vor.u32 %v812_v27, %v811_v31 }
  0xd0   : > { %945 = vst [vmem:[#allocation2 + $0x14] sm:$0x1] %v944_v26  ;;  %v1020_v32 = vld [vmem:[#allocation2 + $0x98] sm:$0x1]  ;;  %v1023_v34 = vld [vmem:[#allocation2 + $0x9c] sm:$0xf]  ;;  %5534 = vmatpush3.bf16.msra.mxu1 %v6251_v11  ;;  %v1017_v55 = vsel %vm7028_vm7, %v806_v45, %v1016_v28 }
  0xd1   : > { %v1125_v37 = vld [vmem:[#allocation2 + $0xc] sm:$0x1]  ;;  %v826_v39 = vshrl.u32 %v7107_v8, 16  ;;  %v829_v40 = vshll.u32 %v7107_v8, 16  ;;  %v1435_v41 = vshrl.u32 %v7120_v29, 16  ;;  %v1437_v42 = vshll.u32 %v7120_v29, 16  ;;  %5535 = vmatprep.subr.bf16.mxu1 %v6256_v20 }
  0xd2   : > { %v1126_v43 = vsel %vm7014_vm5, 0, %v1125_v37  ;;  %v6260_v44 = vld [vmem:[#allocation10 + $0x118] sm:$0xff]   ;;  %v484_v47 = vld [vmem:[%s6960_s18 + $0x10] sm:$0xff]  ;;  %v807_v48 = vrot.slane %v803_v30, 4  ;;  %v816_v50 = vrot.slane %v811_v31, 4  ;;  %v823_v52 = vor.u32 %v821_v33, %v7122_v38  ;;  %v6252_v58 = vld [vmem:[#allocation2 + $0x78] sm:$0xff]  }
  0xd3   : > { %1127 = vst [vmem:[#allocation2 + $0xc] sm:$0x1] %v1126_v43  ;;  %v1439_v54 = vrot.slane %v1437_v42, 1  ;;  %v5232_v56 = vpack.c.bf16 %v484_v47, %v484_v47  ;;  %1018 = vst [vmem:[#allocation2 + $0x90] sm:$0xf] %v1017_v55  ;;  %v824_v61 = vrot.slane %v7122_v38, 4 }
  0xd4   : > { %v815_v59 = vsel %vm7021_vm6, %v807_v48, %v814_v49  ;;  %v1021_v60 = vsel %vm7014_vm5, %v816_v50, %v1020_v32  ;;  %v1024_v62 = vsel %vm7028_vm7, %v823_v52, %v1023_v34  ;;  %v6253_v2 = vld [vmem:[#allocation2 + $0x80] ss:$0 sps:$4 sm:$0x11]   ;;  %v6261_v4 = vld [vmem:[#allocation10 + $0xd8] sm:$0xff]   ;;  %v1673_v5 = vrot.slane %v6252_v58, 1  ;;  %5536 = vmatpush3.bf16.msra.mxu1 %v6257_v36  ;;  %v6266_v17 = vld [vmem:[#allocation10 + $0x120] sm:$0xff]  }
  0xd5   : > { %v6249_v53 = vld [vmem:[#allocation2 + $0x8] ss:$0 sps:$4 sm:$0x11]   ;;  %v1440_v63 = vor.u32 %v1439_v54, %v1435_v41  ;;  %1019 = vst [vmem:[#allocation2 + $0x94] sm:$0xf] %v815_v59  ;;  %v1674_v13 = vrot.slane %v6253_v2, 1  ;;  %5537 = vmatprep.subr.bf16.mxu1 %v6260_v44 }
  0xd6   : > { %v1442_v1 = vshll.u32 %v6249_v53, 16  ;;  %1022 = vst [vmem:[#allocation2 + $0x98] sm:$0x1] %v1021_v60  ;;  %1025 = vst [vmem:[#allocation2 + $0x9c] sm:$0xf] %v1024_v62  ;;  %v6254_v8 = vld [vmem:[#allocation2 + $0x84] sm:$0xff]  }
  0xd7   : > { %v1180_v10 = vld [vmem:[#allocation2 + $0x14] sm:$0x1]  ;;  %v6255_v14 = vld [vmem:[#allocation2 + $0x8c] ss:$0 sps:$4 sm:$0x11]   ;;  %v1676_v19 = vrot.slane %v6254_v8, 1  ;;  %v1675_v24 = vsel %vm1642_vm9, %v1673_v5, %v1674_v13 }
  0xd8   : > { %v1444_v11 = vrot.slane %v1442_v1, 1  ;;  %v1181_v16 = vsel %vm7053_vm8, 0, %v1180_v10  ;;  %v828_v20 = vrot.slane %v826_v39, 7  ;;  %v485_v21 = vld [vmem:[%s6960_s18 + $0x18] sm:$0xff]  ;;  %v631_v22 = vshrl.u32 %v5232_v56, 16  ;;  %5839 = vmatprep.mubr.bf16.mxu1 %v1675_v24  ;;  %v6267_v32 = vld [vmem:[#allocation10 + $0xe0] sm:$0xff]   ;;  %5538 = vmatpush3.bf16.msra.mxu1 %v6261_v4 }
  0xd9   : > { %1182 = vst [vmem:[#allocation2 + $0x14] sm:$0x1] %v1181_v16  ;;  %v1677_v26 = vrot.slane %v6255_v14, 1  ;;  %v1027_v28 = vld [vmem:[#allocation2 + $0xa4] sm:$0x1]  ;;  %v5233_v25 = vpack.c.bf16 %v485_v21, %v485_v21  ;;  %v634_v34 = vshll.u32 %v5232_v56, 16  ;;  %5539 = vmatprep.subr.bf16.mxu1 %v6266_v17 }
  0xda   : > { %v1445_v23 = vsel %vm1433_vm10, %v1440_v63, %v1444_v11  ;;  %v7146_v27 = vld [vmem:[#allocation2 + $0xc] sm:$0xff]   ;;  %v831_v30 = vor.u32 %v829_v40, %v828_v20  ;;  %v833_v31 = vrot.slane %v828_v20, 4  ;;  %v633_v33 = vrot.slane %v631_v22, 7  ;;  %v946_v36 = vld [vmem:[#allocation2 + $0x18] sm:$0xf]  ;;  %v6270_v43 = vld [vmem:[#allocation10 + $0x128] sm:$0xff]  }
  0xdb   : > { %1931 = vmatprep.mubr.bf16.mxu0 %v1445_v23  ;;  %v1678_v37 = vsel %vm1642_vm9, %v1676_v19, %v1677_v26  ;;  %v1447_v38 = vshrl.u32 %v7146_v27, 16  ;;  %v1449_v39 = vshll.u32 %v7146_v27, 16  ;;  %v1158_v41 = vld [vmem:[#allocation2 + $0x90] sm:$0x1]  ;;  %v639_v42 = vshrl.u32 %v5233_v25, 16  ;;  %v508_v49 = vld [vmem:[%s6960_s18 + $0xd0] sm:$0xff] }
  0xdc   : > { %1932 = vmatmul.mubr.bf16.vlgmr.msra.gmra.mrb[0].mxu0 %v7120_v29  ;;  %5840 = vmatmul.mubr.bf16.gmra.mrb[4].mxu1 %v1678_v37  ;;  %v1159_v40 = vsel %vm7014_vm5, 0, %v1158_v41  ;;  %v832_v29 = vsel %vm7021_vm6, %v824_v61, %v831_v30  ;;  %v1028_v45 = vsel %vm7014_vm5, %v833_v31, %v1027_v28  ;;  %v636_v47 = vor.u32 %v634_v34, %v633_v33  ;;  %v950_v48 = vld [vmem:[#allocation2 + $0x20] sm:$0x1]  ;;  %v509_v2 = vld [vmem:[%s6960_s18 + $0xd8] sm:$0xff]  ;;  %v510_v16 = vld [vmem:[%s6960_s18 + $0xe0] sm:$0xff] }
  0xdd   : > { %5804 = vmatpush3.bf16.msra.mxu0 %v6980_v0  ;;  %v1213_v44 = vld [vmem:[#allocation2 + $0x98] sm:$0x1]  ;;  %v1451_v50 = vrot.slane %v1449_v39, 1  ;;  %1160 = vst [vmem:[#allocation2 + $0x90] sm:$0x1] %v1159_v40  ;;  %v637_v53 = vrot.slane %v633_v33, 4  ;;  %v5256_v60 = vpack.c.bf16 %v508_v49, %v508_v49  ;;  %5540 = vmatpush3.bf16.msra.mxu1 %v6267_v32  ;;  %v5257_v10 = vpack.c.bf16 %v509_v2, %v509_v2 }
  0xde   : > { %v1214_v52 = vsel %vm7053_vm8, 0, %v1213_v44  ;;  %1026 = vst [vmem:[#allocation2 + $0xa0] sm:$0xf] %v832_v29  ;;  %1029 = vst [vmem:[#allocation2 + $0xa4] sm:$0x1] %v1028_v45  ;;  %v641_v54 = vrot.slane %v639_v42, 7  ;;  %5805 = vmatprep.subr.bf16.mxu0 %v6984_v3  ;;  %v947_v59 = vsel %vm7028_vm7, %v636_v47, %v946_v36  ;;  %5541 = vmatprep.subr.bf16.mxu1 %v6270_v43 }
  0xdf   : > { %v1161_v0 = vld [vmem:[#allocation2 + $0x9c] sm:$0x1]  ;;  %v6271_v55 = vld [vmem:[#allocation10 + $0xe8] sm:$0xff]   ;;  %1215 = vst [vmem:[#allocation2 + $0x98] sm:$0x1] %v1214_v52  ;;  %v642_v58 = vshll.u32 %v5233_v25, 16  ;;  %v1452_v63 = vor.u32 %v1451_v50, %v1447_v38  ;;  %v5258_v21 = vpack.c.bf16 %v510_v16, %v510_v16 }
  0xe0   : > { %v1162_v56 = vsel %vm7014_vm5, 0, %v1161_v0  ;;  %v6259_v61 = vld [vmem:[#allocation2 + $0x14] ss:$0 sps:$4 sm:$0x11]   ;;  %v646_v62 = vrot.slane %v641_v54, 4  ;;  %v835_v4 = vshrl.u32 %v5256_v60, 16 }
  0xe1   : > { %1163 = vst [vmem:[#allocation2 + $0x9c] sm:$0x1] %v1162_v56  ;;  %948 = vst [vmem:[#allocation2 + $0x18] sm:$0xf] %v947_v59  ;;  %v644_v1 = vor.u32 %v642_v58, %v641_v54  ;;  %5806 = vmatpush3.bf16.msra.mxu0 %v6984_v3  ;;  %v1454_v5 = vshll.u32 %v6259_v61, 16  ;;  %v838_v11 = vshll.u32 %v5256_v60, 16  ;;  %5542 = vmatpush3.bf16.msra.mxu1 %v6271_v55 }
  0xe2   : > { %v951_v8 = vsel %vm7014_vm5, %v646_v62, %v950_v48  ;;  %5807 = vmatprep.subr.bf16.mxu0 %v6987_v6  ;;  %v837_v14 = vrot.slane %v835_v4, 7  ;;  %v511_v17 = vld [vmem:[%s6960_s18 + $0xe8] sm:$0xff]  ;;  %v843_v3 = vshrl.u32 %v5257_v10, 16  ;;  %v1030_v20 = vld [vmem:[#allocation2 + $0xa8] sm:$0xf]  ;;  %v846_v28 = vshll.u32 %v5257_v10, 16 }
  0xe3   : > { %v645_v13 = vsel %vm7021_vm6, %v637_v53, %v644_v1  ;;  %952 = vst [vmem:[#allocation2 + $0x20] sm:$0x1] %v951_v8  ;;  %v1456_v19 = vrot.slane %v1454_v5, 1  ;;  %v6276_v22 = vld [vmem:[#allocation10 + $0x130] sm:$0xff]   ;;  %v5259_v25 = vpack.c.bf16 %v511_v17, %v511_v17  ;;  %v1034_v37 = vld [vmem:[#allocation2 + $0xb0] sm:$0x1] }
  0xe4   : > { %949 = vst [vmem:[#allocation2 + $0x1c] sm:$0xf] %v645_v13  ;;  %v6262_v23 = vld [vmem:[#allocation2 + $0x90] sm:$0xff]   ;;  %v840_v26 = vor.u32 %v838_v11, %v837_v14  ;;  %5543 = vmatprep.subr.bf16.mxu1 %v6276_v22  ;;  %v841_v34 = vrot.slane %v837_v14, 4  ;;  %v845_v39 = vrot.slane %v843_v3, 7  ;;  %v852_v41 = vshrl.u32 %v5258_v21, 16 }
  0xe5   : > { %v1216_v24 = vld [vmem:[#allocation2 + $0xa4] sm:$0x1]  ;;  %5808 = vmatpush3.bf16.msra.mxu0 %v6987_v6  ;;  %v1457_v30 = vsel %vm1433_vm10, %v1452_v63, %v1456_v19  ;;  %v1679_v33 = vrot.slane %v6262_v23, 1  ;;  %v855_v42 = vshll.u32 %v5258_v21, 16  ;;  %v860_v44 = vshrl.u32 %v5259_v25, 16  ;;  %v6277_v58 = vld [vmem:[#allocation10 + $0xf0] sm:$0xff]  }
  0xe6   : > { %v6263_v31 = vld [vmem:[#allocation2 + $0x98] ss:$0 sps:$4 sm:$0x11]   ;;  %v1217_v32 = vsel %vm7053_vm8, 0, %v1216_v24  ;;  %5809 = vmatprep.subr.bf16.mxu0 %v6991_v9  ;;  %1939 = vmatprep.mubr.bf16.mxu0 %v1457_v30  ;;  %v1031_v36 = vsel %vm7028_vm7, %v840_v26, %v1030_v20  ;;  %v863_v29 = vshll.u32 %v5259_v25, 16  ;;  %v848_v48 = vor.u32 %v846_v28, %v845_v39  ;;  %v487_v63 = vld [vmem:[%s6960_s18 + $0x28] sm:$0xff] }
  0xe7   : > { %1218 = vst [vmem:[#allocation2 + $0xa4] sm:$0x1] %v1217_v32  ;;  %1940 = vmatmul.mubr.bf16.gmra.mrb[4].mxu0 %v7146_v27  ;;  %v1680_v6 = vrot.slane %v6263_v31, 1  ;;  %1032 = vst [vmem:[#allocation2 + $0xa8] sm:$0xf] %v1031_v36  ;;  %v850_v49 = vrot.slane %v845_v39, 4  ;;  %5544 = vmatpush3.bf16.msra.mxu1 %v6277_v58  ;;  %v5235_v5 = vpack.c.bf16 %v487_v63, %v487_v63 }
  0xe8   : > { %v1128_v38 = vld [vmem:[#allocation2 + $0x18] sm:$0x1]  ;;  %v6264_v43 = vld [vmem:[#allocation2 + $0x9c] sm:$0xff]   ;;  %v1037_v45 = vld [vmem:[#allocation2 + $0xb4] sm:$0xf]  ;;  %v854_v50 = vrot.slane %v852_v41, 7 }
  0xe9   : > { %v1129_v40 = vsel %vm7014_vm5, 0, %v1128_v38  ;;  %5810 = vmatpush3.bf16.msra.mxu0 %v6991_v9  ;;  %v1681_v47 = vsel %vm1642_vm9, %v1679_v33, %v1680_v6  ;;  %v1041_v52 = vld [vmem:[#allocation2 + $0xbc] sm:$0x1]  ;;  %v862_v53 = vrot.slane %v860_v44, 7  ;;  %v849_v9 = vsel %vm7021_vm6, %v841_v34, %v848_v48  ;;  %v6280_v8 = vld [vmem:[#allocation10 + $0x138] sm:$0xff]   ;;  %v6386_v22 = vld [vmem:[#allocation10 + $0xa8] sm:$0xff]  }
  0xea   : > { %1130 = vst [vmem:[#allocation2 + $0x18] sm:$0x1] %v1129_v40  ;;  %v1183_v27 = vld [vmem:[#allocation2 + $0x20] sm:$0x1]  ;;  %5811 = vmatprep.subr.bf16.mxu0 %v6995_v12  ;;  %5843 = vmatprep.mubr.bf16.mxu1 %v1681_v47  ;;  %v1035_v54 = vsel %vm7014_vm5, %v850_v49, %v1034_v37  ;;  %v857_v55 = vor.u32 %v855_v42, %v854_v50  ;;  %v858_v56 = vrot.slane %v854_v50, 4  ;;  %v486_v59 = vld [vmem:[%s6960_s18 + $0x20] sm:$0xff] }
  0xeb   : > { %v1184_v0 = vsel %vm7053_vm8, 0, %v1183_v27  ;;  %v1682_v60 = vrot.slane %v6264_v43, 1  ;;  %1033 = vst [vmem:[#allocation2 + $0xac] sm:$0xf] %v849_v9  ;;  %1036 = vst [vmem:[#allocation2 + $0xb0] sm:$0x1] %v1035_v54  ;;  %v865_v61 = vor.u32 %v863_v29, %v862_v53  ;;  %v5234_v1 = vpack.c.bf16 %v486_v59, %v486_v59  ;;  %5545 = vmatprep.subr.bf16.mxu1 %v6280_v8 }
  0xec   : > { %1185 = vst [vmem:[#allocation2 + $0x20] sm:$0x1] %v1184_v0  ;;  %v867_v62 = vrot.slane %v862_v53, 4  ;;  %v1038_v4 = vsel %vm7028_vm7, %v857_v55, %v1037_v45  ;;  %v656_v19 = vshrl.u32 %v5235_v5, 16  ;;  %v659_v3 = vshll.u32 %v5235_v5, 16  ;;  %v6281_v28 = vld [vmem:[#allocation10 + $0xf8] sm:$0xff]  }
  0xed   : > { %5812 = vmatpush3.bf16.msra.mxu0 %v6995_v12  ;;  %v866_v11 = vsel %vm7021_vm6, %v858_v56, %v865_v61  ;;  %1039 = vst [vmem:[#allocation2 + $0xb4] sm:$0xf] %v1038_v4  ;;  %v648_v14 = vshrl.u32 %v5234_v1, 16  ;;  %v651_v12 = vshll.u32 %v5234_v1, 16  ;;  %v957_v26 = vld [vmem:[#allocation2 + $0x2c] sm:$0x1]  ;;  %5546 = vmatpush3.bf16.msra.mxu1 %v6281_v28 }
  0xee   : > { %v7198_v2 = vld [vmem:[#allocation2 + $0xa4] ss:$0 sps:$4 sm:$0x11]   ;;  %5813 = vmatprep.subr.bf16.mxu0 %v6999_v15  ;;  %v1164_v10 = vld [vmem:[#allocation2 + $0xa8] sm:$0x1]  ;;  %v1042_v13 = vsel %vm7014_vm5, %v867_v62, %v1041_v52  ;;  %v658_v24 = vrot.slane %v656_v19, 7 }
  0xef   : > { %v1683_v16 = vrot.slane %v7198_v2, 1  ;;  %v1165_v17 = vsel %vm7014_vm5, 0, %v1164_v10  ;;  %1040 = vst [vmem:[#allocation2 + $0xb8] sm:$0xf] %v866_v11  ;;  %1043 = vst [vmem:[#allocation2 + $0xbc] sm:$0x1] %v1042_v13 }
  0xf0   : > { %v953_v15 = vld [vmem:[#allocation2 + $0x24] sm:$0xf]  ;;  %1166 = vst [vmem:[#allocation2 + $0xa8] sm:$0x1] %v1165_v17  ;;  %v650_v21 = vrot.slane %v648_v14, 7  ;;  %v661_v36 = vor.u32 %v659_v3, %v658_v24  ;;  %v663_v38 = vrot.slane %v658_v24, 4 }
  0xf1   : > { %v6268_v20 = vld [vmem:[#allocation2 + $0x18] sm:$0xff]   ;;  %5814 = vmatpush3.bf16.msra.mxu0 %v6386_v22  ;;  %v1684_v23 = vsel %vm1642_vm9, %v1682_v60, %v1683_v16  ;;  %v7216_v41 = vld [vmem:[#allocation2 + $0xc] sm:$0xff]   ;;  %v6283_v54 = vld [vmem:[#allocation2 + $0x14] ss:$0 sps:$4 sm:$0x11]  }
  0xf2   : > { %5815 = vmatprep.subr.bf16.mxu0 %v7003_v18  ;;  %5844 = vmatmul.mubr.bf16.gmra.mrb[8].mxu1 %v1684_v23  ;;  %v1459_v30 = vshrl.u32 %v6268_v20, 16  ;;  %v653_v31 = vor.u32 %v651_v12, %v650_v21  ;;  %v1461_v32 = vshll.u32 %v6268_v20, 16  ;;  %v1219_v33 = vld [vmem:[#allocation2 + $0xb0] sm:$0x1]  ;;  %v654_v34 = vrot.slane %v650_v21, 4  ;;  %v6387_v18 = vld [vmem:[#allocation10 + $0xb0] sm:$0xff]  }
  0xf3   : > { %v6269_v25 = vld [vmem:[#allocation2 + $0x20] ss:$0 sps:$4 sm:$0x11]   ;;  %v1220_v6 = vsel %vm7053_vm8, 0, %v1219_v33  ;;  %v488_v44 = vld [vmem:[%s6960_s18 + $0x30] sm:$0xff]  ;;  %v6388_v29 = vld [vmem:[#allocation10 + $0xb8] sm:$0xff]   ;;  %v958_v48 = vsel %vm7014_vm5, %v663_v38, %v957_v26 }
  0xf4   : > { %v1466_v37 = vshll.u32 %v6269_v25, 16  ;;  %v954_v39 = vsel %vm7028_vm7, %v653_v31, %v953_v15  ;;  %v1463_v42 = vrot.slane %v1461_v32, 1  ;;  %1221 = vst [vmem:[#allocation2 + $0xb0] sm:$0x1] %v1220_v6  ;;  %v1167_v43 = vld [vmem:[#allocation2 + $0xb4] sm:$0x1]  ;;  %v662_v40 = vsel %vm7021_vm6, %v654_v34, %v661_v36 }
  0xf5   : > { %5816 = vmatpush3.bf16.msra.mxu0 %v6387_v18  ;;  %955 = vst [vmem:[#allocation2 + $0x24] sm:$0xf] %v954_v39  ;;  %v1168_v47 = vsel %vm7014_vm5, 0, %v1167_v43  ;;  %956 = vst [vmem:[#allocation2 + $0x28] sm:$0xf] %v662_v40  ;;  %v5236_v49 = vpack.c.bf16 %v488_v44, %v488_v44  ;;  %v2446_v53 = vshrl.u32 %v7216_v41, 16 }
  0xf6   : > { %5817 = vmatprep.subr.bf16.mxu0 %v6388_v29  ;;  %v1468_v45 = vrot.slane %v1466_v37, 1  ;;  %v1222_v27 = vld [vmem:[#allocation2 + $0xbc] sm:$0x1]  ;;  %v1464_v50 = vor.u32 %v1463_v42, %v1459_v30  ;;  %1169 = vst [vmem:[#allocation2 + $0xb4] sm:$0x1] %v1168_v47  ;;  %v2448_v9 = vshll.u32 %v7216_v41, 16 }
  0xf7   : > { %v7225_v52 = vld [vmem:[#allocation2 + $0xa8] sm:$0xff]   ;;  %v1223_v0 = vsel %vm7053_vm8, 0, %v1222_v27  ;;  %959 = vst [vmem:[#allocation2 + $0x2c] sm:$0x1] %v958_v48  ;;  %v489_v55 = vld [vmem:[%s6960_s18 + $0x38] sm:$0xff]  ;;  %v665_v56 = vshrl.u32 %v5236_v49, 16 }
  0xf8   : > { %1224 = vst [vmem:[#allocation2 + $0xbc] sm:$0x1] %v1223_v0  ;;  %v668_v58 = vshll.u32 %v5236_v49, 16  ;;  %v1469_v59 = vsel %vm1433_vm10, %v1464_v50, %v1468_v45  ;;  %v2450_v60 = vrot.slane %v2448_v9, 1  ;;  %v5237_v61 = vpack.c.bf16 %v489_v55, %v489_v55  ;;  %v960_v62 = vld [vmem:[#allocation2 + $0x30] sm:$0xf] }
  0xf9   : > { %5818 = vmatpush3.bf16.msra.mxu0 %v6388_v29  ;;  %1947 = vmatprep.mubr.bf16.mxu0 %v1469_v59  ;;  %v2453_v63 = vshll.u32 %v6283_v54, 16  ;;  %v667_v1 = vrot.slane %v665_v56, 7  ;;  %v1685_v4 = vrot.slane %v7225_v52, 1  ;;  %v7234_v10 = vld [vmem:[#allocation10 + $0x140] sm:$0xff]   ;;  %v491_v18 = vld [vmem:[%s6960_s18 + $0x48] sm:$0xff]  ;;  %v492_v42 = vld [vmem:[%s6960_s18 + $0x50] sm:$0xff] }
  0xfa   : > { %1948 = vmatmul.mubr.bf16.gmra.mrb[8].mxu0 %v6268_v20  ;;  %v673_v5 = vshrl.u32 %v5237_v61, 16  ;;  %v676_v8 = vshll.u32 %v5237_v61, 16  ;;  %v2451_v13 = vor.u32 %v2450_v60, %v2446_v53  ;;  %v964_v16 = vld [vmem:[#allocation2 + $0x38] sm:$0x1]  ;;  %5851 = vmatprep.subr.bf16.mxu1 %v7234_v10  ;;  %v5239_v44 = vpack.c.bf16 %v491_v18, %v491_v18  ;;  %v493_v53 = vld [vmem:[%s6960_s18 + $0x58] sm:$0xff] }
  0xfb   : > { %v7236_v11 = vld [vmem:[#allocation2 + $0xb0] ss:$0 sps:$4 sm:$0x11]   ;;  %v2455_v14 = vrot.slane %v2453_v63, 1  ;;  %v670_v12 = vor.u32 %v668_v58, %v667_v1  ;;  %v7238_v17 = vld [vmem:[#allocation2 + $0x18] sm:$0xff]   ;;  %v671_v3 = vrot.slane %v667_v1, 4  ;;  %v5240_v27 = vpack.c.bf16 %v492_v42, %v492_v42 }
  0xfc   : > { %v1131_v19 = vld [vmem:[#allocation2 + $0x24] sm:$0x1]  ;;  %v675_v15 = vrot.slane %v673_v5, 7  ;;  %v1686_v20 = vrot.slane %v7236_v11, 1  ;;  %v490_v24 = vld [vmem:[%s6960_s18 + $0x40] sm:$0xff]  ;;  %v2458_v36 = vshrl.u32 %v7238_v17, 16  ;;  %v7264_v63 = vpack.c.bf16 %v493_v53, %v493_v53 }
  0xfd   : > { %v6274_v21 = vld [vmem:[#allocation2 + $0xb4] sm:$0xff]   ;;  %v1132_v22 = vsel %vm7014_vm5, 0, %v1131_v19  ;;  %v961_v23 = vsel %vm7028_vm7, %v670_v12, %v960_v62  ;;  %v5238_v30 = vpack.c.bf16 %v490_v24, %v490_v24  ;;  %v2456_v34 = vsel %vm1433_vm10, %v2451_v13, %v2455_v14  ;;  %v6288_v43 = vld [vmem:[#allocation2 + $0x20] ss:$0 sps:$4 sm:$0x11]  }
  0xfe   : > { %1133 = vst [vmem:[#allocation2 + $0x24] sm:$0x1] %v1132_v22  ;;  %v678_v28 = vor.u32 %v676_v8, %v675_v15  ;;  %v680_v25 = vrot.slane %v675_v15, 4  ;;  %962 = vst [vmem:[#allocation2 + $0x30] sm:$0xf] %v961_v23  ;;  %v1687_v31 = vsel %vm1642_vm9, %v1685_v4, %v1686_v20  ;;  %v1688_v32 = vrot.slane %v6274_v21, 1 }
  0xff   : > { %v6275_v26 = vld [vmem:[#allocation2 + $0xbc] ss:$0 sps:$4 sm:$0x11]   ;;  %v1186_v33 = vld [vmem:[#allocation2 + $0x2c] sm:$0x1]  ;;  %5847 = vmatprep.mubr.bf16.mxu1 %v1687_v31  ;;  %v2460_v40 = vshll.u32 %v7238_v17, 16 }
 0x100   : > { %v1689_v37 = vrot.slane %v6275_v26, 1  ;;  %v1187_v6 = vsel %vm7053_vm8, 0, %v1186_v33  ;;  %v679_v38 = vsel %vm7021_vm6, %v671_v3, %v678_v28  ;;  %v965_v39 = vsel %vm7014_vm5, %v680_v25, %v964_v16  ;;  %v967_v54 = vld [vmem:[#allocation2 + $0x3c] sm:$0xf]  ;;  %v971_v62 = vld [vmem:[#allocation2 + $0x44] sm:$0x1] }
 0x101   : > { %1188 = vst [vmem:[#allocation2 + $0x2c] sm:$0x1] %v1187_v6  ;;  %963 = vst [vmem:[#allocation2 + $0x34] sm:$0xf] %v679_v38  ;;  %v682_v29 = vshrl.u32 %v5238_v30, 16  ;;  %v685_v45 = vshll.u32 %v5238_v30, 16 }
 0x102   : > { %966 = vst [vmem:[#allocation2 + $0x38] sm:$0x1] %v965_v39  ;;  %v1690_v47 = vsel %vm1642_vm9, %v1688_v32, %v1689_v37  ;;  %v2462_v48 = vrot.slane %v2460_v40, 1  ;;  %v2465_v49 = vshll.u32 %v6288_v43, 16  ;;  %v690_v0 = vshrl.u32 %v5239_v44, 16  ;;  %v494_v55 = vld [vmem:[%s6960_s18 + $0x60] sm:$0xff] }
 0x103   : > { %5848 = vmatmul.mubr.bf16.gmra.mrb[12].mxu1 %v1690_v47  ;;  %v684_v50 = vrot.slane %v682_v29, 7  ;;  %v693_v9 = vshll.u32 %v5239_v44, 16  ;;  %v699_v8 = vshrl.u32 %v5240_v27, 16  ;;  %v702_v19 = vshll.u32 %v5240_v27, 16  ;;  %v6295_v3 = vld [vmem:[#allocation10 + $0x148] sm:$0xff]  }
 0x104   : > { %2942 = vmatprep.mubr.bf16.mxu1 %v2456_v34  ;;  %v2463_v59 = vor.u32 %v2462_v48, %v2458_v36  ;;  %v2467_v60 = vrot.slane %v2465_v49, 1  ;;  %v692_v5 = vrot.slane %v690_v0, 7  ;;  %v7274_v22 = vpack.c.bf16 %v494_v55, %v494_v55  ;;  %v974_v33 = vld [vmem:[#allocation2 + $0x48] sm:$0xf]  ;;  %v495_v42 = vld [vmem:[%s6960_s18 + $0x68] sm:$0xff] }
 0x105   : > { %v7262_v56 = vld [vmem:[#allocation2 + $0x24] sm:$0xff]   ;;  %v1134_v58 = vld [vmem:[#allocation2 + $0x30] sm:$0x1]  ;;  %v687_v61 = vor.u32 %v685_v45, %v684_v50  ;;  %v688_v4 = vrot.slane %v684_v50, 4  ;;  %v701_v6 = vrot.slane %v699_v8, 7  ;;  %v707_v38 = vshrl.u32 %v7264_v63, 16 }
 0x106   : > { %v1135_v1 = vsel %vm7014_vm5, 0, %v1134_v58  ;;  %v1471_v13 = vshrl.u32 %v7262_v56, 16  ;;  %v1473_v14 = vshll.u32 %v7262_v56, 16  ;;  %v7272_v16 = vld [vmem:[#allocation2 + $0x24] sm:$0xff]   ;;  %v695_v20 = vor.u32 %v693_v9, %v692_v5 }
 0x107   : > { %1136 = vst [vmem:[#allocation2 + $0x30] sm:$0x1] %v1135_v1  ;;  %v968_v12 = vsel %vm7028_vm7, %v687_v61, %v967_v54  ;;  %v697_v21 = vrot.slane %v692_v5, 4  ;;  %v2468_v26 = vsel %vm1433_vm10, %v2463_v59, %v2467_v60  ;;  %v2470_v28 = vshrl.u32 %v7272_v16, 16  ;;  %v6302_v45 = vld [vmem:[#allocation10 + $0x150] sm:$0xff]  }
 0x108   : > { %v6279_v15 = vld [vmem:[#allocation2 + $0x2c] ss:$0 sps:$4 sm:$0x11]   ;;  %969 = vst [vmem:[#allocation2 + $0x3c] sm:$0xf] %v968_v12  ;;  %v1475_v23 = vrot.slane %v1473_v14, 1  ;;  %v696_v31 = vsel %vm7021_vm6, %v688_v4, %v695_v20  ;;  %v704_v44 = vor.u32 %v702_v19, %v701_v6  ;;  %v5243_v49 = vpack.c.bf16 %v495_v42, %v495_v42 }
 0x109   : > { %v1189_v24 = vld [vmem:[#allocation2 + $0x38] sm:$0x1]  ;;  %v1478_v25 = vshll.u32 %v6279_v15, 16  ;;  %v972_v32 = vsel %vm7014_vm5, %v697_v21, %v971_v62  ;;  %970 = vst [vmem:[#allocation2 + $0x40] sm:$0xf] %v696_v31  ;;  %v2472_v37 = vshll.u32 %v7272_v16, 16 }
 0x10a   : > { %v1190_v30 = vsel %vm7053_vm8, 0, %v1189_v24  ;;  %v1476_v34 = vor.u32 %v1475_v23, %v1471_v13  ;;  %973 = vst [vmem:[#allocation2 + $0x44] sm:$0x1] %v972_v32  ;;  %v6292_v36 = vld [vmem:[#allocation2 + $0x2c] ss:$0 sps:$4 sm:$0x11]   ;;  %v975_v53 = vsel %vm7028_vm7, %v704_v44, %v974_v33 }
 0x10b   : > { %2943 = vmatmul.mubr.bf16.vlgmr.msra.gmra.mrb[16].mxu1 %v7216_v41  ;;  %1191 = vst [vmem:[#allocation2 + $0x38] sm:$0x1] %v1190_v30  ;;  %v1480_v39 = vrot.slane %v1478_v25, 1  ;;  %v710_v18 = vshll.u32 %v7264_v63, 16  ;;  %v716_v43 = vshrl.u32 %v7274_v22, 16  ;;  %v2474_v40 = vrot.slane %v2472_v37, 1 }
 0x10c   : > { %5852 = vmatpush3.bf16.msra.mxu1 %v7234_v10  ;;  %2950 = vmatprep.mubr.bf16.mxu1 %v2468_v26  ;;  %v2477_v41 = vshll.u32 %v6292_v36, 16  ;;  %v705_v29 = vrot.slane %v701_v6, 4  ;;  %v709_v48 = vrot.slane %v707_v38, 7  ;;  %976 = vst [vmem:[#allocation2 + $0x48] sm:$0xf] %v975_v53  ;;  %v724_v24 = vshrl.u32 %v5243_v49, 16 }
 0x10d   : > { %5853 = vmatprep.subr.bf16.mxu1 %v6295_v3  ;;  %v1481_v47 = vsel %vm1433_vm10, %v1476_v34, %v1480_v39  ;;  %v2475_v50 = vor.u32 %v2474_v40, %v2470_v28  ;;  %v7298_v54 = vrot.slane %v716_v43, 7  ;;  %v978_v61 = vld [vmem:[#allocation2 + $0x50] sm:$0x1]  ;;  %v981_v23 = vld [vmem:[#allocation2 + $0x54] sm:$0xf]  ;;  %v727_v26 = vshll.u32 %v5243_v49, 16 }
 0x10e   : > { %v7292_v27 = vld [vmem:[#allocation2 + $0x30] sm:$0xff]   ;;  %1955 = vmatprep.mubr.bf16.mxu0 %v1481_v47  ;;  %v2479_v0 = vrot.slane %v2477_v41, 1  ;;  %v712_v60 = vor.u32 %v710_v18, %v709_v48  ;;  %v714_v63 = vrot.slane %v709_v48, 4  ;;  %v6312_v31 = vld [vmem:[#allocation10 + $0x160] sm:$0xff]   ;;  %v726_v36 = vrot.slane %v724_v24, 7 }
 0x10f   : > { %v1137_v10 = vld [vmem:[#allocation2 + $0x3c] sm:$0x1]  ;;  %v7296_v9 = vld [vmem:[#allocation2 + $0x30] sm:$0xff]   ;;  %1956 = vmatmul.mubr.bf16.gmra.mrb[12].mxu0 %v7262_v56  ;;  %v1483_v55 = vshrl.u32 %v7292_v27, 16  ;;  %v1485_v58 = vshll.u32 %v7292_v27, 16  ;;  %v722_v34 = vrot.slane %v7298_v54, 4 }
 0x110   : > { %v1138_v59 = vsel %vm7014_vm5, 0, %v1137_v10  ;;  %5854 = vmatpush3.bf16.msra.mxu1 %v6295_v3  ;;  %v2480_v62 = vsel %vm1433_vm10, %v2475_v50, %v2479_v0  ;;  %v2482_v1 = vshrl.u32 %v7296_v9, 16  ;;  %v2484_v4 = vshll.u32 %v7296_v9, 16  ;;  %v6307_v56 = vld [vmem:[#allocation10 + $0x158] sm:$0xff]   ;;  %v985_v37 = vld [vmem:[#allocation2 + $0x5c] sm:$0x1] }
 0x111   : > { %1139 = vst [vmem:[#allocation2 + $0x3c] sm:$0x1] %v1138_v59  ;;  %5855 = vmatprep.subr.bf16.mxu1 %v6302_v45  ;;  %v1487_v8 = vrot.slane %v1485_v58, 1  ;;  %v713_v13 = vsel %vm7021_vm6, %v705_v29, %v712_v60  ;;  %v1192_v14 = vld [vmem:[#allocation2 + $0x44] sm:$0x1]  ;;  %v979_v12 = vsel %vm7014_vm5, %v714_v63, %v978_v61  ;;  %v729_v42 = vor.u32 %v727_v26, %v726_v36 }
 0x112   : > { %v7308_v5 = vld [vmem:[#allocation2 + $0x38] ss:$0 sps:$4 sm:$0x11]   ;;  %977 = vst [vmem:[#allocation2 + $0x4c] sm:$0xf] %v713_v13  ;;  %v1193_v15 = vsel %vm7053_vm8, 0, %v1192_v14 }
 0x113   : > { %2951 = vmatmul.mubr.bf16.gmra.mrb[20].mxu1 %v7238_v17  ;;  %v1488_v19 = vor.u32 %v1487_v8, %v1483_v55  ;;  %v1490_v3 = vshll.u32 %v7308_v5, 16  ;;  %980 = vst [vmem:[#allocation2 + $0x50] sm:$0x1] %v979_v12  ;;  %v6297_v20 = vld [vmem:[#allocation2 + $0x38] ss:$0 sps:$4 sm:$0x11]   ;;  %v730_v48 = vsel %vm7021_vm6, %v722_v34, %v729_v42 }
 0x114   : > { %2958 = vmatprep.mubr.bf16.mxu1 %v2480_v62  ;;  %v2486_v21 = vrot.slane %v2484_v4, 1  ;;  %5856 = vmatpush3.bf16.msra.mxu1 %v6302_v45  ;;  %1194 = vst [vmem:[#allocation2 + $0x44] sm:$0x1] %v1193_v15  ;;  %v719_v17 = vshll.u32 %v7274_v22, 16  ;;  %v2489_v30 = vshll.u32 %v6297_v20, 16  ;;  %v731_v43 = vrot.slane %v726_v36, 4 }
 0x115   : > { %5857 = vmatprep.subr.bf16.mxu1 %v6307_v56  ;;  %v1492_v28 = vrot.slane %v1490_v3, 1  ;;  %v1140_v32 = vld [vmem:[#allocation2 + $0x48] sm:$0x1]  ;;  %v6317_v50 = vld [vmem:[#allocation10 + $0x168] sm:$0xff]   ;;  %984 = vst [vmem:[#allocation2 + $0x58] sm:$0xf] %v730_v48 }
 0x116   : > { %v2487_v25 = vor.u32 %v2486_v21, %v2482_v1  ;;  %v721_v33 = vor.u32 %v719_v17, %v7298_v54  ;;  %v1141_v22 = vsel %vm7014_vm5, 0, %v1140_v32  ;;  %v2491_v39 = vrot.slane %v2489_v30, 1  ;;  %v6322_v32 = vld [vmem:[#allocation10 + $0x170] sm:$0xff]  }
 0x117   : > { %v1493_v6 = vsel %vm1433_vm10, %v1488_v19, %v1492_v28  ;;  %1142 = vst [vmem:[#allocation2 + $0x48] sm:$0x1] %v1141_v22  ;;  %v986_v49 = vsel %vm7014_vm5, %v731_v43, %v985_v37  ;;  %v6390_v22 = vld [vmem:[#allocation2 + $0x68] ss:$0 sps:$4 sm:$0x11]  }
 0x118   : > { %v7322_v38 = vld [vmem:[#allocation2 + $0x3c] sm:$0xff]   ;;  %5858 = vmatpush3.bf16.msra.mxu1 %v6307_v56  ;;  %1963 = vmatprep.mubr.bf16.mxu0 %v1493_v6  ;;  %v982_v40 = vsel %vm7028_vm7, %v721_v33, %v981_v23  ;;  %v2492_v29 = vsel %vm1433_vm10, %v2487_v25, %v2491_v39  ;;  %987 = vst [vmem:[#allocation2 + $0x5c] sm:$0x1] %v986_v49  ;;  %v1538_v39 = vshll.u32 %v6390_v22, 16 }
 0x119   : > { %v7326_v18 = vld [vmem:[#allocation2 + $0x3c] sm:$0xff]   ;;  %5859 = vmatprep.subr.bf16.mxu1 %v6312_v31  ;;  %1964 = vmatmul.mubr.bf16.gmra.mrb[16].mxu0 %v7292_v27  ;;  %v1495_v41 = vshrl.u32 %v7322_v38, 16  ;;  %v1497_v44 = vshll.u32 %v7322_v38, 16  ;;  %983 = vst [vmem:[#allocation2 + $0x54] sm:$0xf] %v982_v40 }
 0x11a   : > { %v2494_v45 = vshrl.u32 %v7326_v18, 16  ;;  %v1195_v47 = vld [vmem:[#allocation2 + $0x50] sm:$0x1]  ;;  %v2496_v10 = vshll.u32 %v7326_v18, 16  ;;  %v7361_v23 = vld [vmem:[#allocation2 + $0x60] sm:$0xff]  }
 0x11b   : > { %2959 = vmatmul.mubr.bf16.gmra.mrb[24].mxu1 %v7272_v16  ;;  %v7341_v0 = vld [vmem:[#allocation2 + $0x44] ss:$0 sps:$4 sm:$0x11]   ;;  %v1499_v53 = vrot.slane %v1497_v44, 1  ;;  %v1196_v16 = vsel %vm7053_vm8, 0, %v1195_v47  ;;  %v1533_v17 = vshll.u32 %v7361_v23, 16 }
 0x11c   : > { %2966 = vmatprep.mubr.bf16.mxu1 %v2492_v29  ;;  %5860 = vmatpush3.bf16.msra.mxu1 %v6312_v31  ;;  %v6301_v54 = vld [vmem:[#allocation2 + $0x44] ss:$0 sps:$4 sm:$0x11]   ;;  %v1502_v58 = vshll.u32 %v7341_v0, 16  ;;  %1197 = vst [vmem:[#allocation2 + $0x50] sm:$0x1] %v1196_v16 }
 0x11d   : > { %5861 = vmatprep.subr.bf16.mxu1 %v6317_v50  ;;  %v1500_v55 = vor.u32 %v1499_v53, %v1495_v41  ;;  %v2498_v59 = vrot.slane %v2496_v10, 1  ;;  %v2501_v60 = vshll.u32 %v6301_v54, 16  ;;  %v7370_v31 = vld [vmem:[#allocation2 + $0x60] sm:$0xff]   ;;  %v1531_v37 = vshrl.u32 %v7361_v23, 16 }
 0x11e   : > { %v1504_v61 = vrot.slane %v1502_v58, 1  ;;  %v7346_v62 = vld [vmem:[#allocation2 + $0x48] sm:$0xff]   ;;  %v1535_v6 = vrot.slane %v1533_v17, 1  ;;  %v2532_v29 = vshll.u32 %v7370_v31, 16  ;;  %v1540_v53 = vrot.slane %v1538_v39, 1 }
 0x11f   : > { %v2499_v63 = vor.u32 %v2498_v59, %v2494_v45  ;;  %v2503_v4 = vrot.slane %v2501_v60, 1  ;;  %v7348_v56 = vld [vmem:[#allocation2 + $0x48] sm:$0xff]   ;;  %v1509_v13 = vshll.u32 %v7346_v62, 16  ;;  %v1507_v12 = vshrl.u32 %v7346_v62, 16  ;;  %v1198_v19 = vld [vmem:[#allocation2 + $0x5c] sm:$0x1] }
 0x120   : > { %5862 = vmatpush3.bf16.msra.mxu1 %v6317_v50  ;;  %v1143_v1 = vld [vmem:[#allocation2 + $0x54] sm:$0x1]  ;;  %v1505_v8 = vsel %vm1433_vm10, %v1500_v55, %v1504_v61  ;;  %v2508_v15 = vshll.u32 %v7348_v56, 16  ;;  %v1199_v21 = vsel %vm7053_vm8, 0, %v1198_v19  ;;  %v2506_v24 = vshrl.u32 %v7348_v56, 16  ;;  %v7394_v58 = vld [vmem:[#allocation2 + $0x6c] sm:$0xff]  }
 0x121   : > { %v1144_v14 = vsel %vm7014_vm5, 0, %v1143_v1  ;;  %1971 = vmatprep.mubr.bf16.mxu0 %v1505_v8  ;;  %v2504_v3 = vsel %vm1433_vm10, %v2499_v63, %v2503_v4  ;;  %v1511_v20 = vrot.slane %v1509_v13, 1  ;;  %1200 = vst [vmem:[#allocation2 + $0x5c] sm:$0x1] %v1199_v21  ;;  %5863 = vmatprep.subr.bf16.mxu1 %v6322_v32  ;;  %v1536_v10 = vor.u32 %v1535_v6, %v1531_v37  ;;  %v7399_v63 = vld [vmem:[#allocation2 + $0x6c] sm:$0xff]   ;;  %v6323_v13 = vld [vmem:[#allocation10 + $0x1c0] sm:$0xff]  }
 0x122   : > { %1145 = vst [vmem:[#allocation2 + $0x54] sm:$0x1] %v1144_v14  ;;  %1972 = vmatmul.mubr.bf16.gmra.mrb[20].mxu0 %v7322_v38  ;;  %v2510_v26 = vrot.slane %v2508_v15, 1  ;;  %v7380_v44 = vld [vmem:[#allocation2 + $0x68] ss:$0 sps:$4 sm:$0x11]   ;;  %5667 = vmatprep.subr.bf16.mxu0 %v6323_v13 }
 0x123   : > { %2967 = vmatmul.mubr.bf16.gmra.mrb[28].mxu1 %v7296_v9  ;;  %v7365_v9 = vld [vmem:[#allocation2 + $0x50] ss:$0 sps:$4 sm:$0x11]   ;;  %v1512_v25 = vor.u32 %v1511_v20, %v1507_v12  ;;  %v1545_v59 = vshll.u32 %v7394_v58, 16  ;;  %v2530_v61 = vshrl.u32 %v7370_v31, 16  ;;  %v2534_v8 = vrot.slane %v2532_v29, 1 }
 0x124   : > { %2974 = vmatprep.mubr.bf16.mxu1 %v2504_v3  ;;  %v7367_v28 = vld [vmem:[#allocation2 + $0x50] ss:$0 sps:$4 sm:$0x11]   ;;  %v1514_v30 = vshll.u32 %v7365_v9, 16  ;;  %v2511_v33 = vor.u32 %v2510_v26, %v2506_v24  ;;  %5864 = vmatpush3.bf16.msra.mxu1 %v6322_v32  ;;  %v2537_v19 = vshll.u32 %v7380_v44, 16  ;;  %v1543_v3 = vshrl.u32 %v7394_v58, 16 }
 0x125   : > { %v2513_v34 = vshll.u32 %v7367_v28, 16  ;;  %v1541_v21 = vsel %vm1433_vm10, %v1536_v10, %v1540_v53  ;;  %v1547_v17 = vrot.slane %v1545_v59, 1  ;;  %v6392_v24 = vld [vmem:[#allocation2 + $0x74] ss:$0 sps:$4 sm:$0x11]   ;;  %v2535_v32 = vor.u32 %v2534_v8, %v2530_v61  ;;  %v7411_v6 = vld [vmem:[#allocation2 + $0x78] sm:$0xff]  }
 0x126   : > { %v1516_v36 = vrot.slane %v1514_v30, 1  ;;  %v1550_v26 = vshll.u32 %v6392_v24, 16  ;;  %v7407_v30 = vld [vmem:[#allocation2 + $0x74] ss:$0 sps:$4 sm:$0x11]   ;;  %v1557_v22 = vshll.u32 %v7411_v6, 16 }
 0x127   : > { %v2515_v43 = vrot.slane %v2513_v34, 1  ;;  %v2544_v34 = vshll.u32 %v7399_v63, 16  ;;  %v2549_v39 = vshll.u32 %v7407_v30, 16  ;;  %v6396_v8 = vld [vmem:[#allocation2 + $0x8c] ss:$0 sps:$4 sm:$0x11]  }
 0x128   : > { %v1517_v40 = vsel %vm1433_vm10, %v1512_v25, %v1516_v36  ;;  %v7383_v45 = vld [vmem:[#allocation2 + $0x5c] ss:$0 sps:$4 sm:$0x11]   ;;  %v1548_v36 = vor.u32 %v1547_v17, %v1543_v3  ;;  %v1552_v37 = vrot.slane %v1550_v26, 1  ;;  %v1559_v10 = vrot.slane %v1557_v22, 1  ;;  %v7437_v17 = vld [vmem:[#allocation2 + $0x90] sm:$0xff]  }
 0x129   : > { %v7374_v42 = vld [vmem:[#allocation2 + $0x54] sm:$0xff]   ;;  %1979 = vmatprep.mubr.bf16.mxu0 %v1517_v40  ;;  %v2516_v48 = vsel %vm1433_vm10, %v2511_v33, %v2515_v43  ;;  %v1526_v50 = vshll.u32 %v7383_v45, 16  ;;  %v2539_v33 = vrot.slane %v2537_v19, 1  ;;  %v2542_v40 = vshrl.u32 %v7399_v63, 16 }
 0x12a   : > { %v7378_v41 = vld [vmem:[#allocation2 + $0x54] sm:$0xff]   ;;  %v1519_v47 = vshrl.u32 %v7374_v42, 16  ;;  %1980 = vmatmul.mubr.bf16.gmra.mrb[24].mxu0 %v7346_v62  ;;  %v1521_v49 = vshll.u32 %v7374_v42, 16  ;;  %v2546_v29 = vrot.slane %v2544_v34, 1  ;;  %v1574_v13 = vshll.u32 %v6396_v8, 16 }
 0x12b   : > { %2975 = vmatmul.mubr.bf16.gmra.mrb[32].mxu1 %v7326_v18  ;;  %v7389_v18 = vld [vmem:[#allocation2 + $0x5c] ss:$0 sps:$4 sm:$0x11]   ;;  %v2518_v16 = vshrl.u32 %v7378_v41, 16  ;;  %v2520_v54 = vshll.u32 %v7378_v41, 16  ;;  %v1528_v1 = vrot.slane %v1526_v50, 1  ;;  %v2540_v43 = vsel %vm1433_vm10, %v2535_v32, %v2539_v33 }
 0x12c   : > { %2982 = vmatprep.mubr.bf16.mxu1 %v2516_v48  ;;  %v1523_v55 = vrot.slane %v1521_v49, 1  ;;  %v2525_v60 = vshll.u32 %v7389_v18, 16  ;;  %v1553_v48 = vsel %vm1433_vm10, %v1548_v36, %v1552_v37  ;;  %v1555_v49 = vshrl.u32 %v7411_v6, 16  ;;  %v6394_v50 = vld [vmem:[#allocation2 + $0x80] ss:$0 sps:$4 sm:$0x11]  }
 0x12d   : > { %v2522_v4 = vrot.slane %v2520_v54, 1  ;;  %v1562_v53 = vshll.u32 %v6394_v50, 16  ;;  %v2547_v54 = vor.u32 %v2546_v29, %v2542_v40  ;;  %v1581_v24 = vshll.u32 %v7437_v17, 16  ;;  %v7440_v26 = vld [vmem:[#allocation2 + $0x8c] ss:$0 sps:$4 sm:$0x11]  }
 0x12e   : > { %v1524_v14 = vor.u32 %v1523_v55, %v1519_v47  ;;  %v2527_v12 = vrot.slane %v2525_v60, 1  ;;  %v7417_v47 = vld [vmem:[#allocation2 + $0x78] sm:$0xff]   ;;  %v7423_v55 = vld [vmem:[#allocation2 + $0x80] ss:$0 sps:$4 sm:$0x11]   ;;  %v7426_v60 = vld [vmem:[#allocation2 + $0x84] sm:$0xff]  }
 0x12f   : > { %v2523_v15 = vor.u32 %v2522_v4, %v2518_v16  ;;  %v2551_v16 = vrot.slane %v2549_v39, 1  ;;  %v2556_v59 = vshll.u32 %v7417_v47, 16  ;;  %v1569_v61 = vshll.u32 %v7426_v60, 16  ;;  %v6398_v22 = vld [vmem:[#allocation2 + $0x98] ss:$0 sps:$4 sm:$0x11]  }
 0x130   : > { %v1529_v20 = vsel %vm1433_vm10, %v1524_v14, %v1528_v1  ;;  %v1560_v1 = vor.u32 %v1559_v10, %v1555_v49  ;;  %v1564_v4 = vrot.slane %v1562_v53, 1  ;;  %v2554_v14 = vshrl.u32 %v7417_v47, 16 }
 0x131   : > { %1987 = vmatprep.mubr.bf16.mxu0 %v1529_v20  ;;  %v2528_v25 = vsel %vm1433_vm10, %v2523_v15, %v2527_v12  ;;  %v7430_v12 = vld [vmem:[#allocation2 + $0x84] sm:$0xff]   ;;  %v2558_v19 = vrot.slane %v2556_v59, 1  ;;  %v2561_v3 = vshll.u32 %v7423_v55, 16  ;;  %v1567_v15 = vshrl.u32 %v7426_v60, 16 }
 0x132   : > { %1988 = vmatmul.mubr.bf16.gmra.mrb[28].mxu0 %v7374_v42  ;;  %v1571_v20 = vrot.slane %v1569_v61, 1  ;;  %v2568_v34 = vshll.u32 %v7430_v12, 16  ;;  %v1579_v37 = vshrl.u32 %v7437_v17, 16  ;;  %v1586_v39 = vshll.u32 %v6398_v22, 16  ;;  %v513_v22 = vld [vmem:[%s6960_s18 + $0xf8] sm:$0xff] }
 0x133   : > { %2983 = vmatmul.mubr.bf16.gmra.mrb[36].mxu1 %v7348_v56  ;;  %1995 = vmatprep.mubr.bf16.mxu0 %v1541_v21  ;;  %v1565_v21 = vsel %vm1433_vm10, %v1560_v1, %v1564_v4  ;;  %v2559_v32 = vor.u32 %v2558_v19, %v2554_v14  ;;  %v2563_v33 = vrot.slane %v2561_v3, 1  ;;  %v1598_v29 = vshll.u32 %v7198_v2, 16  ;;  %v7466_v3 = vld [vmem:[#allocation2 + $0x9c] sm:$0xff]  }
 0x134   : > { %2990 = vmatprep.mubr.bf16.mxu1 %v2528_v25  ;;  %v1576_v25 = vrot.slane %v1574_v13, 1  ;;  %v1572_v36 = vor.u32 %v1571_v20, %v1567_v15  ;;  %v1583_v49 = vrot.slane %v1581_v24, 1  ;;  %v2566_v10 = vshrl.u32 %v7430_v12, 16  ;;  %v6335_v15 = vld [vmem:[#allocation10 + $0x178] sm:$0xff]  }
 0x135   : > { %v2564_v50 = vsel %vm1433_vm10, %v2559_v32, %v2563_v33  ;;  %v2570_v53 = vrot.slane %v2568_v34, 1  ;;  %v1588_v59 = vrot.slane %v1586_v39, 1  ;;  %v7459_v1 = vrot.slane %v1598_v29, 1  ;;  %5865 = vmatprep.subr.bf16.mxu1 %v6335_v15 }
 0x136   : > { %v1655_v4 = vrot.slane %v7292_v27, 1  ;;  %v1656_v8 = vrot.slane %v7308_v5, 1  ;;  %v1658_v27 = vrot.slane %v7322_v38, 1  ;;  %v1659_v5 = vrot.slane %v7341_v0, 1  ;;  %5866 = vmatpush3.bf16.msra.mxu1 %v6335_v15  ;;  %v512_v38 = vld [vmem:[%s6960_s18 + $0xf0] sm:$0xff] }
 0x137   : > { %v2571_v13 = vor.u32 %v2570_v53, %v2566_v10  ;;  %v1605_v24 = vshll.u32 %v7225_v52, 16  ;;  %v1661_v33 = vrot.slane %v7346_v62, 1  ;;  %v1662_v0 = vrot.slane %v7365_v9, 1  ;;  %v1048_v15 = vld [vmem:[#allocation2 + $0xc8] sm:$0x1] }
 0x138   : > { %v7469_v20 = vsel %vm1642_vm9, %v1655_v4, %v1656_v8  ;;  %v7477_v32 = vsel %vm1642_vm9, %v1658_v27, %v1659_v5  ;;  %v1610_v39 = vshll.u32 %v7236_v11, 16  ;;  %v5260_v29 = vpack.c.bf16 %v512_v38, %v512_v38  ;;  %v7499_v8 = vld [vmem:[#allocation2 + $0xa8] sm:$0xff]  }
 0x139   : > { %v2592_v62 = vshll.u32 %v7466_v3, 16  ;;  %v7492_v53 = vsel %vm1642_vm9, %v1661_v33, %v1662_v0  ;;  %v1665_v9 = vrot.slane %v7383_v45, 1  ;;  %v1607_v38 = vrot.slane %v1605_v24, 1  ;;  %v7516_v24 = vld [vmem:[#allocation2 + $0xb0] ss:$0 sps:$4 sm:$0x11]  }
 0x13a   : > { %1996 = vmatmul.mubr.bf16.gmra.mrb[32].mxu0 %v7361_v23  ;;  %v2552_v23 = vsel %vm1433_vm10, %v2547_v54, %v2551_v16  ;;  %v2573_v16 = vshll.u32 %v7440_v26, 16  ;;  %v1577_v54 = vsel %vm1433_vm10, %v1572_v36, %v1576_v25 }
 0x13b   : > { %2991 = vmatmul.mubr.bf16.gmra.mrb[40].mxu1 %v7378_v41  ;;  %2003 = vmatprep.mubr.bf16.mxu0 %v1553_v48  ;;  %v7449_v48 = vld [vmem:[#allocation2 + $0x90] sm:$0xff]  }
 0x13c   : > { %2998 = vmatprep.mubr.bf16.mxu1 %v2540_v43  ;;  %v7445_v43 = vld [vmem:[#allocation2 + $0x9c] sm:$0xff]   ;;  %v2575_v14 = vrot.slane %v2573_v16, 1  ;;  %v2578_v25 = vshrl.u32 %v7449_v48, 16  ;;  %v872_v16 = vshll.u32 %v5260_v29, 16 }
 0x13d   : > { %v1593_v40 = vshll.u32 %v7445_v43, 16  ;;  %v1591_v61 = vshrl.u32 %v7445_v43, 16 }
 0x13e   : > { %v2576_v34 = vsel %vm1433_vm10, %v2571_v13, %v2575_v14 }
 0x13f   : > { %v1595_v2 = vrot.slane %v1593_v40, 1 }
 0x142   : > { %2004 = vmatmul.mubr.bf16.gmra.mrb[36].mxu0 %v7394_v58  ;;  %v7451_v58 = vld [vmem:[#allocation2 + $0x98] ss:$0 sps:$4 sm:$0x11]  }
 0x143   : > { %2999 = vmatmul.mubr.bf16.gmra.mrb[44].mxu1 %v7370_v31  ;;  %2011 = vmatprep.mubr.bf16.mxu0 %v1565_v21  ;;  %v2585_v19 = vshll.u32 %v7451_v58, 16  ;;  %v1603_v21 = vshrl.u32 %v7225_v52, 16  ;;  %v2669_v52 = vrot.slane %v7367_v28, 1 }
 0x144   : > { %3006 = vmatprep.mubr.bf16.mxu1 %v2552_v23  ;;  %v2580_v23 = vshll.u32 %v7449_v48, 16 }
 0x145   : > { %v2587_v40 = vrot.slane %v2585_v19, 1  ;;  %v1596_v19 = vor.u32 %v1595_v2, %v1591_v61 }
 0x146   : > { %v2582_v36 = vrot.slane %v2580_v23, 1  ;;  %v1044_v23 = vld [vmem:[#allocation2 + $0xc0] sm:$0xf] }
 0x147   : > { %v1601_v0 = vsel %vm1433_vm10, %v1596_v19, %v7459_v1  ;;  %v1608_v1 = vor.u32 %v1607_v38, %v1603_v21  ;;  %v2675_v38 = vrot.slane %v7380_v44, 1  ;;  %v2680_v44 = vrot.slane %v7417_v47, 1 }
 0x148   : > { %v2583_v4 = vor.u32 %v2582_v36, %v2578_v25  ;;  %v2594_v25 = vrot.slane %v2592_v62, 1  ;;  %v7504_v36 = vld [vmem:[#allocation10 + $0x200] sm:$0xff]  }
 0x149   : > { %5899 = vmatprep.subr.bf16.mxu1 %v7504_v36 }
 0x14a   : > { %2012 = vmatmul.mubr.bf16.gmra.mrb[40].mxu0 %v7411_v6  ;;  %v1584_v6 = vor.u32 %v1583_v49, %v1579_v37  ;;  %v1664_v37 = vrot.slane %v7374_v42, 1  ;;  %v5261_v49 = vpack.c.bf16 %v513_v22, %v513_v22  ;;  %v869_v42 = vshrl.u32 %v5260_v29, 16 }
 0x14b   : > { %3007 = vmatmul.mubr.bf16.gmra.mrb[48].mxu1 %v7399_v63  ;;  %2019 = vmatprep.mubr.bf16.mxu0 %v1577_v54  ;;  %v2588_v33 = vsel %vm1433_vm10, %v2583_v4, %v2587_v40  ;;  %v1612_v40 = vrot.slane %v1610_v39, 1  ;;  %v2609_v4 = vshll.u32 %v7516_v24, 16 }
 0x14c   : > { %3014 = vmatprep.mubr.bf16.mxu1 %v2564_v50  ;;  %v1589_v10 = vsel %vm1433_vm10, %v1584_v6, %v1588_v59  ;;  %v7488_v50 = vld [vmem:[#allocation2 + $0xa4] ss:$0 sps:$4 sm:$0x11]   ;;  %v877_v11 = vshrl.u32 %v5261_v49, 16  ;;  %v880_v54 = vshll.u32 %v5261_v49, 16  ;;  %v7497_v59 = vsel %vm1642_vm9, %v1664_v37, %v1665_v9 }
 0x14d   : > { %v871_v13 = vrot.slane %v869_v42, 7  ;;  %v2604_v37 = vshll.u32 %v7499_v8, 16  ;;  %v6401_v42 = vld [vmem:[#allocation2 + $0xbc] ss:$0 sps:$4 sm:$0x11]  }
 0x14e   : > { %v879_v14 = vrot.slane %v877_v11, 7  ;;  %v7526_v11 = vld [vmem:[#allocation2 + $0xb4] sm:$0xff]  }
 0x14f   : > { %v874_v45 = vor.u32 %v872_v16, %v871_v13  ;;  %v875_v27 = vrot.slane %v871_v13, 4  ;;  %v1622_v16 = vshll.u32 %v6401_v42, 16  ;;  %v2606_v39 = vrot.slane %v2604_v37, 1  ;;  %v6403_v42 = vld [vmem:[#allocation2] sm:$0xff]  }
 0x150   : > { %v882_v5 = vor.u32 %v880_v54, %v879_v14  ;;  %v884_v6 = vrot.slane %v879_v14, 4  ;;  %v2668_v54 = vrot.slane %v7348_v56, 1  ;;  %v1613_v13 = vsel %vm1433_vm10, %v1608_v1, %v1612_v40 }
 0x151   : > { %v1045_v61 = vsel %vm7028_vm7, %v874_v45, %v1044_v23  ;;  %v2616_v56 = vshll.u32 %v7526_v11, 16  ;;  %v2678_v37 = vrot.slane %v7407_v30, 1  ;;  %v2681_v40 = vrot.slane %v7423_v55, 1  ;;  %v6402_v30 = vld [vmem:[#allocation2 + $0xa8] sm:$0xff]  }
 0x152   : > { %2020 = vmatmul.mubr.bf16.gmra.mrb[44].mxu0 %v7426_v60  ;;  %v2590_v60 = vshrl.u32 %v7466_v3, 16  ;;  %v883_v22 = vsel %vm7021_vm6, %v875_v27, %v882_v5  ;;  %v1049_v2 = vsel %vm7014_vm5, %v884_v6, %v1048_v15  ;;  %1046 = vst [vmem:[#allocation2 + $0xc0] sm:$0xf] %v1045_v61  ;;  %v7535_v19 = vsel %vm1642_vm9, %v2668_v54, %v2669_v52  ;;  %v7543_v27 = vld [vmem:[#allocation2 + $0xbc] ss:$0 sps:$4 sm:$0x11]  }
 0x153   : > { %3015 = vmatmul.mubr.bf16.gmra.mrb[52].mxu1 %v7417_v47  ;;  %2027 = vmatprep.mubr.bf16.mxu0 %v1589_v10  ;;  %1047 = vst [vmem:[#allocation2 + $0xc4] sm:$0xf] %v883_v22  ;;  %1050 = vst [vmem:[#allocation2 + $0xc8] sm:$0x1] %v1049_v2  ;;  %v7522_v10 = vld [vmem:[#allocation2 + $0xb4] sm:$0xff]   ;;  %v2671_v5 = vrot.slane %v7378_v41, 1 }
 0x154   : > { %3022 = vmatprep.mubr.bf16.mxu1 %v2576_v34  ;;  %v2597_v34 = vshll.u32 %v7488_v50, 16  ;;  %v2595_v29 = vor.u32 %v2594_v25, %v2590_v60  ;;  %v1615_v62 = vshrl.u32 %v7522_v10, 16  ;;  %v1617_v9 = vshll.u32 %v7522_v10, 16 }
 0x155   : > { %v2672_v60 = vrot.slane %v7389_v18, 1  ;;  %v2674_v25 = vrot.slane %v7370_v31, 1  ;;  %v2614_v61 = vshrl.u32 %v7526_v11, 16  ;;  %v2618_v2 = vrot.slane %v2616_v56, 1 }
 0x156   : > { %v2599_v49 = vrot.slane %v2597_v34, 1  ;;  %v1619_v15 = vrot.slane %v1617_v9, 1  ;;  %v1624_v34 = vrot.slane %v1622_v16, 1  ;;  %v2621_v41 = vshll.u32 %v7543_v27, 16 }
 0x157   : > { %v2677_v18 = vrot.slane %v7399_v63, 1  ;;  %v7571_v9 = vsel %vm1642_vm9, %v2680_v44, %v2681_v40  ;;  %v1643_v16 = vrot.slane %v6403_v42, 1  ;;  %v2683_v54 = vrot.slane %v7430_v12, 1  ;;  %v6324_v44 = vld [vmem:[#allocation10 + $0x180] sm:$0xff]   ;;  %v6411_v42 = vld [vmem:[#allocation2 + $0x24] sm:$0xff]  }
 0x158   : > { %v2600_v21 = vsel %vm1433_vm10, %v2595_v29, %v2599_v49  ;;  %v1620_v22 = vor.u32 %v1619_v15, %v1615_v62  ;;  %v2619_v62 = vor.u32 %v2618_v2, %v2614_v61  ;;  %v2623_v63 = vrot.slane %v2621_v41, 1 }
 0x159   : > { %v1170_v14 = vld [vmem:[#allocation2 + $0xc0] sm:$0x1]  ;;  %v7568_v1 = vsel %vm1642_vm9, %v2677_v18, %v2678_v37  ;;  %v2686_v52 = vrot.slane %v7449_v48, 1 }
 0x15a   : > { %2028 = vmatmul.mubr.bf16.gmra.mrb[48].mxu0 %v7437_v17  ;;  %v2602_v17 = vshrl.u32 %v7499_v8, 16  ;;  %v1225_v23 = vld [vmem:[#allocation2 + $0xc8] sm:$0x1]  ;;  %v1171_v45 = vsel %vm7014_vm5, 0, %v1170_v14  ;;  %v1625_v29 = vsel %vm1433_vm10, %v1620_v22, %v1624_v34 }
 0x15b   : > { %3023 = vmatmul.mubr.bf16.gmra.mrb[56].mxu1 %v7430_v12  ;;  %2035 = vmatprep.mubr.bf16.mxu0 %v1601_v0  ;;  %v1226_v28 = vsel %vm7053_vm8, 0, %v1225_v23  ;;  %1172 = vst [vmem:[#allocation2 + $0xc0] sm:$0x1] %v1171_v45  ;;  %v7552_v0 = vsel %vm1642_vm9, %v2671_v5, %v2672_v60  ;;  %v6405_v5 = vld [vmem:[#allocation2 + $0xc] sm:$0xff]  }
 0x15c   : > { %3030 = vmatprep.mubr.bf16.mxu1 %v2588_v33  ;;  %1227 = vst [vmem:[#allocation2 + $0xc8] sm:$0x1] %v1226_v28  ;;  %v2607_v6 = vor.u32 %v2606_v39, %v2602_v17  ;;  %v2611_v33 = vrot.slane %v2609_v4, 1  ;;  %v6404_v17 = vld [vmem:[#allocation2 + $0x8] ss:$0 sps:$4 sm:$0x11]  }
 0x15d   : > { %v1644_v39 = vrot.slane %v6404_v17, 1  ;;  %v2684_v4 = vrot.slane %v7440_v26, 1  ;;  %v2689_v26 = vrot.slane %v7466_v3, 1  ;;  %v2693_v28 = vrot.slane %v7516_v24, 1 }
 0x15e   : > { %v2612_v31 = vsel %vm1433_vm10, %v2607_v6, %v2611_v33  ;;  %v1646_v6 = vrot.slane %v6405_v5, 1  ;;  %v6406_v34 = vld [vmem:[#allocation2 + $0x14] ss:$0 sps:$4 sm:$0x11]   ;;  %v2695_v24 = vrot.slane %v7526_v11, 1 }
 0x15f   : > { %v7581_v56 = vsel %vm1642_vm9, %v2683_v54, %v2684_v4  ;;  %v1645_v12 = vsel %vm1642_vm9, %v1643_v16, %v1644_v39  ;;  %v1652_v16 = vrot.slane %v6411_v42, 1  ;;  %v6412_v54 = vld [vmem:[#allocation2 + $0x2c] ss:$0 sps:$4 sm:$0x11]   ;;  %v6334_v5 = vld [vmem:[#allocation10 + $0x198] sm:$0xff]  }
 0x160   : > { %v1653_v17 = vrot.slane %v6412_v54, 1  ;;  %v6329_v39 = vld [vmem:[#allocation10 + $0x1d0] sm:$0xff]  }
 0x162   : > { %2036 = vmatmul.mubr.bf16.gmra.mrb[52].mxu0 %v7445_v43  ;;  %v7556_v43 = vsel %vm1642_vm9, %v2674_v25, %v2675_v38  ;;  %v7565_v49 = vld [vmem:[#allocation2 + $0xc0] sm:$0xff]   ;;  %v1647_v38 = vrot.slane %v6406_v34, 1 }
 0x163   : > { %3031 = vmatmul.mubr.bf16.gmra.mrb[60].mxu1 %v7449_v48  ;;  %2043 = vmatprep.mubr.bf16.mxu0 %v1613_v13  ;;  %v6340_v47 = vld [vmem:[#allocation2 + $0xc8] ss:$0 sps:$4 sm:$0x11]   ;;  %v2628_v55 = vshll.u32 %v7565_v49, 16  ;;  %v2624_v13 = vsel %vm1433_vm10, %v2619_v62, %v2623_v63  ;;  %v2626_v14 = vshrl.u32 %v7565_v49, 16  ;;  %v2690_v48 = vrot.slane %v7488_v50, 1 }
 0x164   : > { %3038 = vmatprep.mubr.bf16.mxu1 %v2600_v21  ;;  %v2687_v21 = vrot.slane %v7451_v58, 1  ;;  %v2633_v15 = vshll.u32 %v6340_v47, 16  ;;  %v2692_v58 = vrot.slane %v7499_v8, 1  ;;  %v2698_v2 = vrot.slane %v7565_v49, 1 }
 0x165   : > { %v2630_v23 = vrot.slane %v2628_v55, 1  ;;  %v7594_v25 = vsel %vm1642_vm9, %v2689_v26, %v2690_v48  ;;  %v2699_v41 = vrot.slane %v6340_v47, 1  ;;  %v1648_v37 = vsel %vm1642_vm9, %v1646_v6, %v1647_v38  ;;  %v6328_v55 = vld [vmem:[#allocation10 + $0x188] sm:$0xff]  }
 0x166   : > { %v7584_v45 = vsel %vm1642_vm9, %v2686_v52, %v2687_v21  ;;  %v2635_v60 = vrot.slane %v2633_v15, 1  ;;  %v7597_v50 = vsel %vm1642_vm9, %v2692_v58, %v2693_v28  ;;  %v6330_v52 = vld [vmem:[#allocation10 + $0x190] sm:$0xff]   ;;  %v6331_v21 = vld [vmem:[#allocation10 + $0x1d8] sm:$0xff]   ;;  %v6414_v15 = vld [vmem:[#allocation2 + $0x20] ss:$0 sps:$4 sm:$0x11]  }
 0x167   : > { %v2631_v33 = vor.u32 %v2630_v23, %v2626_v14  ;;  %v7608_v40 = vsel %vm1642_vm9, %v2698_v2, %v2699_v41  ;;  %v6413_v14 = vld [vmem:[#allocation2 + $0x18] sm:$0xff]   ;;  %v6415_v26 = vld [vmem:[#allocation2 + $0x24] sm:$0xff]   ;;  %v6416_v58 = vld [vmem:[#allocation2 + $0x2c] ss:$0 sps:$4 sm:$0x11]  }
 0x168   : > { %v2656_v23 = vrot.slane %v6413_v14, 1  ;;  %v2659_v48 = vrot.slane %v6415_v26, 1  ;;  %v2660_v28 = vrot.slane %v6416_v58, 1  ;;  %v7618_v6 = vld [vmem:[#allocation2 + $0x20] ss:$0 sps:$4 sm:$0x11]  }
 0x169   : > { %v2636_v18 = vsel %vm1433_vm10, %v2631_v33, %v2635_v60  ;;  %v6351_v38 = vld [vmem:[#allocation10 + $0x208] sm:$0xff]   ;;  %v6418_v41 = vld [vmem:[#allocation2 + $0x38] ss:$0 sps:$4 sm:$0x11]  }
 0x16a   : > { %2044 = vmatmul.mubr.bf16.gmra.mrb[56].mxu0 %v6402_v30  ;;  %v6410_v30 = vld [vmem:[#allocation2 + $0x14] ss:$0 sps:$4 sm:$0x11]   ;;  %v2661_v34 = vsel %vm1642_vm9, %v2659_v48, %v2660_v28  ;;  %v6360_v26 = vld [vmem:[#allocation10 + $0x220] sm:$0xff]  }
 0x16b   : > { %3039 = vmatmul.mubr.bf16.gmra.mrb[64].mxu1 %v7466_v3  ;;  %2051 = vmatprep.mubr.bf16.mxu0 %v1625_v29  ;;  %v6407_v3 = vld [vmem:[#allocation2 + $0x18] sm:$0xff]   ;;  %v6325_v29 = vld [vmem:[#allocation10 + $0x1c8] sm:$0xff]   ;;  %v2654_v47 = vrot.slane %v6410_v30, 1  ;;  %v6345_v28 = vld [vmem:[#allocation10 + $0x1b8] sm:$0xff]  }
 0x16c   : > { %3046 = vmatprep.mubr.bf16.mxu1 %v2612_v31  ;;  %v1649_v22 = vrot.slane %v6407_v3, 1  ;;  %v6337_v3 = vld [vmem:[#allocation10 + $0x1a0] sm:$0xff]  }
 0x172   : > { %2052 = vmatmul.mubr.bf16.gmra.mrb[60].mxu0 %v7522_v10  ;;  %v2696_v10 = vrot.slane %v7543_v27, 1  ;;  %v6409_v27 = vld [vmem:[#allocation2 + $0xc] sm:$0xff]  }
 0x173   : > { %3047 = vmatmul.mubr.bf16.gmra.mrb[68].mxu1 %v7499_v8  ;;  %5819 = vmatprep.mubr.bf16.mxu0 %v1645_v12  ;;  %v6408_v8 = vld [vmem:[#allocation2 + $0x20] ss:$0 sps:$4 sm:$0x11]   ;;  %v2653_v63 = vrot.slane %v6409_v27, 1  ;;  %v2657_v12 = vrot.slane %v6414_v15, 1  ;;  %v6354_v27 = vld [vmem:[#allocation10 + $0x210] sm:$0xff]  }
 0x174   : > { %3054 = vmatprep.mubr.bf16.mxu1 %v2624_v13  ;;  %v1650_v61 = vrot.slane %v6408_v8, 1  ;;  %v7604_v31 = vsel %vm1642_vm9, %v2695_v24, %v2696_v10  ;;  %v7615_v13 = vld [vmem:[#allocation2 + $0x18] sm:$0xff]   ;;  %v7625_v24 = vld [vmem:[#allocation2 + $0x24] sm:$0xff]   ;;  %v6417_v10 = vld [vmem:[#allocation2 + $0x30] sm:$0xff]  }
 0x175   : > { %v2655_v4 = vsel %vm1642_vm9, %v2653_v63, %v2654_v47  ;;  %v3524_v33 = vshll.u32 %v7615_v13, 16  ;;  %v2658_v60 = vsel %vm1642_vm9, %v2656_v23, %v2657_v12  ;;  %v3522_v8 = vshrl.u32 %v7615_v13, 16  ;;  %v6341_v63 = vld [vmem:[#allocation10 + $0x1a8] sm:$0xff]   ;;  %v7640_v23 = vld [vmem:[#allocation2 + $0x30] sm:$0xff]  }
 0x176   : > { %v1651_v62 = vsel %vm1642_vm9, %v1649_v22, %v1650_v61  ;;  %v6338_v22 = vld [vmem:[#allocation10 + $0x1e8] sm:$0xff]   ;;  %v3529_v61 = vshll.u32 %v7618_v6, 16  ;;  %v2662_v2 = vrot.slane %v6417_v10, 1  ;;  %v1119_v10 = vld [vmem:[#allocation2 + $0xd4] sm:$0x1] }
 0x178   : > { %v3531_v30 = vrot.slane %v3529_v61, 1 }
 0x17a   : > { %5820 = vmatmul.mubr.bf16.vlgmr.msra.gmra.mrb[64].mxu0 %v1648_v37  ;;  %v6419_v37 = vld [vmem:[#allocation2 + $0x3c] sm:$0xff]  }
 0x17b   : > { %3055 = vmatmul.mubr.bf16.gmra.mrb[72].mxu1 %v7526_v11  ;;  %5668 = vmatpush3.bf16.msra.mxu0 %v6324_v44  ;;  %v1654_v11 = vsel %vm1642_vm9, %v1652_v16, %v1653_v17  ;;  %v2665_v44 = vrot.slane %v6419_v37, 1  ;;  %v1086_v16 = vld [vmem:[%s6974_s11] sm:$0xff]  ;;  %v6357_v17 = vld [vmem:[#allocation10 + $0x218] sm:$0xff]  }
 0x17c   : > { %3062 = vmatprep.mubr.bf16.mxu1 %v2636_v18  ;;  %5823 = vmatprep.mubr.bf16.mxu0 %v1651_v62  ;;  %v2663_v18 = vrot.slane %v6418_v41, 1  ;;  %v5264_v15 = vpack.c.bf16 %v1086_v16, %v1086_v16 }
 0x17d   : > { %5669 = vmatprep.subr.bf16.mxu0 %v6325_v29  ;;  %v6420_v29 = vld [vmem:[#allocation2 + $0x44] ss:$0 sps:$4 sm:$0x11]  }
 0x17e   : > { %v2666_v62 = vrot.slane %v6420_v29, 1  ;;  %v2664_v42 = vsel %vm1642_vm9, %v2662_v2, %v2663_v18  ;;  %v1095_v48 = vshrl.u32 %v5264_v15, 16  ;;  %v1098_v58 = vshll.u32 %v5264_v15, 16 }
 0x17f   : > { %5670 = vmatpush3.bf16.msra.mxu0 %v6328_v55  ;;  %v7630_v55 = vld [vmem:[#allocation2 + $0x2c] ss:$0 sps:$4 sm:$0x11]   ;;  %v3546_v2 = vshrl.u32 %v7640_v23, 16 }
 0x180   : > { %5671 = vmatprep.subr.bf16.mxu0 %v6329_v39  ;;  %v2667_v54 = vsel %vm1642_vm9, %v2665_v44, %v2666_v62  ;;  %v1087_v39 = vld [vmem:[%s6974_s11 + $0x8] sm:$0xff]  ;;  %v3541_v14 = vshll.u32 %v7630_v55, 16 }
 0x181   : > { %v5265_v12 = vpack.c.bf16 %v1087_v39, %v1087_v39  ;;  %v7650_v62 = vld [vmem:[#allocation2 + $0x3c] sm:$0xff]  }
 0x182   : > { %5824 = vmatmul.mubr.bf16.gmra.mrb[68].mxu0 %v1654_v11  ;;  %v6344_v11 = vld [vmem:[#allocation10 + $0x1f8] sm:$0xff]   ;;  %v3560_v51 = vshll.u32 %v7650_v62, 16 }
 0x183   : > { %3063 = vmatmul.mubr.bf16.gmra.mrb[76].mxu1 %v7565_v49  ;;  %5672 = vmatpush3.bf16.msra.mxu0 %v6330_v52  ;;  %v6336_v49 = vld [vmem:[#allocation10 + $0x1e0] sm:$0xff]  }
 0x184   : > { %5867 = vmatprep.mubr.bf16.mxu1 %v2655_v4  ;;  %5827 = vmatprep.mubr.bf16.mxu0 %v7469_v20  ;;  %v3526_v20 = vrot.slane %v3524_v33, 1  ;;  %v6343_v4 = vld [vmem:[#allocation10 + $0x1b0] sm:$0xff]   ;;  %v3562_v16 = vrot.slane %v3560_v51, 1  ;;  %v7721_v51 = vld [vmem:[#allocation2 + $0x74] ss:$0 sps:$4 sm:$0x11]  }
 0x185   : > { %5673 = vmatprep.subr.bf16.mxu0 %v6331_v21 }
 0x186   : > { %v3527_v47 = vor.u32 %v3526_v20, %v3522_v8  ;;  %v6363_v8 = vld [vmem:[#allocation10 + $0x228] sm:$0xff]  }
 0x187   : > { %5674 = vmatpush3.bf16.msra.mxu0 %v6334_v5  ;;  %v1103_v5 = vshrl.u32 %v5265_v12, 16 }
 0x188   : > { %5675 = vmatprep.subr.bf16.mxu0 %v6336_v49  ;;  %v3532_v52 = vsel %vm1433_vm10, %v3527_v47, %v3531_v30  ;;  %v1106_v49 = vshll.u32 %v5265_v12, 16  ;;  %v6369_v47 = vld [vmem:[#allocation10 + $0x238] sm:$0xff]  }
 0x189   : > { %v7685_v12 = vld [vmem:[#allocation2 + $0x54] sm:$0xff]  }
 0x18a   : > { %5828 = vmatmul.mubr.bf16.gmra.mrb[72].mxu0 %v7477_v32  ;;  %v3536_v32 = vshll.u32 %v7625_v24, 16 }
 0x18b   : > { %5868 = vmatmul.mubr.bf16.vlgmr.msra.gmra.mrb[80].mxu1 %v2658_v60  ;;  %5676 = vmatpush3.bf16.msra.mxu0 %v6337_v3  ;;  %v3543_v60 = vrot.slane %v3541_v14, 1  ;;  %v1097_v3 = vrot.slane %v1095_v48, 7 }
 0x18c   : > { %5900 = vmatpush3.bf16.msra.mxu1 %v7504_v36  ;;  %5871 = vmatprep.mubr.bf16.mxu1 %v2661_v34  ;;  %v6342_v36 = vld [vmem:[#allocation10 + $0x1f0] sm:$0xff]   ;;  %v3538_v21 = vrot.slane %v3536_v32, 1  ;;  %v7643_v34 = vld [vmem:[#allocation2 + $0x38] ss:$0 sps:$4 sm:$0x11]  }
 0x18d   : > { %5901 = vmatprep.subr.bf16.mxu1 %v6351_v38  ;;  %5831 = vmatprep.mubr.bf16.mxu0 %v7492_v53  ;;  %v3534_v53 = vshrl.u32 %v7625_v24, 16  ;;  %v1100_v61 = vor.u32 %v1098_v58, %v1097_v3  ;;  %v1101_v20 = vrot.slane %v1097_v3, 4  ;;  %v3553_v29 = vshll.u32 %v7643_v34, 16 }
 0x18e   : > { %5677 = vmatprep.subr.bf16.mxu0 %v6338_v22  ;;  %v1105_v22 = vrot.slane %v1103_v5, 7 }
 0x18f   : > { %5678 = vmatpush3.bf16.msra.mxu0 %v6341_v63  ;;  %v3539_v33 = vor.u32 %v3538_v21, %v3534_v53  ;;  %v3555_v30 = vrot.slane %v3553_v29, 1  ;;  %v7677_v21 = vld [vmem:[#allocation2 + $0x50] ss:$0 sps:$4 sm:$0x11]  }
 0x190   : > { %5902 = vmatpush3.bf16.msra.mxu1 %v6351_v38  ;;  %5679 = vmatprep.subr.bf16.mxu0 %v6342_v36  ;;  %v3548_v38 = vshll.u32 %v7640_v23, 16  ;;  %v1108_v41 = vor.u32 %v1106_v49, %v1105_v22  ;;  %v1110_v18 = vrot.slane %v1105_v22, 4  ;;  %v3577_v15 = vshll.u32 %v7677_v21, 16 }
 0x191   : > { %5903 = vmatprep.subr.bf16.mxu1 %v6354_v27  ;;  %v3544_v37 = vsel %vm1433_vm10, %v3539_v33, %v3543_v60 }
 0x192   : > { %5832 = vmatmul.mubr.bf16.gmra.mrb[76].mxu0 %v7497_v59  ;;  %v1115_v59 = vld [vmem:[#allocation2 + $0xcc] sm:$0xf]  ;;  %v3550_v44 = vrot.slane %v3548_v38, 1  ;;  %v1109_v63 = vsel %vm7021_vm6, %v1101_v20, %v1108_v41  ;;  %v1120_v36 = vsel %vm7014_vm5, %v1110_v18, %v1119_v10  ;;  %v3579_v58 = vrot.slane %v3577_v15, 1 }
 0x193   : > { %5872 = vmatmul.mubr.bf16.gmra.mrb[84].mxu1 %v2664_v42  ;;  %5680 = vmatpush3.bf16.msra.mxu0 %v6343_v4  ;;  %1118 = vst [vmem:[#allocation2 + $0xd0] sm:$0xf] %v1109_v63  ;;  %1121 = vst [vmem:[#allocation2 + $0xd4] sm:$0x1] %v1120_v36  ;;  %v3558_v42 = vshrl.u32 %v7650_v62, 16  ;;  %v3729_v36 = vrot.slane %v7615_v13, 1 }
 0x194   : > { %5875 = vmatprep.mubr.bf16.mxu1 %v2667_v54  ;;  %5904 = vmatpush3.bf16.msra.mxu1 %v6354_v27  ;;  %v1116_v27 = vsel %vm7028_vm7, %v1100_v61, %v1115_v59  ;;  %1239 = vst [vmem:[#allocation2 + $0xd0] sm:$0xf] %v6671_v7  ;;  %v3551_v57 = vor.u32 %v3550_v44, %v3546_v2  ;;  %v7700_v59 = vld [vmem:[#allocation2 + $0x60] sm:$0xff]   ;;  %v7704_v20 = vld [vmem:[#allocation2 + $0x68] ss:$0 sps:$4 sm:$0x11]  }
 0x195   : > { %5905 = vmatprep.subr.bf16.mxu1 %v6357_v17  ;;  %4018 = vmatprep.mubr.bf16.mxu0 %v3532_v52  ;;  %1117 = vst [vmem:[#allocation2 + $0xcc] sm:$0xf] %v1116_v27  ;;  %v3596_v10 = vshll.u32 %v7700_v59, 16  ;;  %v7711_v44 = vld [vmem:[#allocation2 + $0x6c] sm:$0xff]  }
 0x196   : > { %5681 = vmatprep.subr.bf16.mxu0 %v6344_v11  ;;  %v3556_v32 = vsel %vm1433_vm10, %v3551_v57, %v3555_v30  ;;  %v3563_v11 = vor.u32 %v3562_v16, %v3558_v42  ;;  %v3606_v42 = vshrl.u32 %v7711_v44, 16  ;;  %v7729_v16 = vld [vmem:[#allocation2 + $0x78] sm:$0xff]  }
 0x197   : > { %5682 = vmatpush3.bf16.msra.mxu0 %v6345_v28  ;;  %v7689_v28 = vld [vmem:[#allocation2 + $0x5c] ss:$0 sps:$4 sm:$0x11]  }
 0x198   : > { %5906 = vmatpush3.bf16.msra.mxu1 %v6357_v17  ;;  %v7668_v17 = vld [vmem:[#allocation2 + $0x48] sm:$0xff]   ;;  %v3589_v22 = vshll.u32 %v7689_v28, 16 }
 0x199   : > { %5907 = vmatprep.subr.bf16.mxu1 %v6360_v26  ;;  %v3570_v35 = vshrl.u32 %v7668_v17, 16 }
 0x19a   : > { %4019 = vmatmul.mubr.bf16.vlgmr.msra.gmra.mrb[80].mxu0 %v7615_v13  ;;  %v1228_v53 = vld [vmem:[#allocation2 + $0xd4] sm:$0x1]  ;;  %v3591_v61 = vrot.slane %v3589_v22, 1 }
 0x19b   : > { %5876 = vmatmul.mubr.bf16.gmra.mrb[88].mxu1 %v7535_v19  ;;  %v6366_v19 = vld [vmem:[#allocation10 + $0x230] sm:$0xff]   ;;  %4026 = vmatprep.mubr.bf16.mxu0 %v3544_v37  ;;  %v3598_v37 = vrot.slane %v3596_v10, 1 }
 0x19c   : > { %5879 = vmatprep.mubr.bf16.mxu1 %v7552_v0  ;;  %5908 = vmatpush3.bf16.msra.mxu1 %v6360_v26  ;;  %v7661_v0 = vld [vmem:[#allocation2 + $0x44] ss:$0 sps:$4 sm:$0x11]   ;;  %v1173_v39 = vld [vmem:[#allocation2 + $0xcc] sm:$0x1] }
 0x19d   : > { %5909 = vmatprep.subr.bf16.mxu1 %v6363_v8  ;;  %v3565_v54 = vshll.u32 %v7661_v0, 16  ;;  %v1174_v4 = vsel %vm7014_vm5, 0, %v1173_v39  ;;  %v3733_v39 = vrot.slane %v7630_v55, 1  ;;  %v3618_v55 = vshrl.u32 %v7729_v16, 16 }
 0x19e   : > { %1175 = vst [vmem:[#allocation2 + $0xcc] sm:$0x1] %v1174_v4  ;;  %v3735_v4 = vrot.slane %v7640_v23, 1  ;;  %v3739_v15 = vrot.slane %v7661_v0, 1 }
 0x19f   : > { %1238 = vst [vmem:[#allocation2 + $0xcc] sm:$0xf] %v6671_v7  ;;  %v3567_v52 = vrot.slane %v3565_v54, 1  ;;  %v3732_v54 = vrot.slane %v7625_v24, 1 }
 0x1a0   : > { %5910 = vmatpush3.bf16.msra.mxu1 %v6363_v8 }
 0x1a1   : > { %5911 = vmatprep.subr.bf16.mxu1 %v6366_v19  ;;  %v3568_v46 = vsel %vm1433_vm10, %v3563_v11, %v3567_v52  ;;  %v7736_v11 = vld [vmem:[#allocation2 + $0x80] ss:$0 sps:$4 sm:$0x11]   ;;  %v3620_v52 = vshll.u32 %v7729_v16, 16 }
 0x1a2   : > { %4027 = vmatmul.mubr.bf16.gmra.mrb[84].mxu0 %v7625_v24 }
 0x1a3   : > { %5880 = vmatmul.mubr.bf16.gmra.mrb[92].mxu1 %v7556_v43  ;;  %v1229_v43 = vsel %vm7053_vm8, 0, %v1228_v53  ;;  %4034 = vmatprep.mubr.bf16.mxu0 %v3556_v32  ;;  %v3736_v53 = vrot.slane %v7643_v34, 1  ;;  %v7744_v34 = vld [vmem:[#allocation2 + $0x84] sm:$0xff]  }
 0x1a4   : > { %5883 = vmatprep.mubr.bf16.mxu1 %v7568_v1  ;;  %5912 = vmatpush3.bf16.msra.mxu1 %v6366_v19  ;;  %1230 = vst [vmem:[#allocation2 + $0xd4] sm:$0x1] %v1229_v43  ;;  %v3572_v1 = vshll.u32 %v7668_v17, 16  ;;  %v3730_v19 = vrot.slane %v7618_v6, 1  ;;  %v3613_v6 = vshll.u32 %v7721_v51, 16 }
 0x1a5   : > { %5913 = vmatprep.subr.bf16.mxu1 %v6369_v47  ;;  %1240 = vst [vmem:[#allocation2 + $0xd4] sm:$0x1] %v6671_v7 }
 0x1a6   : > { %v3574_v14 = vrot.slane %v3572_v1, 1  ;;  %v3731_v32 = vsel %vm1642_vm9, %v3729_v36, %v3730_v19  ;;  %v3615_v43 = vrot.slane %v3613_v6, 1  ;;  %v3734_v1 = vsel %vm1642_vm9, %v3732_v54, %v3733_v39 }
 0x1a8   : > { %5914 = vmatpush3.bf16.msra.mxu1 %v6369_v47  ;;  %v3575_v7 = vor.u32 %v3574_v14, %v3570_v35  ;;  %v3608_v47 = vshll.u32 %v7711_v44, 16  ;;  %v3622_v35 = vrot.slane %v3620_v52, 1  ;;  %v3738_v14 = vrot.slane %v7650_v62, 1 }
 0x1aa   : > { %4035 = vmatmul.mubr.bf16.gmra.mrb[88].mxu0 %v7640_v23  ;;  %v3580_v38 = vsel %vm1433_vm10, %v3575_v7, %v3579_v58  ;;  %v3610_v13 = vrot.slane %v3608_v47, 1  ;;  %v3625_v23 = vshll.u32 %v7736_v11, 16  ;;  %v3742_v7 = vrot.slane %v7677_v21, 1 }
 0x1ab   : > { %5884 = vmatmul.mubr.bf16.gmra.mrb[0].mxu1 %v7571_v9  ;;  %4042 = vmatprep.mubr.bf16.mxu0 %v3568_v46  ;;  %v3584_v9 = vshll.u32 %v7685_v12, 16  ;;  %v3737_v46 = vsel %vm1642_vm9, %v3735_v4, %v3736_v53  ;;  %v3740_v0 = vsel %vm1642_vm9, %v3738_v14, %v3739_v15  ;;  %v7782_v4 = vld [vmem:[#allocation2 + $0xa4] ss:$0 sps:$4 sm:$0x11]   ;;  %v3756_v14 = vrot.slane %v7744_v34, 1 }
 0x1ac   : > { %5887 = vmatprep.mubr.bf16.mxu1 %v7581_v56  ;;  %v3582_v56 = vshrl.u32 %v7685_v12, 16 }
 0x1ad   : > { %v3586_v3 = vrot.slane %v3584_v9, 1  ;;  %v3623_v9 = vor.u32 %v3622_v35, %v3618_v55  ;;  %v3661_v55 = vshll.u32 %v7782_v4, 16  ;;  %v7794_v35 = vld [vmem:[#allocation2 + $0xa8] sm:$0xff]  }
 0x1af   : > { %v5411_v26 = vpop.f32.mrb[0].mxu0  ;;  %v3587_v8 = vor.u32 %v3586_v3, %v3582_v56  ;;  %v7753_v56 = vld [vmem:[#allocation2 + $0x8c] ss:$0 sps:$4 sm:$0x11]  }
 0x1b0   : > { %v5412_v48 = vpop.f32.mrb[1].mxu0  ;;  %v3637_v10 = vshll.u32 %v7753_v56, 16  ;;  %v3757_v15 = vrot.slane %v7753_v56, 1 }
 0x1b1   : > { %v7692_v5 = vadd.f32 %v5412_v48, %v5411_v26  ;;  %v5414_v49 = vpop.f32.mrb[2].mxu0  ;;  %v3592_v18 = vsel %vm1433_vm10, %v3587_v8, %v3591_v61  ;;  %v3741_v48 = vrot.slane %v7668_v17, 1  ;;  %v3630_v8 = vshrl.u32 %v7744_v34, 16 }
 0x1b2   : > { %v5415_v33 = vpop.f32.mrb[3].mxu0  ;;  %4043 = vmatmul.mubr.bf16.gmra.mrb[92].mxu0 %v7650_v62  ;;  %v3632_v62 = vshll.u32 %v7744_v34, 16 }
 0x1b3   : > { %v7694_v60 = vadd.f32 %v5415_v33, %v5414_v49  ;;  %5888 = vmatmul.mubr.bf16.gmra.mrb[4].mxu1 %v7584_v45  ;;  %4050 = vmatprep.mubr.bf16.mxu0 %v3580_v38  ;;  %v3594_v45 = vshrl.u32 %v7700_v59, 16  ;;  %v3627_v49 = vrot.slane %v3625_v23, 1 }
 0x1b4   : > { %5891 = vmatprep.mubr.bf16.mxu1 %v7594_v25  ;;  %v3601_v25 = vshll.u32 %v7704_v20, 16  ;;  %v3634_v61 = vrot.slane %v3632_v62, 1 }
 0x1b5   : > { %v3628_v21 = vsel %vm1433_vm10, %v3623_v9, %v3627_v49 }
 0x1b6   : > { %v3603_v30 = vrot.slane %v3601_v25, 1  ;;  %v3635_v25 = vor.u32 %v3634_v61, %v3630_v8  ;;  %v3758_v8 = vsel %vm1642_vm9, %v3756_v14, %v3757_v15 }
 0x1ba   : > { %v5417_v2 = vpop.f32.mrb[4].mxu0  ;;  %4051 = vmatmul.mubr.bf16.gmra.mrb[96].mxu0 %v7668_v17  ;;  %v3743_v17 = vsel %vm1642_vm9, %v3741_v48, %v3742_v7 }
 0x1bb   : > { %v5418_v41 = vpop.f32.mrb[5].mxu0  ;;  %5892 = vmatmul.mubr.bf16.gmra.mrb[8].mxu1 %v7597_v50  ;;  %4058 = vmatprep.mubr.bf16.mxu0 %v3592_v18  ;;  %v3599_v50 = vor.u32 %v3598_v37, %v3594_v45  ;;  %v3744_v45 = vrot.slane %v7685_v12, 1  ;;  %v3747_v18 = vrot.slane %v7700_v59, 1  ;;  %v3748_v37 = vrot.slane %v7704_v20, 1 }
 0x1bc   : > { %v7713_v29 = vadd.f32 %v5418_v41, %v5417_v2  ;;  %v5420_v27 = vpop.f32.mrb[6].mxu0  ;;  %5895 = vmatprep.mubr.bf16.mxu1 %v7604_v31  ;;  %v7763_v2 = vld [vmem:[#allocation2 + $0x90] sm:$0xff]   ;;  %v3745_v41 = vrot.slane %v7689_v28, 1  ;;  %v3750_v20 = vrot.slane %v7711_v44, 1 }
 0x1bd   : > { %v5421_v63 = vpop.f32.mrb[7].mxu0  ;;  %v3604_v31 = vsel %vm1433_vm10, %v3599_v50, %v3603_v30  ;;  %v3644_v36 = vshll.u32 %v7763_v2, 16  ;;  %v3749_v50 = vsel %vm1642_vm9, %v3747_v18, %v3748_v37  ;;  %v3642_v28 = vshrl.u32 %v7763_v2, 16 }
 0x1be   : > { %v7719_v57 = vadd.f32 %v5421_v63, %v5420_v27  ;;  %v3639_v27 = vrot.slane %v3637_v10, 1  ;;  %v6375_v63 = vld [vmem:[#allocation2 + $0x98] ss:$0 sps:$4 sm:$0x11]   ;;  %v3746_v19 = vsel %vm1642_vm9, %v3744_v45, %v3745_v41  ;;  %v3759_v7 = vrot.slane %v7763_v2, 1 }
 0x1bf   : > { %v3646_v30 = vrot.slane %v3644_v36, 1  ;;  %v3649_v47 = vshll.u32 %v6375_v63, 16  ;;  %v3666_v18 = vshrl.u32 %v7794_v35, 16  ;;  %v3763_v36 = vrot.slane %v7782_v4, 1 }
 0x1c1   : > { %v3647_v6 = vor.u32 %v3646_v30, %v3642_v28  ;;  %v3651_v54 = vrot.slane %v3649_v47, 1  ;;  %v6381_v47 = vld [vmem:[#allocation2 + $0xbc] ss:$0 sps:$4 sm:$0x11]  }
 0x1c2   : > { %4059 = vmatmul.mubr.bf16.gmra.mrb[100].mxu0 %v7685_v12  ;;  %v3640_v12 = vsel %vm1433_vm10, %v3635_v25, %v3639_v27  ;;  %v7813_v27 = vld [vmem:[#allocation2 + $0xb4] sm:$0xff]   ;;  %v3769_v14 = vrot.slane %v6381_v47, 1 }
 0x1c3   : > { %5896 = vmatmul.mubr.bf16.gmra.mrb[12].mxu1 %v7608_v40  ;;  %4066 = vmatprep.mubr.bf16.mxu0 %v3604_v31  ;;  %v3611_v40 = vor.u32 %v3610_v13, %v3606_v42  ;;  %v3753_v31 = vrot.slane %v7729_v16, 1  ;;  %v3754_v42 = vrot.slane %v7736_v11, 1 }
 0x1c4   : > { %5915 = vmatprep.mubr.bf16.mxu1 %v3731_v32  ;;  %v3751_v32 = vrot.slane %v7721_v51, 1 }
 0x1c5   : > { %v3616_v24 = vsel %vm1433_vm10, %v3611_v40, %v3615_v43  ;;  %v3755_v52 = vsel %vm1642_vm9, %v3753_v31, %v3754_v42 }
 0x1c6   : > { %v3752_v51 = vsel %vm1642_vm9, %v3750_v20, %v3751_v32 }
 0x1ca   : > { %4067 = vmatmul.mubr.bf16.gmra.mrb[104].mxu0 %v7700_v59  ;;  %v7775_v59 = vld [vmem:[#allocation2 + $0x9c] sm:$0xff]  }
 0x1cb   : > { %5916 = vmatmul.mubr.bf16.vlgmr.msra.gmra.mrb[80].mxu1 %v3734_v1  ;;  %4074 = vmatprep.mubr.bf16.mxu0 %v3616_v24  ;;  %v3656_v53 = vshll.u32 %v7775_v59, 16  ;;  %v3652_v1 = vsel %vm1433_vm10, %v3647_v6, %v3651_v54  ;;  %v3680_v6 = vshll.u32 %v7813_v27, 16 }
 0x1cc   : > { %5919 = vmatprep.mubr.bf16.mxu1 %v3737_v46  ;;  %v3654_v46 = vshrl.u32 %v7775_v59, 16 }
 0x1cd   : > { %v5423_v26 = vpop.f32.mrb[8].mxu0  ;;  %v3658_v24 = vrot.slane %v3656_v53, 1 }
 0x1ce   : > { %v5424_v58 = vpop.f32.mrb[9].mxu0 }
 0x1cf   : > { %v7751_v33 = vadd.f32 %v5424_v58, %v5423_v26  ;;  %v5426_v38 = vpop.f32.mrb[10].mxu0  ;;  %v3760_v58 = vrot.slane %v6375_v63, 1  ;;  %v3659_v62 = vor.u32 %v3658_v24, %v3654_v46  ;;  %v3762_v63 = vrot.slane %v7775_v59, 1 }
 0x1d0   : > { %v5427_v3 = vpop.f32.mrb[11].mxu0  ;;  %v3682_v46 = vrot.slane %v3680_v6, 1  ;;  %v3685_v24 = vshll.u32 %v6381_v47, 16 }
 0x1d1   : > { %v7757_v22 = vadd.f32 %v5427_v3, %v5426_v38  ;;  %v3761_v10 = vsel %vm1642_vm9, %v3759_v7, %v3760_v58  ;;  %v3764_v4 = vsel %vm1642_vm9, %v3762_v63, %v3763_v36  ;;  %v7847_v63 = vld [vmem:[#allocation2 + $0xcc] sm:$0xff]  }
 0x1d2   : > { %4075 = vmatmul.mubr.bf16.gmra.mrb[108].mxu0 %v7711_v44 }
 0x1d3   : > { %5920 = vmatmul.mubr.bf16.gmra.mrb[84].mxu1 %v3740_v0  ;;  %4082 = vmatprep.mubr.bf16.mxu0 %v3628_v21  ;;  %v3663_v0 = vrot.slane %v3661_v55, 1  ;;  %v3668_v21 = vshll.u32 %v7794_v35, 16  ;;  %v6383_v55 = vld [vmem:[#allocation2 + $0xc8] ss:$0 sps:$4 sm:$0x11]  }
 0x1d4   : > { %5923 = vmatprep.mubr.bf16.mxu1 %v3743_v17  ;;  %v6379_v17 = vld [vmem:[#allocation2 + $0xb0] ss:$0 sps:$4 sm:$0x11]  }
 0x1d5   : > { %v3664_v41 = vsel %vm1433_vm10, %v3659_v62, %v3663_v0  ;;  %v3670_v37 = vrot.slane %v3668_v21, 1  ;;  %v3673_v25 = vshll.u32 %v6379_v17, 16 }
 0x1d7   : > { %v3671_v31 = vor.u32 %v3670_v37, %v3666_v18  ;;  %v3675_v42 = vrot.slane %v3673_v25, 1 }
 0x1da   : > { %4083 = vmatmul.mubr.bf16.gmra.mrb[112].mxu0 %v7729_v16 }
 0x1db   : > { %5924 = vmatmul.mubr.bf16.gmra.mrb[88].mxu1 %v3746_v19  ;;  %4090 = vmatprep.mubr.bf16.mxu0 %v3640_v12  ;;  %v3766_v12 = vrot.slane %v6379_v17, 1 }
 0x1dc   : > { %5927 = vmatprep.mubr.bf16.mxu1 %v3749_v50  ;;  %v3765_v50 = vrot.slane %v7794_v35, 1 }
 0x1de   : > { %v5547_v13 = vpop.f32.mrb[16].mxu1 }
 0x1df   : > { %v5548_v39 = vpop.f32.mrb[17].mxu1 }
 0x1e0   : > { %v7785_v40 = vadd.f32 %v5548_v39, %v5547_v13  ;;  %v5550_v44 = vpop.f32.mrb[18].mxu1 }
 0x1e1   : > { %v5551_v43 = vpop.f32.mrb[19].mxu1 }
 0x1e2   : > { %v7789_v16 = vadd.f32 %v5551_v43, %v5550_v44  ;;  %v5429_v11 = vpop.f32.mrb[12].mxu0  ;;  %4091 = vmatmul.mubr.bf16.gmra.mrb[116].mxu0 %v7744_v34 }
 0x1e3   : > { %5928 = vmatmul.mubr.bf16.gmra.mrb[92].mxu1 %v3752_v51  ;;  %v5430_v23 = vpop.f32.mrb[13].mxu0  ;;  %4098 = vmatprep.mubr.bf16.mxu0 %v3652_v1  ;;  %v3767_v51 = vsel %vm1642_vm9, %v3765_v50, %v3766_v12  ;;  %v3678_v1 = vshrl.u32 %v7813_v27, 16  ;;  %v3697_v12 = vshll.u32 %v6383_v55, 16 }
 0x1e4   : > { %5931 = vmatprep.mubr.bf16.mxu1 %v3755_v52  ;;  %v7799_v26 = vadd.f32 %v5430_v23, %v5429_v11  ;;  %v5432_v48 = vpop.f32.mrb[14].mxu0  ;;  %v7830_v52 = vld [vmem:[#allocation2 + $0xc0] sm:$0xff]   ;;  %v3676_v11 = vsel %vm1433_vm10, %v3671_v31, %v3675_v42  ;;  %v3768_v23 = vrot.slane %v7813_v27, 1 }
 0x1e5   : > { %v5433_v9 = vpop.f32.mrb[15].mxu0  ;;  %v3771_v15 = vrot.slane %v7830_v52, 1  ;;  %v3692_v0 = vshll.u32 %v7830_v52, 16  ;;  %v3690_v25 = vshrl.u32 %v7830_v52, 16  ;;  %v3699_v31 = vrot.slane %v3697_v12, 1 }
 0x1e6   : > { %v5553_v49 = vpop.f32.mrb[20].mxu1  ;;  %v7802_v38 = vadd.f32 %v5433_v9, %v5432_v48  ;;  %v3772_v48 = vrot.slane %v6383_v55, 1  ;;  %v3683_v9 = vor.u32 %v3682_v46, %v3678_v1  ;;  %v3702_v55 = vshrl.u32 %v7847_v63, 16 }
 0x1e7   : > { %v5554_v3 = vpop.f32.mrb[21].mxu1  ;;  %v3694_v50 = vrot.slane %v3692_v0, 1 }
 0x1e8   : > { %v7805_v56 = vadd.f32 %v5554_v3, %v5553_v49  ;;  %v5556_v34 = vpop.f32.mrb[22].mxu1  ;;  %v3687_v49 = vrot.slane %v3685_v24, 1 }
 0x1e9   : > { %v5557_v61 = vpop.f32.mrb[23].mxu1 }
 0x1ea   : > { %v7809_v45 = vadd.f32 %v5557_v61, %v5556_v34  ;;  %4099 = vmatmul.mubr.bf16.gmra.mrb[120].mxu0 %v7763_v2  ;;  %v3770_v34 = vsel %vm1642_vm9, %v3768_v23, %v3769_v14 }
 0x1eb   : > { %5932 = vmatmul.mubr.bf16.gmra.mrb[0].mxu1 %v3758_v8  ;;  %4106 = vmatprep.mubr.bf16.mxu0 %v3664_v41  ;;  %v6385_v8 = vld [vmem:[#allocation2 + $0xd4] ss:$0 sps:$4 sm:$0x11]   ;;  %v3773_v41 = vsel %vm1642_vm9, %v3771_v15, %v3772_v48 }
 0x1ec   : > { %5935 = vmatprep.mubr.bf16.mxu1 %v3761_v10  ;;  %v5435_v19 = vpop.f32.mrb[16].mxu0  ;;  %v3709_v14 = vshll.u32 %v6385_v8, 16 }
 0x1ed   : > { %v5436_v28 = vpop.f32.mrb[17].mxu0 }
 0x1ee   : > { %v5559_v30 = vpop.f32.mrb[24].mxu1  ;;  %v7819_v20 = vadd.f32 %v5436_v28, %v5435_v19  ;;  %v5438_v32 = vpop.f32.mrb[18].mxu0  ;;  %v3688_v19 = vsel %vm1433_vm10, %v3683_v9, %v3687_v49  ;;  %v3774_v28 = vrot.slane %v7847_v63, 1 }
 0x1ef   : > { %v5560_v13 = vpop.f32.mrb[25].mxu1  ;;  %v5439_v54 = vpop.f32.mrb[19].mxu0 }
 0x1f0   : > { %v7822_v39 = vadd.f32 %v5560_v13, %v5559_v30  ;;  %v5562_v2 = vpop.f32.mrb[26].mxu1  ;;  %v7825_v53 = vadd.f32 %v5439_v54, %v5438_v32  ;;  %v3775_v30 = vrot.slane %v6385_v8, 1  ;;  %v3695_v32 = vor.u32 %v3694_v50, %v3690_v25 }
 0x1f1   : > { %v5563_v44 = vpop.f32.mrb[27].mxu1  ;;  %v3704_v13 = vshll.u32 %v7847_v63, 16 }
 0x1f2   : > { %v7828_v43 = vadd.f32 %v5563_v44, %v5562_v2  ;;  %4107 = vmatmul.mubr.bf16.gmra.mrb[124].mxu0 %v7775_v59  ;;  %v3700_v24 = vsel %vm1433_vm10, %v3695_v32, %v3699_v31 }
 0x1f3   : > { %5936 = vmatmul.mubr.bf16.gmra.mrb[4].mxu1 %v3764_v4  ;;  %4114 = vmatprep.mubr.bf16.mxu0 %v3676_v11  ;;  %v3776_v4 = vsel %vm1642_vm9, %v3774_v28, %v3775_v30  ;;  %v3706_v23 = vrot.slane %v3704_v13, 1 }
 0x1f4   : > { %5939 = vmatprep.mubr.bf16.mxu1 %v3767_v51 }
 0x1f5   : > { %v5441_v58 = vpop.f32.mrb[20].mxu0 }
 0x1f6   : > { %v5565_v7 = vpop.f32.mrb[28].mxu1  ;;  %v5442_v3 = vpop.f32.mrb[21].mxu0 }
 0x1f7   : > { %v5566_v62 = vpop.f32.mrb[29].mxu1  ;;  %v7841_v61 = vadd.f32 %v5442_v3, %v5441_v58  ;;  %v5444_v59 = vpop.f32.mrb[22].mxu0  ;;  %v3711_v58 = vrot.slane %v3709_v14, 1 }
 0x1f8   : > { %v7838_v17 = vadd.f32 %v5566_v62, %v5565_v7  ;;  %v5568_v21 = vpop.f32.mrb[30].mxu1  ;;  %v5445_v18 = vpop.f32.mrb[23].mxu0  ;;  %v3707_v7 = vor.u32 %v3706_v23, %v3702_v55 }
 0x1f9   : > { %v5569_v10 = vpop.f32.mrb[31].mxu1  ;;  %v7849_v36 = vadd.f32 %v5445_v18, %v5444_v59 }
 0x1fa   : > { %v7844_v37 = vadd.f32 %v5569_v10, %v5568_v21  ;;  %4115 = vmatmul.mubr.bf16.gmra.mrb[128].mxu0 %v7794_v35 }
 0x1fb   : > { %5940 = vmatmul.mubr.bf16.gmra.mrb[8].mxu1 %v3770_v34  ;;  %4122 = vmatprep.mubr.bf16.mxu0 %v3688_v19 }
 0x1fc   : > { %5943 = vmatprep.mubr.bf16.mxu1 %v3773_v41  ;;  %v3712_v41 = vsel %vm1433_vm10, %v3707_v7, %v3711_v58 }
 0x1fd   : > { %v5447_v6 = vpop.f32.mrb[24].mxu0 }
 0x1fe   : > { %v5571_v47 = vpop.f32.mrb[32].mxu1  ;;  %v5448_v44 = vpop.f32.mrb[25].mxu0 }
 0x1ff   : > { %v5572_v42 = vpop.f32.mrb[33].mxu1  ;;  %v7858_v11 = vadd.f32 %v5448_v44, %v5447_v6  ;;  %v5450_v1 = vpop.f32.mrb[26].mxu0 }
 0x200   : > { %v7855_v54 = vadd.f32 %v5572_v42, %v5571_v47  ;;  %v5574_v2 = vpop.f32.mrb[34].mxu1  ;;  %v5451_v35 = vpop.f32.mrb[27].mxu0 }
 0x201   : > { %v5575_v51 = vpop.f32.mrb[35].mxu1  ;;  %v7864_v15 = vadd.f32 %v5451_v35, %v5450_v1 }
 0x202   : > { %v7860_v46 = vadd.f32 %v5575_v51, %v5574_v2  ;;  %4123 = vmatmul.mubr.bf16.gmra.mrb[132].mxu0 %v7813_v27 }
 0x203   : > { %5944 = vmatmul.mubr.bf16.gmra.mrb[12].mxu1 %v3776_v4  ;;  %4130 = vmatprep.mubr.bf16.mxu0 %v3700_v24 }
 0x205   : > { %v5453_v49 = vpop.f32.mrb[28].mxu0 }
 0x206   : > { %v5577_v48 = vpop.f32.mrb[36].mxu1  ;;  %v5454_v3 = vpop.f32.mrb[29].mxu0 }
 0x207   : > { %v5578_v9 = vpop.f32.mrb[37].mxu1  ;;  %v7869_v34 = vadd.f32 %v5454_v3, %v5453_v49  ;;  %v5456_v59 = vpop.f32.mrb[30].mxu0 }
 0x208   : > { %v7867_v62 = vadd.f32 %v5578_v9, %v5577_v48  ;;  %v5580_v0 = vpop.f32.mrb[38].mxu1  ;;  %v5457_v8 = vpop.f32.mrb[31].mxu0 }
 0x209   : > { %v5581_v21 = vpop.f32.mrb[39].mxu1  ;;  %v7874_v27 = vadd.f32 %v5457_v8, %v5456_v59 }
 0x20a   : > { %v7871_v10 = vadd.f32 %v5581_v21, %v5580_v0  ;;  %4131 = vmatmul.mubr.bf16.gmra.mrb[136].mxu0 %v7830_v52 }
 0x20b   : > { %4138 = vmatprep.mubr.bf16.mxu0 %v3712_v41 }
 0x20d   : > { %v5459_v19 = vpop.f32.mrb[32].mxu0 }
 0x20e   : > { %v5583_v18 = vpop.f32.mrb[40].mxu1  ;;  %v5460_v28 = vpop.f32.mrb[33].mxu0 }
 0x20f   : > { %v5584_v25 = vpop.f32.mrb[41].mxu1  ;;  %v5461_v47 = vadd.f32 %v5460_v28, %v5459_v19  ;;  %v5462_v32 = vpop.f32.mrb[34].mxu0 }
 0x210   : > { %v7877_v50 = vadd.f32 %v5584_v25, %v5583_v18  ;;  %v5586_v12 = vpop.f32.mrb[42].mxu1  ;;  %v5463_v42 = vpop.f32.mrb[35].mxu0 }
 0x211   : > { %v5587_v30 = vpop.f32.mrb[43].mxu1  ;;  %v5464_v13 = vadd.f32 %v5463_v42, %v5462_v32 }
 0x212   : > { %v7879_v31 = vadd.f32 %v5587_v30, %v5586_v12  ;;  %4139 = vmatmul.mubr.bf16.gmra.mrb[140].mxu0 %v7847_v63 }
 0x215   : > { %v5465_v52 = vpop.f32.mrb[36].mxu0 }
 0x216   : > { %v5589_v6 = vpop.f32.mrb[44].mxu1  ;;  %v5466_v51 = vpop.f32.mrb[37].mxu0 }
 0x217   : > { %v5590_v2 = vpop.f32.mrb[45].mxu1  ;;  %v5467_v35 = vadd.f32 %v5466_v51, %v5465_v52  ;;  %v5468_v24 = vpop.f32.mrb[38].mxu0 }
 0x218   : > { %v7882_v4 = vadd.f32 %v5590_v2, %v5589_v6  ;;  %v5592_v44 = vpop.f32.mrb[46].mxu1  ;;  %v5469_v23 = vpop.f32.mrb[39].mxu0 }
 0x219   : > { %v5593_v1 = vpop.f32.mrb[47].mxu1  ;;  %v5470_v14 = vadd.f32 %v5469_v23, %v5468_v24 }
 0x21a   : > { %v7884_v55 = vadd.f32 %v5593_v1, %v5592_v44 }
 0x21d   : > { %v5471_v58 = vpop.f32.mrb[40].mxu0 }
 0x21e   : > { %v5595_v48 = vpop.f32.mrb[48].mxu1  ;;  %v5472_v63 = vpop.f32.mrb[41].mxu0 }
 0x21f   : > { %v5596_v7 = vpop.f32.mrb[49].mxu1  ;;  %v5473_v3 = vadd.f32 %v5472_v63, %v5471_v58  ;;  %v5474_v21 = vpop.f32.mrb[42].mxu0 }
 0x220   : > { %v5597_v9 = vadd.f32 %v5596_v7, %v5595_v48  ;;  %v5598_v49 = vpop.f32.mrb[50].mxu1  ;;  %v5475_v41 = vpop.f32.mrb[43].mxu0 }
 0x221   : > { %v5599_v0 = vpop.f32.mrb[51].mxu1  ;;  %v5476_v18 = vadd.f32 %v5475_v41, %v5474_v21 }
 0x222   : > { %v7886_v59 = vadd.f32 %v5597_v9, %v5461_v47  ;;  %v5600_v8 = vadd.f32 %v5599_v0, %v5598_v49 }
 0x224   : > { %v7888_v25 = vadd.f32 %v5600_v8, %v5464_v13 }
 0x225   : > { %v5477_v28 = vpop.f32.mrb[44].mxu0 }
 0x226   : > { %v5601_v19 = vpop.f32.mrb[52].mxu1  ;;  %v5478_v42 = vpop.f32.mrb[45].mxu0 }
 0x227   : > { %v5602_v12 = vpop.f32.mrb[53].mxu1  ;;  %v5479_v2 = vadd.f32 %v5478_v42, %v5477_v28  ;;  %v5480_v52 = vpop.f32.mrb[46].mxu0 }
 0x228   : > { %v5603_v30 = vadd.f32 %v5602_v12, %v5601_v19  ;;  %v5604_v32 = vpop.f32.mrb[54].mxu1  ;;  %v5481_v1 = vpop.f32.mrb[47].mxu0 }
 0x229   : > { %v5605_v6 = vpop.f32.mrb[55].mxu1  ;;  %v5482_v47 = vadd.f32 %v5481_v1, %v5480_v52 }
 0x22a   : > { %v7890_v44 = vadd.f32 %v5603_v30, %v5467_v35  ;;  %v5606_v51 = vadd.f32 %v5605_v6, %v5604_v32 }
 0x22c   : > { %v7892_v24 = vadd.f32 %v5606_v51, %v5470_v14 }
 0x22d   : > { %v5483_v13 = vpop.f32.mrb[48].mxu0 }
 0x22e   : > { %v5607_v23 = vpop.f32.mrb[56].mxu1  ;;  %v5484_v9 = vpop.f32.mrb[49].mxu0 }
 0x22f   : > { %v5608_v48 = vpop.f32.mrb[57].mxu1  ;;  %v5485_v63 = vadd.f32 %v5484_v9, %v5483_v13  ;;  %v5486_v0 = vpop.f32.mrb[50].mxu0 }
 0x230   : > { %v5609_v7 = vadd.f32 %v5608_v48, %v5607_v23  ;;  %v5610_v58 = vpop.f32.mrb[58].mxu1  ;;  %v5487_v41 = vpop.f32.mrb[51].mxu0 }
 0x231   : > { %v5611_v49 = vpop.f32.mrb[59].mxu1  ;;  %v5488_v35 = vadd.f32 %v5487_v41, %v5486_v0 }
 0x232   : > { %v7894_v21 = vadd.f32 %v5609_v7, %v5473_v3  ;;  %v5612_v8 = vadd.f32 %v5611_v49, %v5610_v58 }
 0x234   : > { %v7896_v19 = vadd.f32 %v5612_v8, %v5476_v18 }
 0x235   : > { %v5489_v14 = vpop.f32.mrb[52].mxu0 }
 0x236   : > { %v5613_v12 = vpop.f32.mrb[60].mxu1  ;;  %v5490_v42 = vpop.f32.mrb[53].mxu0 }
 0x237   : > { %v5614_v28 = vpop.f32.mrb[61].mxu1  ;;  %v5491_v52 = vadd.f32 %v5490_v42, %v5489_v14  ;;  %v5492_v51 = vpop.f32.mrb[54].mxu0 }
 0x238   : > { %v5615_v30 = vadd.f32 %v5614_v28, %v5613_v12  ;;  %v5616_v32 = vpop.f32.mrb[62].mxu1  ;;  %v5493_v48 = vpop.f32.mrb[55].mxu0 }
 0x239   : > { %v5617_v6 = vpop.f32.mrb[63].mxu1  ;;  %v5494_v3 = vadd.f32 %v5493_v48, %v5492_v51 }
 0x23a   : > { %v7898_v1 = vadd.f32 %v5615_v30, %v5479_v2  ;;  %v5618_v23 = vadd.f32 %v5617_v6, %v5616_v32 }
 0x23c   : > { %8356 = vst [vmem:[#allocation27_spill] sm:$0xff] %v7898_v1  ;;  %v7900_v13 = vadd.f32 %v5618_v23, %v5482_v47 }
 0x23d   : > { %v5495_v18 = vpop.f32.mrb[56].mxu0 }
 0x23e   : > { %8357 = vst [vmem:[#allocation28_spill] sm:$0xff] %v7900_v13  ;;  %v5619_v7 = vpop.f32.mrb[64].mxu1  ;;  %v5496_v0 = vpop.f32.mrb[57].mxu0 }
 0x23f   : > { %v5620_v58 = vpop.f32.mrb[65].mxu1  ;;  %v5497_v41 = vadd.f32 %v5496_v0, %v5495_v18  ;;  %v5498_v12 = vpop.f32.mrb[58].mxu0 }
 0x240   : > { %v5621_v9 = vadd.f32 %v5620_v58, %v5619_v7  ;;  %v5622_v49 = vpop.f32.mrb[66].mxu1  ;;  %v5499_v42 = vpop.f32.mrb[59].mxu0 }
 0x241   : > { %v5623_v8 = vpop.f32.mrb[67].mxu1  ;;  %v5500_v2 = vadd.f32 %v5499_v42, %v5498_v12 }
 0x242   : > { %v7902_v28 = vadd.f32 %v5621_v9, %v5485_v63  ;;  %v5624_v14 = vadd.f32 %v5623_v8, %v5622_v49 }
 0x244   : > { %v7904_v30 = vadd.f32 %v5624_v14, %v5488_v35 }
 0x245   : > { %v5501_v47 = vpop.f32.mrb[60].mxu0 }
 0x246   : > { %8358 = vst [vmem:[#allocation29_spill] sm:$0xff] %v7904_v30  ;;  %v5625_v32 = vpop.f32.mrb[68].mxu1  ;;  %v5502_v48 = vpop.f32.mrb[61].mxu0 }
 0x247   : > { %v5626_v6 = vpop.f32.mrb[69].mxu1  ;;  %v5503_v7 = vadd.f32 %v5502_v48, %v5501_v47  ;;  %v5504_v58 = vpop.f32.mrb[62].mxu0 }
 0x248   : > { %v5627_v51 = vadd.f32 %v5626_v6, %v5625_v32  ;;  %v5628_v23 = vpop.f32.mrb[70].mxu1  ;;  %v5505_v0 = vpop.f32.mrb[63].mxu0 }
 0x249   : > { %v5629_v13 = vpop.f32.mrb[71].mxu1  ;;  %v5506_v63 = vadd.f32 %v5505_v0, %v5504_v58 }
 0x24a   : > { %v7906_v1 = vadd.f32 %v5627_v51, %v5491_v52  ;;  %v5630_v18 = vadd.f32 %v5629_v13, %v5628_v23 }
 0x24c   : > { %v7908_v9 = vadd.f32 %v5630_v18, %v5494_v3 }
 0x24d   : > { %v5821_v35 = vpop.f32.mrb[64].mxu0 }
 0x24e   : > { %v5631_v49 = vpop.f32.mrb[72].mxu1  ;;  %v2103_v42 = vadd.f32 %v5821_v35, %v7713_v29  ;;  %v2094_v32 = vpop.f32.mrb[65].mxu0 }
 0x24f   : > { %v5632_v8 = vpop.f32.mrb[73].mxu1  ;;  %v2095_v30 = vadd.f32 %v7692_v5, %v2094_v32  ;;  %v5822_v47 = vpop.f32.mrb[66].mxu0 }
 0x250   : > { %v5633_v12 = vadd.f32 %v5632_v8, %v5631_v49  ;;  %v5634_v14 = vpop.f32.mrb[74].mxu1  ;;  %v7915_v13 = vadd.f32 %v7805_v56, %v2103_v42  ;;  %v2106_v3 = vadd.f32 %v5822_v47, %v7719_v57  ;;  %v2097_v51 = vpop.f32.mrb[67].mxu0 }
 0x251   : > { %v5635_v6 = vpop.f32.mrb[75].mxu1  ;;  %v5968_v23 = vadd.f32 %v7785_v40, %v2095_v30  ;;  %v2098_v58 = vadd.f32 %v7694_v60, %v2097_v51 }
 0x252   : > { %v7912_v48 = vadd.f32 %v5633_v12, %v5497_v41  ;;  %v5636_v52 = vadd.f32 %v5635_v6, %v5634_v14  ;;  %v5972_v29 = vadd.f32 %v7809_v45, %v2106_v3 }
 0x253   : > { %v5976_v5 = vadd.f32 %v7789_v16, %v2098_v58 }
 0x254   : > { %v7920_v18 = vadd.f32 %v5636_v52, %v5500_v2 }
 0x255   : > { %v5825_v49 = vpop.f32.mrb[68].mxu0 }
 0x256   : > { %v5637_v0 = vpop.f32.mrb[76].mxu1  ;;  %v2119_v56 = vadd.f32 %v5825_v49, %v7799_v26  ;;  %v2110_v12 = vpop.f32.mrb[69].mxu0 }
 0x257   : > { %v5638_v41 = vpop.f32.mrb[77].mxu1  ;;  %v2111_v14 = vadd.f32 %v7751_v33, %v2110_v12  ;;  %v5826_v40 = vpop.f32.mrb[70].mxu0 }
 0x258   : > { %v5639_v8 = vadd.f32 %v5638_v41, %v5637_v0  ;;  %v5640_v35 = vpop.f32.mrb[78].mxu1  ;;  %v5980_v2 = vadd.f32 %v7838_v17, %v2119_v56  ;;  %v2122_v45 = vadd.f32 %v5826_v40, %v7802_v38  ;;  %v2113_v16 = vpop.f32.mrb[71].mxu0 }
 0x259   : > { %v5641_v57 = vpop.f32.mrb[79].mxu1  ;;  %v5984_v42 = vadd.f32 %v7822_v39, %v2111_v14  ;;  %v2114_v32 = vadd.f32 %v7757_v22, %v2113_v16 }
 0x25a   : > { %v7926_v30 = vadd.f32 %v5639_v8, %v5503_v7  ;;  %v5642_v60 = vadd.f32 %v5641_v57, %v5640_v35  ;;  %v5988_v26 = vadd.f32 %v7844_v37, %v2122_v45 }
 0x25b   : > { %v5992_v47 = vadd.f32 %v7828_v43, %v2114_v32 }
 0x25c   : > { %v7932_v6 = vadd.f32 %v5642_v60, %v5506_v63 }
 0x25d   : > { %v5829_v33 = vpop.f32.mrb[72].mxu0 }
 0x25e   : > { %v2135_v7 = vadd.f32 %v5829_v33, %v7841_v61  ;;  %v2126_v52 = vpop.f32.mrb[73].mxu0 }
 0x25f   : > { %v2127_v3 = vadd.f32 %v7819_v20, %v2126_v52  ;;  %v5830_v17 = vpop.f32.mrb[74].mxu0 }
 0x260   : > { %v7939_v38 = vadd.f32 %v7867_v62, %v2135_v7  ;;  %v2138_v39 = vadd.f32 %v5830_v17, %v7849_v36  ;;  %v2129_v51 = vpop.f32.mrb[75].mxu0 }
 0x261   : > { %v6000_v22 = vadd.f32 %v7855_v54, %v2127_v3  ;;  %v2130_v63 = vadd.f32 %v7825_v53, %v2129_v51 }
 0x262   : > { %v6004_v37 = vadd.f32 %v7871_v10, %v2138_v39 }
 0x263   : > { %v6008_v43 = vadd.f32 %v7860_v46, %v2130_v63 }
 0x265   : > { %v5833_v58 = vpop.f32.mrb[76].mxu0 }
 0x266   : > { %v2151_v61 = vadd.f32 %v5833_v58, %v7869_v34  ;;  %v2142_v0 = vpop.f32.mrb[77].mxu0 }
 0x267   : > { %v2143_v20 = vadd.f32 %v7858_v11, %v2142_v0  ;;  %v5834_v41 = vpop.f32.mrb[78].mxu0 }
 0x268   : > { %v7949_v62 = vadd.f32 %v7882_v4, %v2151_v61  ;;  %v2154_v36 = vadd.f32 %v5834_v41, %v7874_v27  ;;  %v2145_v49 = vpop.f32.mrb[79].mxu0 }
 0x269   : > { %v7953_v54 = vadd.f32 %v7877_v50, %v2143_v20  ;;  %v2146_v53 = vadd.f32 %v7864_v15, %v2145_v49 }
 0x26a   : > { %v7957_v46 = vadd.f32 %v7884_v55, %v2154_v36 }
 0x26b   : > { %v7960_v34 = vadd.f32 %v7879_v31, %v2146_v53 }
 0x26d   : > { %v5683_v10 = vpop.f32.mrb[80].mxu0 }
 0x26e   : > { %v5684_v11 = vpop.f32.mrb[81].mxu0 }
 0x26f   : > { %v5685_v8 = vadd.f32 %v5684_v11, %v5683_v10  ;;  %v5686_v35 = vpop.f32.mrb[82].mxu0 }
 0x270   : > { %v5687_v4 = vpop.f32.mrb[83].mxu0 }
 0x271   : > { %v5688_v56 = vadd.f32 %v5687_v4, %v5686_v35  ;;  %v5969_v12 = vadd.f32 %v5968_v23, %v5685_v8 }
 0x273   : > { %v5977_v27 = vadd.f32 %v5976_v5, %v5688_v56 }
 0x275   : > { %v5689_v57 = vpop.f32.mrb[84].mxu0 }
 0x276   : > { %v5690_v14 = vpop.f32.mrb[85].mxu0 }
 0x277   : > { %v5691_v50 = vadd.f32 %v5690_v14, %v5689_v57  ;;  %v5692_v40 = vpop.f32.mrb[86].mxu0 }
 0x278   : > { %v5693_v60 = vpop.f32.mrb[87].mxu0 }
 0x279   : > { %v5694_v15 = vadd.f32 %v5693_v60, %v5692_v40  ;;  %v5965_v55 = vadd.f32 %v7915_v13, %v5691_v50 }
 0x27b   : > { %v5973_v45 = vadd.f32 %v5972_v29, %v5694_v15 }
 0x27d   : > { %v5695_v16 = vpop.f32.mrb[88].mxu0 }
 0x27e   : > { %v5696_v31 = vpop.f32.mrb[89].mxu0 }
 0x27f   : > { %v5697_v32 = vadd.f32 %v5696_v31, %v5695_v16  ;;  %v5698_v33 = vpop.f32.mrb[90].mxu0 }
 0x280   : > { %v5699_v7 = vpop.f32.mrb[91].mxu0 }
 0x281   : > { %v5700_v52 = vadd.f32 %v5699_v7, %v5698_v33  ;;  %v5985_v3 = vadd.f32 %v5984_v42, %v5697_v32 }
 0x283   : > { %v5993_v17 = vadd.f32 %v5992_v47, %v5700_v52 }
 0x285   : > { %v5701_v39 = vpop.f32.mrb[92].mxu0 }
 0x286   : > { %v5702_v23 = vpop.f32.mrb[93].mxu0 }
 0x287   : > { %v5703_v5 = vadd.f32 %v5702_v23, %v5701_v39  ;;  %v5704_v51 = vpop.f32.mrb[94].mxu0 }
 0x288   : > { %v5705_v63 = vpop.f32.mrb[95].mxu0 }
 0x289   : > { %v5706_v58 = vadd.f32 %v5705_v63, %v5704_v51  ;;  %v5981_v61 = vadd.f32 %v5980_v2, %v5703_v5 }
 0x28b   : > { %v5989_v0 = vadd.f32 %v5988_v26, %v5706_v58 }
 0x28d   : > { %v5707_v20 = vpop.f32.mrb[96].mxu0 }
 0x28e   : > { %v5708_v41 = vpop.f32.mrb[97].mxu0 }
 0x28f   : > { %v5709_v13 = vadd.f32 %v5708_v41, %v5707_v20  ;;  %v5710_v29 = vpop.f32.mrb[98].mxu0 }
 0x290   : > { %v5711_v36 = vpop.f32.mrb[99].mxu0 }
 0x291   : > { %v5712_v49 = vadd.f32 %v5711_v36, %v5710_v29  ;;  %v6001_v53 = vadd.f32 %v6000_v22, %v5709_v13 }
 0x293   : > { %v7963_v10 = vadd.f32 %v6008_v43, %v5712_v49 }
 0x295   : > { %v5713_v42 = vpop.f32.mrb[100].mxu0 }
 0x296   : > { %v5714_v47 = vpop.f32.mrb[101].mxu0 }
 0x297   : > { %v5715_v11 = vadd.f32 %v5714_v47, %v5713_v42  ;;  %v5716_v8 = vpop.f32.mrb[102].mxu0 }
 0x298   : > { %v5717_v35 = vpop.f32.mrb[103].mxu0 }
 0x299   : > { %v5718_v4 = vadd.f32 %v5717_v35, %v5716_v8  ;;  %v5997_v56 = vadd.f32 %v7939_v38, %v5715_v11 }
 0x29b   : > { %v6005_v26 = vadd.f32 %v6004_v37, %v5718_v4 }
 0x29d   : > { %v5719_v50 = vpop.f32.mrb[104].mxu0 }
 0x29e   : > { %v5917_v2 = vpop.f32.mrb[80].mxu1  ;;  %v5720_v43 = vpop.f32.mrb[105].mxu0 }
 0x29f   : > { %v7966_v57 = vadd.f32 %v5965_v55, %v5917_v2  ;;  %v4181_v14 = vpop.f32.mrb[81].mxu1  ;;  %v5721_v16 = vadd.f32 %v5720_v43, %v5719_v50  ;;  %v5722_v31 = vpop.f32.mrb[106].mxu0 }
 0x2a0   : > { %v7969_v40 = vadd.f32 %v5969_v12, %v4181_v14  ;;  %v5918_v22 = vpop.f32.mrb[82].mxu1  ;;  %v5723_v33 = vpop.f32.mrb[107].mxu0 }
 0x2a1   : > { %v7971_v60 = vadd.f32 %v5973_v45, %v5918_v22  ;;  %v4184_v15 = vpop.f32.mrb[83].mxu1  ;;  %v5724_v37 = vadd.f32 %v5723_v33, %v5722_v31  ;;  %v6017_v7 = vadd.f32 %v7953_v54, %v5721_v16 }
 0x2a2   : > { %v7973_v32 = vadd.f32 %v5977_v27, %v4184_v15 }
 0x2a3   : > { %v5307_v38 = vpack.c.bf16 %v7971_v60, %v7966_v57  ;;  %v6025_v52 = vadd.f32 %v7960_v34, %v5724_v37 }
 0x2a4   : > { %v5302_v55 = vpack.c.bf16 %v7973_v32, %v7969_v40  ;;  %v4596_v12 = vadd.f32 %v7973_v32, %v7969_v40 }
 0x2a5   : > { %5380 = vst [vmem:[%s7982_s13 + $0x8] sm:$0xff] %v5307_v38   ;;  %v5725_v5 = vpop.f32.mrb[108].mxu0 }
 0x2a6   : > { %5303 = vst [vmem:[%s7982_s13] sm:$0xff] %v5302_v55   ;;  %v4597_v27 = vadd.f32 %v7966_v57, %v4596_v12  ;;  %v5921_v45 = vpop.f32.mrb[84].mxu1  ;;  %v5726_v58 = vpop.f32.mrb[109].mxu0 }
 0x2a7   : > { %v7988_v39 = vadd.f32 %v5981_v61, %v5921_v45  ;;  %v4197_v23 = vpop.f32.mrb[85].mxu1  ;;  %v5727_v13 = vadd.f32 %v5726_v58, %v5725_v5  ;;  %v5728_v29 = vpop.f32.mrb[110].mxu0 }
 0x2a8   : > { %v7990_v51 = vadd.f32 %v5985_v3, %v4197_v23  ;;  %v4598_v54 = vadd.f32 %v7971_v60, %v4597_v27  ;;  %v5922_v63 = vpop.f32.mrb[86].mxu1  ;;  %v5729_v61 = vpop.f32.mrb[111].mxu0 }
 0x2a9   : > { %v7993_v20 = vadd.f32 %v5989_v0, %v5922_v63  ;;  %v4200_v41 = vpop.f32.mrb[87].mxu1  ;;  %v5730_v49 = vadd.f32 %v5729_v61, %v5728_v29  ;;  %v6013_v0 = vadd.f32 %v7949_v62, %v5727_v13 }
 0x2aa   : > { %v4599_v36 = vadd.f32 %v7990_v51, %v4598_v54  ;;  %v7996_v34 = vadd.f32 %v5993_v17, %v4200_v41 }
 0x2ab   : > { %v5317_v3 = vpack.c.bf16 %v7993_v20, %v7988_v39  ;;  %v6021_v17 = vadd.f32 %v7957_v46, %v5730_v49 }
 0x2ac   : > { %v5312_v42 = vpack.c.bf16 %v7996_v34, %v7990_v51  ;;  %v4600_v47 = vadd.f32 %v7996_v34, %v4599_v36 }
 0x2ad   : > { %5382 = vst [vmem:[%s7982_s13 + $0x18] sm:$0xff] %v5317_v3   ;;  %v5731_v2 = vpop.f32.mrb[112].mxu0 }
 0x2ae   : > { %5381 = vst [vmem:[%s7982_s13 + $0x10] sm:$0xff] %v5312_v42   ;;  %v4601_v11 = vadd.f32 %v7988_v39, %v4600_v47  ;;  %v5925_v8 = vpop.f32.mrb[88].mxu1  ;;  %v5732_v43 = vpop.f32.mrb[113].mxu0 }
 0x2af   : > { %v8008_v35 = vadd.f32 %v5997_v56, %v5925_v8  ;;  %v4213_v4 = vpop.f32.mrb[89].mxu1  ;;  %v5733_v16 = vadd.f32 %v5732_v43, %v5731_v2  ;;  %v5734_v31 = vpop.f32.mrb[114].mxu0 }
 0x2b0   : > { %v8010_v14 = vadd.f32 %v6001_v53, %v4213_v4  ;;  %v4602_v50 = vadd.f32 %v7993_v20, %v4601_v11  ;;  %v5926_v22 = vpop.f32.mrb[90].mxu1  ;;  %v5735_v56 = vpop.f32.mrb[115].mxu0 }
 0x2b1   : > { %v8013_v62 = vadd.f32 %v6005_v26, %v5926_v22  ;;  %v4216_v15 = vpop.f32.mrb[91].mxu1  ;;  %v5736_v38 = vadd.f32 %v5735_v56, %v5734_v31  ;;  %v6031_v26 = vadd.f32 %v7886_v59, %v5733_v16 }
 0x2b2   : > { %v4603_v33 = vadd.f32 %v8010_v14, %v4602_v50  ;;  %v8017_v46 = vadd.f32 %v7963_v10, %v4216_v15 }
 0x2b3   : > { %v5327_v53 = vpack.c.bf16 %v8013_v62, %v8008_v35  ;;  %v6037_v10 = vadd.f32 %v7888_v25, %v5736_v38 }
 0x2b4   : > { %v5322_v37 = vpack.c.bf16 %v8017_v46, %v8010_v14  ;;  %v4604_v55 = vadd.f32 %v8017_v46, %v4603_v33 }
 0x2b5   : > { %5384 = vst [vmem:[%s7982_s13 + $0x28] sm:$0xff] %v5327_v53   ;;  %v5737_v5 = vpop.f32.mrb[116].mxu0 }
 0x2b6   : > { %5383 = vst [vmem:[%s7982_s13 + $0x20] sm:$0xff] %v5322_v37   ;;  %v4605_v12 = vadd.f32 %v8008_v35, %v4604_v55  ;;  %v5929_v27 = vpop.f32.mrb[92].mxu1  ;;  %v5738_v41 = vpop.f32.mrb[117].mxu0 }
 0x2b7   : > { %v8029_v45 = vadd.f32 %v6013_v0, %v5929_v27  ;;  %v4229_v23 = vpop.f32.mrb[93].mxu1  ;;  %v5739_v29 = vadd.f32 %v5738_v41, %v5737_v5  ;;  %v5740_v36 = vpop.f32.mrb[118].mxu0 }
 0x2b8   : > { %v8031_v54 = vadd.f32 %v6017_v7, %v4229_v23  ;;  %v4606_v63 = vadd.f32 %v8013_v62, %v4605_v12  ;;  %v5930_v58 = vpop.f32.mrb[94].mxu1  ;;  %v5741_v3 = vpop.f32.mrb[119].mxu0 }
 0x2b9   : > { %v8034_v59 = vadd.f32 %v6021_v17, %v5930_v58  ;;  %v4232_v13 = vpop.f32.mrb[95].mxu1  ;;  %v5742_v49 = vadd.f32 %v5741_v3, %v5740_v36  ;;  %v6028_v0 = vadd.f32 %v7890_v44, %v5739_v29 }
 0x2ba   : > { %v4607_v61 = vadd.f32 %v8031_v54, %v4606_v63  ;;  %v8037_v25 = vadd.f32 %v6025_v52, %v4232_v13 }
 0x2bb   : > { %v5337_v7 = vpack.c.bf16 %v8034_v59, %v8029_v45  ;;  %v6034_v52 = vadd.f32 %v7892_v24, %v5742_v49 }
 0x2bc   : > { %v5332_v42 = vpack.c.bf16 %v8037_v25, %v8031_v54  ;;  %v4608_v47 = vadd.f32 %v8037_v25, %v4607_v61 }
 0x2bd   : > { %5386 = vst [vmem:[%s7982_s13 + $0x38] sm:$0xff] %v5337_v7   ;;  %v5743_v2 = vpop.f32.mrb[120].mxu0 }
 0x2be   : > { %5385 = vst [vmem:[%s7982_s13 + $0x30] sm:$0xff] %v5332_v42   ;;  %v4609_v11 = vadd.f32 %v8029_v45, %v4608_v47  ;;  %v5933_v8 = vpop.f32.mrb[0].mxu1  ;;  %v5744_v15 = vpop.f32.mrb[121].mxu0  ;;  %v8359_v47 = vld [vmem:[#allocation27_spill] sm:$0xff] }
 0x2bf   : > { %v8049_v17 = vadd.f32 %v6028_v0, %v5933_v8  ;;  %v4245_v4 = vpop.f32.mrb[1].mxu1  ;;  %v5745_v31 = vadd.f32 %v5744_v15, %v5743_v2  ;;  %v5746_v33 = vpop.f32.mrb[122].mxu0 }
 0x2c0   : > { %v8051_v50 = vadd.f32 %v6031_v26, %v4245_v4  ;;  %v4610_v22 = vadd.f32 %v8034_v59, %v4609_v11  ;;  %v5934_v43 = vpop.f32.mrb[2].mxu1  ;;  %v5747_v53 = vpop.f32.mrb[123].mxu0 }
 0x2c1   : > { %v8054_v44 = vadd.f32 %v6034_v52, %v5934_v43  ;;  %v4248_v16 = vpop.f32.mrb[3].mxu1  ;;  %v5748_v37 = vadd.f32 %v5747_v53, %v5746_v33  ;;  %v6043_v12 = vadd.f32 %v7894_v21, %v5745_v31  ;;  %v8360_v52 = vld [vmem:[#allocation28_spill] sm:$0xff] }
 0x2c2   : > { %v4611_v56 = vadd.f32 %v8051_v50, %v4610_v22  ;;  %v8057_v24 = vadd.f32 %v6037_v10, %v4248_v16 }
 0x2c3   : > { %v5347_v38 = vpack.c.bf16 %v8054_v44, %v8049_v17  ;;  %v6049_v10 = vadd.f32 %v7896_v19, %v5748_v37 }
 0x2c4   : > { %v5342_v55 = vpack.c.bf16 %v8057_v24, %v8051_v50  ;;  %v4612_v26 = vadd.f32 %v8057_v24, %v4611_v56 }
 0x2c5   : > { %5388 = vst [vmem:[%s7982_s13 + $0x48] sm:$0xff] %v5347_v38   ;;  %v5749_v63 = vpop.f32.mrb[124].mxu0 }
 0x2c6   : > { %5387 = vst [vmem:[%s7982_s13 + $0x40] sm:$0xff] %v5342_v55   ;;  %v4613_v27 = vadd.f32 %v8049_v17, %v4612_v26  ;;  %v5937_v23 = vpop.f32.mrb[4].mxu1  ;;  %v5750_v29 = vpop.f32.mrb[125].mxu0 }
 0x2c7   : > { %v4261_v5 = vpop.f32.mrb[5].mxu1  ;;  %v5751_v61 = vadd.f32 %v5750_v29, %v5749_v63  ;;  %v5752_v3 = vpop.f32.mrb[126].mxu0 }
 0x2c8   : > { %v8069_v58 = vadd.f32 %v6043_v12, %v4261_v5  ;;  %v4614_v41 = vadd.f32 %v8054_v44, %v4613_v27  ;;  %v5938_v13 = vpop.f32.mrb[6].mxu1  ;;  %v5753_v49 = vpop.f32.mrb[127].mxu0 }
 0x2c9   : > { %v4264_v36 = vpop.f32.mrb[7].mxu1  ;;  %v5754_v42 = vadd.f32 %v5753_v49, %v5752_v3  ;;  %v6040_v19 = vadd.f32 %v8359_v47, %v5751_v61 }
 0x2ca   : > { %v4615_v21 = vadd.f32 %v8069_v58, %v4614_v41  ;;  %v8073_v7 = vadd.f32 %v6049_v10, %v4264_v36  ;;  %v8361_v10 = vld [vmem:[#allocation29_spill] sm:$0xff] }
 0x2cb   : > { %v8079_v8 = vadd.f32 %v6040_v19, %v5937_v23  ;;  %v6046_v4 = vadd.f32 %v8360_v52, %v5754_v42 }
 0x2cc   : > { %v5352_v0 = vpack.c.bf16 %v8073_v7, %v8069_v58  ;;  %v4616_v11 = vadd.f32 %v8073_v7, %v4615_v21 }
 0x2cd   : > { %v5755_v43 = vpop.f32.mrb[128].mxu0  ;;  %v8083_v15 = vadd.f32 %v6046_v4, %v5938_v13 }
 0x2ce   : > { %5389 = vst [vmem:[%s7982_s13 + $0x50] sm:$0xff] %v5352_v0   ;;  %v5941_v2 = vpop.f32.mrb[8].mxu1  ;;  %v4617_v16 = vadd.f32 %v8079_v8, %v4616_v11  ;;  %v5756_v33 = vpop.f32.mrb[129].mxu0 }
 0x2cf   : > { %v4277_v22 = vpop.f32.mrb[9].mxu1  ;;  %v5757_v53 = vadd.f32 %v5756_v33, %v5755_v43  ;;  %v5758_v38 = vpop.f32.mrb[130].mxu0  ;;  %v5357_v37 = vpack.c.bf16 %v8083_v15, %v8079_v8 }
 0x2d0   : > { %v5942_v31 = vpop.f32.mrb[10].mxu1  ;;  %v4618_v55 = vadd.f32 %v8083_v15, %v4617_v16  ;;  %v5759_v26 = vpop.f32.mrb[131].mxu0 }
 0x2d1   : > { %v4280_v56 = vpop.f32.mrb[11].mxu1  ;;  %v5760_v12 = vadd.f32 %v5759_v26, %v5758_v38  ;;  %5390 = vst [vmem:[%s7982_s13 + $0x58] sm:$0xff] %v5357_v37   ;;  %v6055_v27 = vadd.f32 %v7902_v28, %v5757_v53 }
 0x2d3   : > { %v8091_v23 = vadd.f32 %v6055_v27, %v4277_v22  ;;  %v6061_v5 = vadd.f32 %v8361_v10, %v5760_v12 }
 0x2d5   : > { %v5761_v13 = vpop.f32.mrb[132].mxu0  ;;  %v4619_v29 = vadd.f32 %v8091_v23, %v4618_v55  ;;  %v8095_v36 = vadd.f32 %v6061_v5, %v4280_v56 }
 0x2d6   : > { %v5945_v63 = vpop.f32.mrb[12].mxu1  ;;  %v5762_v3 = vpop.f32.mrb[133].mxu0 }
 0x2d7   : > { %v4293_v41 = vpop.f32.mrb[13].mxu1  ;;  %v5763_v49 = vadd.f32 %v5762_v3, %v5761_v13  ;;  %v5764_v42 = vpop.f32.mrb[134].mxu0  ;;  %v5362_v28 = vpack.c.bf16 %v8095_v36, %v8091_v23  ;;  %v4620_v47 = vadd.f32 %v8095_v36, %v4619_v29 }
 0x2d8   : > { %v5946_v61 = vpop.f32.mrb[14].mxu1  ;;  %v5765_v19 = vpop.f32.mrb[135].mxu0 }
 0x2d9   : > { %v4296_v21 = vpop.f32.mrb[15].mxu1  ;;  %v5766_v0 = vadd.f32 %v5765_v19, %v5764_v42  ;;  %v6052_v11 = vadd.f32 %v7906_v1, %v5763_v49  ;;  %5391 = vst [vmem:[%s7982_s13 + $0x60] sm:$0xff] %v5362_v28  }
 0x2db   : > { %v8102_v52 = vadd.f32 %v6052_v11, %v5941_v2  ;;  %v6058_v4 = vadd.f32 %v7908_v9, %v5766_v0 }
 0x2dd   : > { %v8105_v22 = vadd.f32 %v6058_v4, %v5942_v31  ;;  %v5767_v43 = vpop.f32.mrb[136].mxu0  ;;  %v4621_v16 = vadd.f32 %v8102_v52, %v4620_v47 }
 0x2de   : > { %v5768_v33 = vpop.f32.mrb[137].mxu0 }
 0x2df   : > { %v5367_v56 = vpack.c.bf16 %v8105_v22, %v8102_v52  ;;  %v5769_v53 = vadd.f32 %v5768_v33, %v5767_v43  ;;  %v5770_v38 = vpop.f32.mrb[138].mxu0  ;;  %v4622_v37 = vadd.f32 %v8105_v22, %v4621_v16 }
 0x2e0   : > { %v5771_v1 = vpop.f32.mrb[139].mxu0 }
 0x2e1   : > { %5392 = vst [vmem:[%s7982_s13 + $0x68] sm:$0xff] %v5367_v56   ;;  %v5772_v2 = vadd.f32 %v5771_v1, %v5770_v38  ;;  %v6067_v55 = vadd.f32 %v7912_v48, %v5769_v53 }
 0x2e3   : > { %v8113_v9 = vadd.f32 %v6067_v55, %v4293_v41  ;;  %v6073_v31 = vadd.f32 %v7920_v18, %v5772_v2 }
 0x2e5   : > { %v4623_v26 = vadd.f32 %v8113_v9, %v4622_v37  ;;  %v5773_v12 = vpop.f32.mrb[140].mxu0  ;;  %v8117_v27 = vadd.f32 %v6073_v31, %v4296_v21 }
 0x2e6   : > { %v5774_v10 = vpop.f32.mrb[141].mxu0 }
 0x2e7   : > { %v5372_v5 = vpack.c.bf16 %v8117_v27, %v8113_v9  ;;  %v4624_v13 = vadd.f32 %v8117_v27, %v4623_v26  ;;  %v5775_v29 = vadd.f32 %v5774_v10, %v5773_v12  ;;  %v5776_v48 = vpop.f32.mrb[142].mxu0 }
 0x2e8   : > { %v5777_v41 = vpop.f32.mrb[143].mxu0 }
 0x2e9   : > { %5393 = vst [vmem:[%s7982_s13 + $0x70] sm:$0xff] %v5372_v5   ;;  %v6064_v18 = vadd.f32 %v7926_v30, %v5775_v29  ;;  %v5778_v3 = vadd.f32 %v5777_v41, %v5776_v48 }
 0x2eb   : > { %v8124_v49 = vadd.f32 %v6064_v18, %v5945_v63  ;;  %v6070_v21 = vadd.f32 %v7932_v6, %v5778_v3 }
 0x2ed   : > { %v4625_v42 = vadd.f32 %v8124_v49, %v4624_v13  ;;  %v8130_v28 = vadd.f32 %v6070_v21, %v5946_v61 }
 0x2ef   : > { %v5377_v30 = vpack.c.bf16 %v8130_v28, %v8124_v49  ;;  %v4626_v6 = vadd.f32 %v8130_v28, %v4625_v42 }
 0x2f1   : > { %5394 = vst [vmem:[%s7982_s13 + $0x78] sm:$0xff] %v5377_v30   ;;  %v4627_v63 = vrot.slane %v4626_v6, 4 }
 0x2f2   : > { %6552 = shalt.err (!%p6549_p12)
}
 0x2f3   : > { %s6553_s29 = scalar_lea.hbm %s8135_s8, 2048  ;;  %s6557_s7 = scalar_lea.hbm %s8298_s6, 4096 }
 0x2f4   : > { %p6554_p0 = scmp.ne.s32.totalorder %s8135_s8, %s6553_s29  ;;  %p6558_p11 = scmp.lt.u32.totalorder %s8135_s8, %s8298_s6 }
 0x2f5   : > { %p6559_p2 = scmp.lt.u32.totalorder %s6557_s7, %s6553_s29  ;;  %p6561_p5 = scmp.lt.u32.totalorder %s6553_s29, %s8135_s8 }
 0x2f6   : > { %p6555_p4 = pnand %p6554_p0, %p8362_p10 }
 0x2f7   : > { %p6560_p1 = por %p6559_p2, %p6558_p11 }
 0x2f8   : > { %p6556_p7 = pneg %p6555_p4 }
 0x2f9   : > { %p6562_p13 = por %p6561_p5, %p6560_p1 }
 0x2fb   : > { %p6563_p3 = pnand %p6562_p13, %p6556_p7 }
 0x2fd   : > { %6566 = shalt.err (!%p6563_p3)
}
 0x2fe   : > { %s6673_s10 = smov 64   ;;  %s6674_s19 = smov 4   ;;  %v4628_v61 = vadd.f32 %v4627_v63, %v4626_v6 }
 0x2ff   : > { %6133 = dma.vmem_to_hbm [thread:$0]  (%p8362_p10), %s8137_s17, 2048, %s8135_s8, %s4739_s28, %s6673_s10, %s6673_s10, %s6674_s19  }
 0x300   : > { %v4629_v47 = vrot.slane %v4628_v61, 2  ;;  %s4982_s30 = sshll.u32 %s6956_s21, 1  ;;  %s5223_s15 = sshll.u32 %s6653_s25, 5 }
 0x301   : > { %s470_s11 = scalar_lea.vmem [#allocation13], %s4982_s30  ;;  %s8363_s17 = sld [smem:[#allocation31_spill]] }
 0x302   : > { %v4630_v19 = vadd.f32 %v4629_v47, %v4628_v61  ;;  %s4779_s14 = sshll.u32 %s470_s11, 4  ;;  %s4744_s12 = scalar_lea.sflag [#allocation14], %s6956_s21  ;;  %s8243_s14 = int_to_ptr.vmem [resolvable:$true] %s4779_s14 }
 0x303   : > { %s6567_s8 = scalar_lea.vmem %s8243_s14, 32  ;;  %s6675_s25 = smov [#allocation13]  }
 0x304   : > { %v4631_v0 = vrot.slane %v4630_v19, 1  ;;  %p6568_p9 = scmp.ne.s32.totalorder %s8243_s14, %s6567_s8  ;;  %s6571_s28 = sshll.u32 %s6675_s25, 4  ;;  %s6572_s28 = int_to_ptr.vmem [resolvable:$false] %s6571_s28 }
 0x305   : > { %s6573_s1 = scalar_lea.vmem %s6572_s28, 64  ;;  %p6574_p12 = scmp.lt.s32.totalorder %s8243_s14, %s6572_s28 }
 0x306   : > { %v8167_v11 = vadd.f32 %v4631_v0, %v4630_v19  ;;  %p6569_p6 = pnand %p6568_p9, %p8362_p10  ;;  %p6575_p0 = scmp.lt.s32.totalorder %s6573_s1, %s6567_s8 }
 0x307   : > { %s8241_s20 = scalar_lea.hbm %s8363_s17, %s5223_s15 }
 0x308   : > { %v8170_v4 = vmul.f32 0.00390625, %v8167_v11  ;;  %p6570_p8 = pneg %p6569_p6  ;;  %p6576_p4 = por %p6575_p0, %p6574_p12 }
 0x30a   : > { %v4634_v43 = vsub.f32 %v7969_v40, %v8170_v4  ;;  %v4635_v16 = vsub.f32 %v7973_v32, %v8170_v4  ;;  %v4636_v33 = vsub.f32 %v7966_v57, %v8170_v4  ;;  %v4637_v38 = vsub.f32 %v7971_v60, %v8170_v4  ;;  %p6577_p7 = pnand %p6576_p4, %p6570_p8 }
 0x30b   : > { %v4638_v37 = vsub.f32 %v7990_v51, %v8170_v4  ;;  %v4639_v55 = vsub.f32 %v7996_v34, %v8170_v4  ;;  %v4640_v32 = vsub.f32 %v7988_v39, %v8170_v4  ;;  %v4641_v12 = vsub.f32 %v7993_v20, %v8170_v4 }
 0x30c   : > { %v4666_v56 = vmul.f32 %v4634_v43, %v4634_v43  ;;  %v4667_v53 = vmul.f32 %v4635_v16, %v4635_v16  ;;  %v4668_v1 = vmul.f32 %v4636_v33, %v4636_v33  ;;  %v4669_v40 = vmul.f32 %v4637_v38, %v4637_v38 }
 0x30d   : > { %v4670_v26 = vmul.f32 %v4638_v37, %v4638_v37  ;;  %v4671_v10 = vmul.f32 %v4639_v55, %v4639_v55  ;;  %v4642_v51 = vsub.f32 %v8010_v14, %v8170_v4  ;;  %v4672_v5 = vmul.f32 %v4640_v32, %v4640_v32 }
 0x30e   : > { %v4698_v2 = vadd.f32 %v4667_v53, %v4666_v56  ;;  %v4643_v34 = vsub.f32 %v8017_v46, %v8170_v4  ;;  %v4673_v29 = vmul.f32 %v4641_v12, %v4641_v12  ;;  %v4644_v39 = vsub.f32 %v8008_v35, %v8170_v4 }
 0x30f   : > { %v4674_v41 = vmul.f32 %v4642_v51, %v4642_v51  ;;  %v4645_v20 = vsub.f32 %v8013_v62, %v8170_v4  ;;  %v4646_v14 = vsub.f32 %v8031_v54, %v8170_v4  ;;  %v4647_v46 = vsub.f32 %v8037_v25, %v8170_v4 }
 0x310   : > { %v4699_v31 = vadd.f32 %v4698_v2, %v4668_v1  ;;  %v4675_v3 = vmul.f32 %v4643_v34, %v4643_v34  ;;  %v4676_v42 = vmul.f32 %v4644_v39, %v4644_v39  ;;  %v4648_v35 = vsub.f32 %v8029_v45, %v8170_v4 }
 0x311   : > { %v4677_v6 = vmul.f32 %v4645_v20, %v4645_v20  ;;  %v4678_v61 = vmul.f32 %v4646_v14, %v4646_v14  ;;  %v4649_v62 = vsub.f32 %v8034_v59, %v8170_v4  ;;  %v4679_v19 = vmul.f32 %v4647_v46, %v4647_v46 }
 0x312   : > { %v4700_v57 = vadd.f32 %v4699_v31, %v4669_v40  ;;  %v4650_v54 = vsub.f32 %v8051_v50, %v8170_v4  ;;  %v4680_v43 = vmul.f32 %v4648_v35, %v4648_v35  ;;  %v4651_v25 = vsub.f32 %v8057_v24, %v8170_v4 }
 0x313   : > { %v4681_v33 = vmul.f32 %v4649_v62, %v4649_v62  ;;  %v4652_v45 = vsub.f32 %v8049_v17, %v8170_v4  ;;  %v4653_v59 = vsub.f32 %v8054_v44, %v8170_v4  ;;  %v4654_v50 = vsub.f32 %v8069_v58, %v8170_v4 }
 0x314   : > { %v4701_v60 = vadd.f32 %v4700_v57, %v4670_v26  ;;  %v4682_v53 = vmul.f32 %v4650_v54, %v4650_v54  ;;  %v4683_v37 = vmul.f32 %v4651_v25, %v4651_v25  ;;  %v4655_v24 = vsub.f32 %v8073_v7, %v8170_v4 }
 0x315   : > { %v4684_v2 = vmul.f32 %v4652_v45, %v4652_v45  ;;  %v4685_v40 = vmul.f32 %v4653_v59, %v4653_v59  ;;  %v4656_v17 = vsub.f32 %v8079_v8, %v8170_v4  ;;  %v4686_v32 = vmul.f32 %v4654_v50, %v4654_v50 }
 0x316   : > { %v4702_v13 = vadd.f32 %v4701_v60, %v4671_v10  ;;  %v4657_v44 = vsub.f32 %v8083_v15, %v8170_v4  ;;  %v4687_v57 = vmul.f32 %v4655_v24, %v4655_v24  ;;  %v4658_v58 = vsub.f32 %v8091_v23, %v8170_v4 }
 0x317   : > { %v4688_v10 = vmul.f32 %v4656_v17, %v4656_v17  ;;  %v4659_v7 = vsub.f32 %v8095_v36, %v8170_v4  ;;  %v4660_v8 = vsub.f32 %v8102_v52, %v8170_v4  ;;  %v4661_v15 = vsub.f32 %v8105_v22, %v8170_v4 }
 0x318   : > { %v4703_v48 = vadd.f32 %v4702_v13, %v4672_v5  ;;  %v4689_v51 = vmul.f32 %v4657_v44, %v4657_v44  ;;  %v4690_v13 = vmul.f32 %v4658_v58, %v4658_v58  ;;  %v4662_v23 = vsub.f32 %v8113_v9, %v8170_v4 }
 0x319   : > { %v4692_v39 = vmul.f32 %v4660_v8, %v4660_v8  ;;  %v4663_v36 = vsub.f32 %v8117_v27, %v8170_v4  ;;  %v4664_v52 = vsub.f32 %v8124_v49, %v8170_v4  ;;  %v4665_v22 = vsub.f32 %v8130_v28, %v8170_v4 }
 0x31a   : > { %v4704_v18 = vadd.f32 %v4703_v48, %v4673_v29  ;;  %v4691_v29 = vmul.f32 %v4659_v7, %v4659_v7 }
 0x31b   : > { %v4695_v14 = vmul.f32 %v4663_v36, %v4663_v36  ;;  %v4696_v9 = vmul.f32 %v4664_v52, %v4664_v52  ;;  %v4697_v46 = vmul.f32 %v4665_v22, %v4665_v22 }
 0x31c   : > { %v4705_v21 = vadd.f32 %v4704_v18, %v4674_v41  ;;  %v4693_v18 = vmul.f32 %v4661_v15, %v4661_v15 }
 0x31e   : > { %v4706_v30 = vadd.f32 %v4705_v21, %v4675_v3  ;;  %v4694_v3 = vmul.f32 %v4662_v23, %v4662_v23 }
 0x320   : > { %v4707_v63 = vadd.f32 %v4706_v30, %v4676_v42 }
 0x322   : > { %v4708_v47 = vadd.f32 %v4707_v63, %v4677_v6 }
 0x324   : > { %v4709_v0 = vadd.f32 %v4708_v47, %v4678_v61 }
 0x326   : > { %v4710_v16 = vadd.f32 %v4709_v0, %v4679_v19 }
 0x328   : > { %v4711_v56 = vadd.f32 %v4710_v16, %v4680_v43 }
 0x32a   : > { %v4712_v38 = vadd.f32 %v4711_v56, %v4681_v33 }
 0x32c   : > { %v4713_v1 = vadd.f32 %v4712_v38, %v4682_v53 }
 0x32e   : > { %v4714_v55 = vadd.f32 %v4713_v1, %v4683_v37 }
 0x330   : > { %v4715_v31 = vadd.f32 %v4714_v55, %v4684_v2 }
 0x332   : > { %v4716_v26 = vadd.f32 %v4715_v31, %v4685_v40 }
 0x334   : > { %v4717_v12 = vadd.f32 %v4716_v26, %v4686_v32 }
 0x336   : > { %v4718_v60 = vadd.f32 %v4717_v12, %v4687_v57 }
 0x338   : > { %v4719_v5 = vadd.f32 %v4718_v60, %v4688_v10 }
 0x33a   : > { %v4720_v34 = vadd.f32 %v4719_v5, %v4689_v51 }
 0x33c   : > { %v4721_v48 = vadd.f32 %v4720_v34, %v4690_v13 }
 0x33e   : > { %v4722_v41 = vadd.f32 %v4721_v48, %v4691_v29 }
 0x340   : > { %v4723_v20 = vadd.f32 %v4722_v41, %v4692_v39 }
 0x342   : > { %v4724_v21 = vadd.f32 %v4723_v20, %v4693_v18 }
 0x344   : > { %v4725_v42 = vadd.f32 %v4724_v21, %v4694_v3 }
 0x346   : > { %v4726_v30 = vadd.f32 %v4725_v42, %v4695_v14 }
 0x348   : > { %v4727_v6 = vadd.f32 %v4726_v30, %v4696_v9 }
 0x34a   : > { %v4728_v27 = vadd.f32 %v4727_v6, %v4697_v46 }
 0x34c   : > { %v4729_v63 = vrot.slane %v4728_v27, 4 }
 0x34e   : > { %v4730_v35 = vadd.f32 %v4729_v63, %v4728_v27 }
 0x350   : > { %v4731_v61 = vrot.slane %v4730_v35, 2 }
 0x352   : > { %v4732_v49 = vadd.f32 %v4731_v61, %v4730_v35 }
 0x354   : > { %v4733_v47 = vrot.slane %v4732_v49, 1 }
 0x356   : > { %v4734_v62 = vadd.f32 %v4733_v47, %v4732_v49 }
 0x358   : > { %v4736_v28 = vsel %vm941_vm4, %v8167_v11, %v4734_v62 }
 0x359   : > { %4737 = vst [vmem:[%s470_s11] sm:$0x3] %v4736_v28 }
 0x35a   : > { %6580 = shalt.err (!%p6577_p7)
}
 0x35b   : > { %s6581_s21 = scalar_lea.hbm %s8241_s20, 32  ;;  %s6585_s23 = scalar_lea.hbm %s8363_s17, 64 }
 0x35c   : > { %p6582_p11 = scmp.ne.s32.totalorder %s8241_s20, %s6581_s21  ;;  %p6586_p5 = scmp.lt.u32.totalorder %s8241_s20, %s8363_s17 }
 0x35d   : > { %p6587_p13 = scmp.lt.u32.totalorder %s6585_s23, %s6581_s21  ;;  %p6589_p9 = scmp.lt.u32.totalorder %s6581_s21, %s8241_s20 }
 0x35e   : > { %p6583_p2 = pnand %p6582_p11, %p8362_p10 }
 0x35f   : > { %p6588_p3 = por %p6587_p13, %p6586_p5 }
 0x360   : > { %p6584_p1 = pneg %p6583_p2 }
 0x361   : > { %p6590_p6 = por %p6589_p9, %p6588_p3 }
 0x363   : > { %p6591_p8 = pnand %p6590_p6, %p6584_p1 }
 0x365   : > { %6594 = shalt.err (!%p6591_p8)
}
 0x366   : > { %6134 = dma.vmem_to_hbm [thread:$0]  (%p8362_p10), %s8243_s14, 32, %s8241_s20, %s4744_s12  }
 0x367 PF: > { %s8364_s24 = sld [smem:[#allocation20_spill]]  ;;  %s8365_s7 = sld [smem:[#allocation26_spill]] }
 0x368   : > { %s8366_s27 = sld [smem:[#allocation23_spill]] }
 0x36d   : > { %s4791_s18 = sand.u32 1, %s8364_s24   ;;  %p8367_p12 = scmp.ne.s32.totalorder %s8365_s7, 0 }
 0x36e   : > { %p8368_p0 = scmp.ge.s32.totalorder %s8366_s27, 2  ;;  %s4792_s10 = scalar_lea.sflag [#allocation6], %s4791_s18 }
 0x370   : > { %p6152_p4 = pnand %p8368_p0, %p8367_p12 }
 0x372   : > { %6632 = dma.done.wait (!%p6152_p4), %s4792_s10, 2048  }
 0x373   : > { %6634 = vsyncadd (!%p6152_p4), %s4792_s10, 4294965248  ;;  %s4801_s19 = scalar_lea.sflag [#allocation14], %s4791_s18 }
 0x374   : > { %6636 = dma.done.wait (!%p6152_p4), %s4801_s19, 32  }
 0x375   : > { %6638 = vsyncadd (!%p6152_p4), %s4801_s19, 4294967264  ;;  %s31_s27 = sadd.s32 1, %s8366_s27   ;;  %s8369_s16 = sld [smem:[#allocation21_spill]] }
 0x376   : > { %p28_p7 = scmp.ge.s32.totalorder %s31_s27, 4   ;;  %s8370_s5 = sld [smem:[#allocation25_spill]] }
 0x377   : > { %s8371_s25 = sld [smem:[#allocation22_spill]]  ;;  %s8372_s26 = sld [smem:[#allocation24_spill]] }
 0x378   : > { %s8373_s24 = smov %s6645_s4  ;;  %30 = sbr.rel (!%p28_p7) target bundleno = 14 (0xe), region = 144 }
 0x37b   : > { %s8374_s4 = smov %s8369_s16 }
 0x37f   :  { %4806 = vsyncpa [#allocation5], 1 }
 0x380   :  { %4808 = vsyncpa [#allocation5 + $0x1], 1 }
 0x381   :  { %4809 = vsyncpa [#allocation8], 1 }
 0x382   :  { %4811 = vsyncpa [#allocation8 + $0x1], 1 }
 0x383   :  { %4812 = vsyncpa [#allocation11], 1 }
 0x384   :  { %4813 = vsyncpa [#allocation6], 1 }
 0x385   :  { %4815 = vsyncpa [#allocation6 + $0x1], 1 }
 0x386   :  { %4816 = vsyncpa [#allocation14], 1 }
 0x387   :  { %4818 = vsyncpa [#allocation14 + $0x1], 1 }

</bundles_post_ra>
